<compile_context>
chip_gen: v7x
topology: tpu7x:2x2x1
jax: 0.10.0
libtpu: 0.0.40
codegen_flags: <defaults>
</compile_context>

<pallas_src>
import numpy as np
import jax
import jax.numpy as jnp
from jax import lax
from jax.experimental import pallas as pl
from jax.experimental.pallas import tpu as pltpu

BN_EPS = 1e-5
LRELU_SLOPE = 0.2
KERNEL = 4
STRIDE = 2


# ---------------------------------------------------------------------------
# Fused Pallas kernel: conv1 + BN + LReLU -> conv2 + BN + LReLU -> conv3
# ---------------------------------------------------------------------------
def _tree_sum(xs):
    """Balanced pairwise sum (avoids a long serial accumulation chain)."""
    while len(xs) > 1:
        nxt = [xs[i] + xs[i + 1] for i in range(0, len(xs) - 1, 2)]
        if len(xs) % 2:
            nxt.append(xs[-1])
        xs = nxt
    return xs[0]


def _disc_fused_kernel(p1c_ref, p1d_ref, w1_ref, b1_ref, g1_ref, be1_ref,
                       w2_ref, b2_ref, g2_ref, be2_ref,
                       w3sel_ref, bsel_ref, b3_ref, o_ref):
    f32 = jnp.float32
    w1 = w1_ref[...]
    b1 = b1_ref[...]

    # ---- block 1 statistics: canonical pass (every conv1 output exactly once)
    y1c = jnp.dot(p1c_ref[...], w1, preferred_element_type=f32) + b1   # (M1, C1)
    inv_m1 = 1.0 / y1c.shape[0]
    mean1 = jnp.sum(y1c, axis=0, keepdims=True) * inv_m1
    var1 = jnp.sum(y1c * y1c, axis=0, keepdims=True) * inv_m1 - mean1 * mean1
    var1 = jnp.maximum(var1, 0.0)                       # guard one-pass cancellation
    scale1 = g1_ref[...] * lax.rsqrt(var1 + BN_EPS)     # folded BN affine
    shift1 = be1_ref[...] - mean1 * scale1

    # ---- block 2: per-tap conv1(dup rows) -> BN1 + LReLU -> @ w2[tap]
    # p1d_ref: (taps, M2, k*k*cin); w2_ref: (taps, C1, C2). Only real data here —
    # no gather matrices, no wasted MXU passes.
    contribs = []
    for t in range(p1d_ref.shape[0]):
        y1t = jnp.dot(p1d_ref[t], w1, preferred_element_type=f32) + b1   # (M2, C1)
        z1t = y1t * scale1 + shift1
        a1t = jnp.maximum(z1t, LRELU_SLOPE * z1t)                        # LeakyReLU
        contribs.append(jnp.dot(a1t, w2_ref[t], preferred_element_type=f32))
    y2 = _tree_sum(contribs) + b2_ref[...]                               # (M2, C2)

    inv_m2 = 1.0 / y2.shape[0]
    mean2 = jnp.sum(y2, axis=0, keepdims=True) * inv_m2
    var2 = jnp.sum(y2 * y2, axis=0, keepdims=True) * inv_m2 - mean2 * mean2
    var2 = jnp.maximum(var2, 0.0)
    z2 = (y2 - mean2) * (g2_ref[...] * lax.rsqrt(var2 + BN_EPS)) + be2_ref[...]
    act2 = jnp.maximum(z2, LRELU_SLOPE * z2)                             # (M2, C2)

    # ---- block 3: final conv (Cout=1, 1x1 output) as VPU MAC.
    # w3sel holds the conv-3 weight of the tap that each (batch, 5x5-position)
    # row feeds (zero for unused positions); bsel sums rows per batch element.
    prod = act2 * w3sel_ref[...]                                         # (M2, C2)
    per_row = jnp.sum(prod, axis=1, keepdims=True)                       # (M2, 1)
    out = jnp.sum(per_row * bsel_ref[...], axis=0, keepdims=True)        # (1, N)
    o_ref[...] = out + b3_ref[...]                                       # lane-dense


# ---------------------------------------------------------------------------
# Wrapper glue (trace-time only, all O(batch))
# ---------------------------------------------------------------------------
def _vmem():
    return pl.BlockSpec(memory_space=pltpu.MemorySpace.VMEM)


def _conv1_patches(x_nhwc, kh, kw, stride):
    """Conv-1 im2col patches kept 4-D: (n, oh, ow, kh*kw*c)."""
    n, h, w, c = x_nhwc.shape
    oh = (h - kh) // stride + 1
    ow = (w - kw) // stride + 1
    cols = []
    for i in range(kh):
        for j in range(kw):
            cols.append(x_nhwc[:, i:i + stride * oh:stride,
                               j:j + stride * ow:stride, :])
    return jnp.concatenate(cols, axis=-1), oh, ow


def discriminator_forward(x_nchw, params):
    p1, p2, p3 = params
    k, s = KERNEL, STRIDE
    x = jnp.transpose(x_nchw, (0, 2, 3, 1)).astype(jnp.float32)          # NHWC
    n, cin = x.shape[0], x.shape[-1]
    c1 = p1["w"].shape[0]
    c2 = p2["w"].shape[0]

    pat1, oh1, ow1 = _conv1_patches(x, k, k, s)          # (n, 13, 13, k*k*cin)
    oh2, ow2 = (oh1 - k) // s + 1, (ow1 - k) // s + 1    # 5, 5
    oh3, ow3 = (oh2 - k) // s + 1, (ow2 - k) // s + 1    # 1, 1
    assert oh3 == 1 and ow3 == 1, "MNIST branch: final conv must reduce to 1x1"
    m2 = n * oh2 * ow2

    # Canonical conv-1 patches: used only for BatchNorm-1 statistics.
    p1c = pat1.reshape(n * oh1 * ow1, k * k * cin)

    # Tap-duplicated conv-1 patches (static strided slices, no dense selector):
    # p1d[t, (b,y2,x2), :] = conv-1 patch at input position (2*y2+i, 2*x2+j).
    taps = []
    for i in range(k):
        for j in range(k):
            sl = pat1[:, i:i + s * oh2:s, j:j + s * ow2:s, :]            # (n,5,5,kkc)
            taps.append(sl.reshape(1, m2, k * k * cin))
    p1d = jnp.concatenate(taps, axis=0)                                  # (16, m2, kkc)

    # Weight reshapes (tap-major, matches PyTorch OIHW layout).
    w1 = jnp.transpose(p1["w"], (2, 3, 1, 0)).reshape(k * k * cin, c1)
    w2t = jnp.transpose(p2["w"], (2, 3, 1, 0)).reshape(k * k, c1, c2)
    w3_taps = jnp.transpose(p3["w"], (2, 3, 1, 0)).reshape(k * k, c2)    # (16, c2)

    # Conv-3: scatter the 16 tap weights onto the 5x5 act2 grid (zeros at the
    # unused row/col 4), tiled over batch -> a pure VPU MAC in the kernel.
    pos2tap = np.zeros((oh2 * ow2, k * k), np.float32)
    for i in range(k):
        for j in range(k):
            pos2tap[i * ow2 + j, i * k + j] = 1.0
    w3sel = jnp.tile(jnp.asarray(pos2tap) @ w3_taps, (n, 1))             # (m2, c2)

    # Per-batch row-group selector (block-diagonal over batch). 25*4B*n^2 —
    # tiny for any realistic DCGAN batch.
    bsel = jnp.asarray(np.kron(np.eye(n, dtype=np.float32),
                               np.ones((oh2 * ow2, 1), np.float32)))     # (m2, n)

    args = (
        p1c, p1d, w1,
        p1["b"].reshape(1, c1), p1["gamma"].reshape(1, c1), p1["beta"].reshape(1, c1),
        w2t,
        p2["b"].reshape(1, c2), p2["gamma"].reshape(1, c2), p2["beta"].reshape(1, c2),
        w3sel, bsel, p3["b"].reshape(1, 1),
    )
    out = pl.pallas_call(
        _disc_fused_kernel,
        out_shape=jax.ShapeDtypeStruct((1, n), jnp.float32),   # lane-dense store
        in_specs=[_vmem() for _ in args],
        out_specs=_vmem(),
    )(*args)
    # Final conv is 1x1 with Cout=1, so view(N, -1) == (N, 1).
    return jnp.transpose(out)


# ---------------------------------------------------------------------------
# Parameters + pure-JAX reference
# ---------------------------------------------------------------------------
def init_params(key, im_channel=1, hidden_dim=32):
    specs = [(im_channel, hidden_dim), (hidden_dim, hidden_dim * 2),
             (hidden_dim * 2, 1)]
    params = []
    for cin, cout in specs:
        key, k1, k2, k3, k4 = jax.random.split(key, 5)
        params.append(dict(
            w=jax.random.normal(k1, (cout, cin, KERNEL, KERNEL), jnp.float32) * 0.05,
            b=jax.random.normal(k2, (cout,), jnp.float32) * 0.05,
            gamma=1.0 + 0.1 * jax.random.normal(k3, (cout,), jnp.float32),
            beta=0.1 * jax.random.normal(k4, (cout,), jnp.float32)))
    return params


def reference_forward(x_nchw, params):
    x = jnp.transpose(x_nchw, (0, 2, 3, 1)).astype(jnp.float32)
    for idx, p in enumerate(params):
        w_hwio = jnp.transpose(p["w"], (2, 3, 1, 0))
        y = lax.conv_general_dilated(
            x, w_hwio, (STRIDE, STRIDE), "VALID",
            dimension_numbers=("NHWC", "HWIO", "NHWC")) + p["b"]
        if idx != len(params) - 1:
            mean = jnp.mean(y, axis=(0, 1, 2))
            var = jnp.mean(jnp.square(y - mean), axis=(0, 1, 2))
            y = (y - mean) * lax.rsqrt(var + BN_EPS) * p["gamma"] + p["beta"]
            y = jnp.where(y >= 0, y, LRELU_SLOPE * y)
        x = y
    x = jnp.transpose(x, (0, 3, 1, 2))
    return x.reshape(x.shape[0], -1)


if __name__ == "__main__":
    key = jax.random.PRNGKey(0)
    k_x, k_p = jax.random.split(key)

    # MNIST-consistent small shapes: batch=2, channels=1, 28x28, hidden_dim=32.
    x = jax.random.normal(k_x, (2, 1, 28, 28), jnp.float32)
    params = init_params(k_p, im_channel=1, hidden_dim=32)

    fwd = jax.jit(discriminator_forward)
    out = jax.block_until_ready(fwd(x, params))

    ref = jax.block_until_ready(reference_forward(x, params))
    assert out.shape == (2, 1), f"unexpected output shape {out.shape}"
    assert jnp.allclose(out, ref, atol=1e-4, rtol=1e-4), (out, ref)

    print("KERNEL_OK")
</pallas_src>

<mosaic_0001>
module attributes {stable_mosaic.version = 11 : i64} {
  func.func @_disc_fused_kernel(%arg0: memref<338x16xf32, #tpu.memory_space<vmem>>, %arg1: memref<16x50x16xf32, #tpu.memory_space<vmem>>, %arg2: memref<16x32xf32, #tpu.memory_space<vmem>>, %arg3: memref<1x32xf32, #tpu.memory_space<vmem>>, %arg4: memref<1x32xf32, #tpu.memory_space<vmem>>, %arg5: memref<1x32xf32, #tpu.memory_space<vmem>>, %arg6: memref<16x32x64xf32, #tpu.memory_space<vmem>>, %arg7: memref<1x64xf32, #tpu.memory_space<vmem>>, %arg8: memref<1x64xf32, #tpu.memory_space<vmem>>, %arg9: memref<1x64xf32, #tpu.memory_space<vmem>>, %arg10: memref<50x64xf32, #tpu.memory_space<vmem>>, %arg11: memref<50x2xf32, #tpu.memory_space<vmem>>, %arg12: memref<1x1xf32, #tpu.memory_space<vmem>>, %arg13: memref<1x2xf32, #tpu.memory_space<vmem>>) attributes {dimension_semantics = [], scalar_prefetch = 0 : i64, scratch_operands = 0 : i64, tpu.core_type = #tpu.core_type<tc>} {
    %c0 = arith.constant 0 : index
    %c0_0 = arith.constant 0 : index
    %0 = vector.load %arg2[%c0, %c0_0] : memref<16x32xf32, #tpu.memory_space<vmem>>, vector<16x32xf32>
    %c0_1 = arith.constant 0 : index
    %c0_2 = arith.constant 0 : index
    %1 = vector.load %arg3[%c0_1, %c0_2] : memref<1x32xf32, #tpu.memory_space<vmem>>, vector<1x32xf32>
    %c0_3 = arith.constant 0 : index
    %c0_4 = arith.constant 0 : index
    %2 = vector.load %arg0[%c0_3, %c0_4] : memref<338x16xf32, #tpu.memory_space<vmem>>, vector<338x16xf32>
    %cst = arith.constant dense<0.000000e+00> : vector<338x32xf32>
    %3 = tpu.matmul %2, %0, %cst {dimension_numbers = #tpu.dot_dimension_numbers<[1], [0], [0], [1], [0, 0, 1, 1], [], []>} : vector<338x16xf32>, vector<16x32xf32>, vector<338x32xf32> -> vector<338x32xf32>
    %4 = vector.broadcast %1 : vector<1x32xf32> to vector<338x32xf32>
    %5 = arith.addf %3, %4 : vector<338x32xf32>
    %cst_5 = arith.constant dense<0.000000e+00> : vector<32xf32>
    %6 = vector.multi_reduction <add>, %5, %cst_5 [0] : vector<338x32xf32> to vector<32xf32>
    %7 = vector.shape_cast %6 : vector<32xf32> to vector<1x32xf32>
    %cst_6 = arith.constant 2.958580e-03 : f32
    %8 = vector.broadcast %cst_6 : f32 to vector<1x32xf32>
    %9 = arith.mulf %7, %8 : vector<1x32xf32>
    %10 = arith.mulf %5, %5 : vector<338x32xf32>
    %cst_7 = arith.constant dense<0.000000e+00> : vector<32xf32>
    %11 = vector.multi_reduction <add>, %10, %cst_7 [0] : vector<338x32xf32> to vector<32xf32>
    %12 = vector.shape_cast %11 : vector<32xf32> to vector<1x32xf32>
    %cst_8 = arith.constant 2.958580e-03 : f32
    %13 = vector.broadcast %cst_8 : f32 to vector<1x32xf32>
    %14 = arith.mulf %12, %13 : vector<1x32xf32>
    %15 = arith.mulf %9, %9 : vector<1x32xf32>
    %16 = arith.subf %14, %15 : vector<1x32xf32>
    %cst_9 = arith.constant 0.000000e+00 : f32
    %17 = vector.broadcast %cst_9 : f32 to vector<1x32xf32>
    %18 = arith.maximumf %16, %17 : vector<1x32xf32>
    %c0_10 = arith.constant 0 : index
    %c0_11 = arith.constant 0 : index
    %19 = vector.load %arg4[%c0_10, %c0_11] : memref<1x32xf32, #tpu.memory_space<vmem>>, vector<1x32xf32>
    %cst_12 = arith.constant 9.99999974E-6 : f32
    %20 = vector.broadcast %cst_12 : f32 to vector<1x32xf32>
    %21 = arith.addf %18, %20 : vector<1x32xf32>
    %22 = math.rsqrt %21 : vector<1x32xf32>
    %23 = arith.mulf %19, %22 : vector<1x32xf32>
    %c0_13 = arith.constant 0 : index
    %c0_14 = arith.constant 0 : index
    %24 = vector.load %arg5[%c0_13, %c0_14] : memref<1x32xf32, #tpu.memory_space<vmem>>, vector<1x32xf32>
    %25 = arith.mulf %9, %23 : vector<1x32xf32>
    %26 = arith.subf %24, %25 : vector<1x32xf32>
    %c0_15 = arith.constant 0 : index
    %c0_16 = arith.constant 0 : index
    %c0_17 = arith.constant 0 : index
    %27 = vector.load %arg1[%c0_15, %c0_16, %c0_17] : memref<16x50x16xf32, #tpu.memory_space<vmem>>, vector<1x50x16xf32>
    %28 = vector.shape_cast %27 : vector<1x50x16xf32> to vector<50x16xf32>
    %cst_18 = arith.constant dense<0.000000e+00> : vector<50x32xf32>
    %29 = tpu.matmul %28, %0, %cst_18 {dimension_numbers = #tpu.dot_dimension_numbers<[1], [0], [0], [1], [0, 0, 1, 1], [], []>} : vector<50x16xf32>, vector<16x32xf32>, vector<50x32xf32> -> vector<50x32xf32>
    %30 = vector.broadcast %1 : vector<1x32xf32> to vector<50x32xf32>
    %31 = arith.addf %29, %30 : vector<50x32xf32>
    %32 = vector.broadcast %23 : vector<1x32xf32> to vector<50x32xf32>
    %33 = arith.mulf %31, %32 : vector<50x32xf32>
    %34 = vector.broadcast %26 : vector<1x32xf32> to vector<50x32xf32>
    %35 = arith.addf %33, %34 : vector<50x32xf32>
    %cst_19 = arith.constant 2.000000e-01 : f32
    %36 = vector.broadcast %cst_19 : f32 to vector<50x32xf32>
    %37 = arith.mulf %36, %35 : vector<50x32xf32>
    %38 = arith.maximumf %35, %37 : vector<50x32xf32>
    %c0_20 = arith.constant 0 : index
    %c0_21 = arith.constant 0 : index
    %c0_22 = arith.constant 0 : index
    %39 = vector.load %arg6[%c0_20, %c0_21, %c0_22] : memref<16x32x64xf32, #tpu.memory_space<vmem>>, vector<1x32x64xf32>
    %40 = vector.shape_cast %39 : vector<1x32x64xf32> to vector<32x64xf32>
    %cst_23 = arith.constant dense<0.000000e+00> : vector<50x64xf32>
    %41 = tpu.matmul %38, %40, %cst_23 {dimension_numbers = #tpu.dot_dimension_numbers<[1], [0], [0], [1], [0, 0, 1, 1], [], []>} : vector<50x32xf32>, vector<32x64xf32>, vector<50x64xf32> -> vector<50x64xf32>
    %c1 = arith.constant 1 : index
    %c0_24 = arith.constant 0 : index
    %c0_25 = arith.constant 0 : index
    %42 = vector.load %arg1[%c1, %c0_24, %c0_25] : memref<16x50x16xf32, #tpu.memory_space<vmem>>, vector<1x50x16xf32>
    %43 = vector.shape_cast %42 : vector<1x50x16xf32> to vector<50x16xf32>
    %cst_26 = arith.constant dense<0.000000e+00> : vector<50x32xf32>
    %44 = tpu.matmul %43, %0, %cst_26 {dimension_numbers = #tpu.dot_dimension_numbers<[1], [0], [0], [1], [0, 0, 1, 1], [], []>} : vector<50x16xf32>, vector<16x32xf32>, vector<50x32xf32> -> vector<50x32xf32>
    %45 = vector.broadcast %1 : vector<1x32xf32> to vector<50x32xf32>
    %46 = arith.addf %44, %45 : vector<50x32xf32>
    %47 = vector.broadcast %23 : vector<1x32xf32> to vector<50x32xf32>
    %48 = arith.mulf %46, %47 : vector<50x32xf32>
    %49 = vector.broadcast %26 : vector<1x32xf32> to vector<50x32xf32>
    %50 = arith.addf %48, %49 : vector<50x32xf32>
    %cst_27 = arith.constant 2.000000e-01 : f32
    %51 = vector.broadcast %cst_27 : f32 to vector<50x32xf32>
    %52 = arith.mulf %51, %50 : vector<50x32xf32>
    %53 = arith.maximumf %50, %52 : vector<50x32xf32>
    %c1_28 = arith.constant 1 : index
    %c0_29 = arith.constant 0 : index
    %c0_30 = arith.constant 0 : index
    %54 = vector.load %arg6[%c1_28, %c0_29, %c0_30] : memref<16x32x64xf32, #tpu.memory_space<vmem>>, vector<1x32x64xf32>
    %55 = vector.shape_cast %54 : vector<1x32x64xf32> to vector<32x64xf32>
    %cst_31 = arith.constant dense<0.000000e+00> : vector<50x64xf32>
    %56 = tpu.matmul %53, %55, %cst_31 {dimension_numbers = #tpu.dot_dimension_numbers<[1], [0], [0], [1], [0, 0, 1, 1], [], []>} : vector<50x32xf32>, vector<32x64xf32>, vector<50x64xf32> -> vector<50x64xf32>
    %c2 = arith.constant 2 : index
    %c0_32 = arith.constant 0 : index
    %c0_33 = arith.constant 0 : index
    %57 = vector.load %arg1[%c2, %c0_32, %c0_33] : memref<16x50x16xf32, #tpu.memory_space<vmem>>, vector<1x50x16xf32>
    %58 = vector.shape_cast %57 : vector<1x50x16xf32> to vector<50x16xf32>
    %cst_34 = arith.constant dense<0.000000e+00> : vector<50x32xf32>
    %59 = tpu.matmul %58, %0, %cst_34 {dimension_numbers = #tpu.dot_dimension_numbers<[1], [0], [0], [1], [0, 0, 1, 1], [], []>} : vector<50x16xf32>, vector<16x32xf32>, vector<50x32xf32> -> vector<50x32xf32>
    %60 = vector.broadcast %1 : vector<1x32xf32> to vector<50x32xf32>
    %61 = arith.addf %59, %60 : vector<50x32xf32>
    %62 = vector.broadcast %23 : vector<1x32xf32> to vector<50x32xf32>
    %63 = arith.mulf %61, %62 : vector<50x32xf32>
    %64 = vector.broadcast %26 : vector<1x32xf32> to vector<50x32xf32>
    %65 = arith.addf %63, %64 : vector<50x32xf32>
    %cst_35 = arith.constant 2.000000e-01 : f32
    %66 = vector.broadcast %cst_35 : f32 to vector<50x32xf32>
    %67 = arith.mulf %66, %65 : vector<50x32xf32>
    %68 = arith.maximumf %65, %67 : vector<50x32xf32>
    %c2_36 = arith.constant 2 : index
    %c0_37 = arith.constant 0 : index
    %c0_38 = arith.constant 0 : index
    %69 = vector.load %arg6[%c2_36, %c0_37, %c0_38] : memref<16x32x64xf32, #tpu.memory_space<vmem>>, vector<1x32x64xf32>
    %70 = vector.shape_cast %69 : vector<1x32x64xf32> to vector<32x64xf32>
    %cst_39 = arith.constant dense<0.000000e+00> : vector<50x64xf32>
    %71 = tpu.matmul %68, %70, %cst_39 {dimension_numbers = #tpu.dot_dimension_numbers<[1], [0], [0], [1], [0, 0, 1, 1], [], []>} : vector<50x32xf32>, vector<32x64xf32>, vector<50x64xf32> -> vector<50x64xf32>
    %c3 = arith.constant 3 : index
    %c0_40 = arith.constant 0 : index
    %c0_41 = arith.constant 0 : index
    %72 = vector.load %arg1[%c3, %c0_40, %c0_41] : memref<16x50x16xf32, #tpu.memory_space<vmem>>, vector<1x50x16xf32>
    %73 = vector.shape_cast %72 : vector<1x50x16xf32> to vector<50x16xf32>
    %cst_42 = arith.constant dense<0.000000e+00> : vector<50x32xf32>
    %74 = tpu.matmul %73, %0, %cst_42 {dimension_numbers = #tpu.dot_dimension_numbers<[1], [0], [0], [1], [0, 0, 1, 1], [], []>} : vector<50x16xf32>, vector<16x32xf32>, vector<50x32xf32> -> vector<50x32xf32>
    %75 = vector.broadcast %1 : vector<1x32xf32> to vector<50x32xf32>
    %76 = arith.addf %74, %75 : vector<50x32xf32>
    %77 = vector.broadcast %23 : vector<1x32xf32> to vector<50x32xf32>
    %78 = arith.mulf %76, %77 : vector<50x32xf32>
    %79 = vector.broadcast %26 : vector<1x32xf32> to vector<50x32xf32>
    %80 = arith.addf %78, %79 : vector<50x32xf32>
    %cst_43 = arith.constant 2.000000e-01 : f32
    %81 = vector.broadcast %cst_43 : f32 to vector<50x32xf32>
    %82 = arith.mulf %81, %80 : vector<50x32xf32>
    %83 = arith.maximumf %80, %82 : vector<50x32xf32>
    %c3_44 = arith.constant 3 : index
    %c0_45 = arith.constant 0 : index
    %c0_46 = arith.constant 0 : index
    %84 = vector.load %arg6[%c3_44, %c0_45, %c0_46] : memref<16x32x64xf32, #tpu.memory_space<vmem>>, vector<1x32x64xf32>
    %85 = vector.shape_cast %84 : vector<1x32x64xf32> to vector<32x64xf32>
    %cst_47 = arith.constant dense<0.000000e+00> : vector<50x64xf32>
    %86 = tpu.matmul %83, %85, %cst_47 {dimension_numbers = #tpu.dot_dimension_numbers<[1], [0], [0], [1], [0, 0, 1, 1], [], []>} : vector<50x32xf32>, vector<32x64xf32>, vector<50x64xf32> -> vector<50x64xf32>
    %c4 = arith.constant 4 : index
    %c0_48 = arith.constant 0 : index
    %c0_49 = arith.constant 0 : index
    %87 = vector.load %arg1[%c4, %c0_48, %c0_49] : memref<16x50x16xf32, #tpu.memory_space<vmem>>, vector<1x50x16xf32>
    %88 = vector.shape_cast %87 : vector<1x50x16xf32> to vector<50x16xf32>
    %cst_50 = arith.constant dense<0.000000e+00> : vector<50x32xf32>
    %89 = tpu.matmul %88, %0, %cst_50 {dimension_numbers = #tpu.dot_dimension_numbers<[1], [0], [0], [1], [0, 0, 1, 1], [], []>} : vector<50x16xf32>, vector<16x32xf32>, vector<50x32xf32> -> vector<50x32xf32>
    %90 = vector.broadcast %1 : vector<1x32xf32> to vector<50x32xf32>
    %91 = arith.addf %89, %90 : vector<50x32xf32>
    %92 = vector.broadcast %23 : vector<1x32xf32> to vector<50x32xf32>
    %93 = arith.mulf %91, %92 : vector<50x32xf32>
    %94 = vector.broadcast %26 : vector<1x32xf32> to vector<50x32xf32>
    %95 = arith.addf %93, %94 : vector<50x32xf32>
    %cst_51 = arith.constant 2.000000e-01 : f32
    %96 = vector.broadcast %cst_51 : f32 to vector<50x32xf32>
    %97 = arith.mulf %96, %95 : vector<50x32xf32>
    %98 = arith.maximumf %95, %97 : vector<50x32xf32>
    %c4_52 = arith.constant 4 : index
    %c0_53 = arith.constant 0 : index
    %c0_54 = arith.constant 0 : index
    %99 = vector.load %arg6[%c4_52, %c0_53, %c0_54] : memref<16x32x64xf32, #tpu.memory_space<vmem>>, vector<1x32x64xf32>
    %100 = vector.shape_cast %99 : vector<1x32x64xf32> to vector<32x64xf32>
    %cst_55 = arith.constant dense<0.000000e+00> : vector<50x64xf32>
    %101 = tpu.matmul %98, %100, %cst_55 {dimension_numbers = #tpu.dot_dimension_numbers<[1], [0], [0], [1], [0, 0, 1, 1], [], []>} : vector<50x32xf32>, vector<32x64xf32>, vector<50x64xf32> -> vector<50x64xf32>
    %c5 = arith.constant 5 : index
    %c0_56 = arith.constant 0 : index
    %c0_57 = arith.constant 0 : index
    %102 = vector.load %arg1[%c5, %c0_56, %c0_57] : memref<16x50x16xf32, #tpu.memory_space<vmem>>, vector<1x50x16xf32>
    %103 = vector.shape_cast %102 : vector<1x50x16xf32> to vector<50x16xf32>
    %cst_58 = arith.constant dense<0.000000e+00> : vector<50x32xf32>
    %104 = tpu.matmul %103, %0, %cst_58 {dimension_numbers = #tpu.dot_dimension_numbers<[1], [0], [0], [1], [0, 0, 1, 1], [], []>} : vector<50x16xf32>, vector<16x32xf32>, vector<50x32xf32> -> vector<50x32xf32>
    %105 = vector.broadcast %1 : vector<1x32xf32> to vector<50x32xf32>
    %106 = arith.addf %104, %105 : vector<50x32xf32>
    %107 = vector.broadcast %23 : vector<1x32xf32> to vector<50x32xf32>
    %108 = arith.mulf %106, %107 : vector<50x32xf32>
    %109 = vector.broadcast %26 : vector<1x32xf32> to vector<50x32xf32>
    %110 = arith.addf %108, %109 : vector<50x32xf32>
    %cst_59 = arith.constant 2.000000e-01 : f32
    %111 = vector.broadcast %cst_59 : f32 to vector<50x32xf32>
    %112 = arith.mulf %111, %110 : vector<50x32xf32>
    %113 = arith.maximumf %110, %112 : vector<50x32xf32>
    %c5_60 = arith.constant 5 : index
    %c0_61 = arith.constant 0 : index
    %c0_62 = arith.constant 0 : index
    %114 = vector.load %arg6[%c5_60, %c0_61, %c0_62] : memref<16x32x64xf32, #tpu.memory_space<vmem>>, vector<1x32x64xf32>
    %115 = vector.shape_cast %114 : vector<1x32x64xf32> to vector<32x64xf32>
    %cst_63 = arith.constant dense<0.000000e+00> : vector<50x64xf32>
    %116 = tpu.matmul %113, %115, %cst_63 {dimension_numbers = #tpu.dot_dimension_numbers<[1], [0], [0], [1], [0, 0, 1, 1], [], []>} : vector<50x32xf32>, vector<32x64xf32>, vector<50x64xf32> -> vector<50x64xf32>
    %c6 = arith.constant 6 : index
    %c0_64 = arith.constant 0 : index
    %c0_65 = arith.constant 0 : index
    %117 = vector.load %arg1[%c6, %c0_64, %c0_65] : memref<16x50x16xf32, #tpu.memory_space<vmem>>, vector<1x50x16xf32>
    %118 = vector.shape_cast %117 : vector<1x50x16xf32> to vector<50x16xf32>
    %cst_66 = arith.constant dense<0.000000e+00> : vector<50x32xf32>
    %119 = tpu.matmul %118, %0, %cst_66 {dimension_numbers = #tpu.dot_dimension_numbers<[1], [0], [0], [1], [0, 0, 1, 1], [], []>} : vector<50x16xf32>, vector<16x32xf32>, vector<50x32xf32> -> vector<50x32xf32>
    %120 = vector.broadcast %1 : vector<1x32xf32> to vector<50x32xf32>
    %121 = arith.addf %119, %120 : vector<50x32xf32>
    %122 = vector.broadcast %23 : vector<1x32xf32> to vector<50x32xf32>
    %123 = arith.mulf %121, %122 : vector<50x32xf32>
    %124 = vector.broadcast %26 : vector<1x32xf32> to vector<50x32xf32>
    %125 = arith.addf %123, %124 : vector<50x32xf32>
    %cst_67 = arith.constant 2.000000e-01 : f32
    %126 = vector.broadcast %cst_67 : f32 to vector<50x32xf32>
    %127 = arith.mulf %126, %125 : vector<50x32xf32>
    %128 = arith.maximumf %125, %127 : vector<50x32xf32>
    %c6_68 = arith.constant 6 : index
    %c0_69 = arith.constant 0 : index
    %c0_70 = arith.constant 0 : index
    %129 = vector.load %arg6[%c6_68, %c0_69, %c0_70] : memref<16x32x64xf32, #tpu.memory_space<vmem>>, vector<1x32x64xf32>
    %130 = vector.shape_cast %129 : vector<1x32x64xf32> to vector<32x64xf32>
    %cst_71 = arith.constant dense<0.000000e+00> : vector<50x64xf32>
    %131 = tpu.matmul %128, %130, %cst_71 {dimension_numbers = #tpu.dot_dimension_numbers<[1], [0], [0], [1], [0, 0, 1, 1], [], []>} : vector<50x32xf32>, vector<32x64xf32>, vector<50x64xf32> -> vector<50x64xf32>
    %c7 = arith.constant 7 : index
    %c0_72 = arith.constant 0 : index
    %c0_73 = arith.constant 0 : index
    %132 = vector.load %arg1[%c7, %c0_72, %c0_73] : memref<16x50x16xf32, #tpu.memory_space<vmem>>, vector<1x50x16xf32>
    %133 = vector.shape_cast %132 : vector<1x50x16xf32> to vector<50x16xf32>
    %cst_74 = arith.constant dense<0.000000e+00> : vector<50x32xf32>
    %134 = tpu.matmul %133, %0, %cst_74 {dimension_numbers = #tpu.dot_dimension_numbers<[1], [0], [0], [1], [0, 0, 1, 1], [], []>} : vector<50x16xf32>, vector<16x32xf32>, vector<50x32xf32> -> vector<50x32xf32>
    %135 = vector.broadcast %1 : vector<1x32xf32> to vector<50x32xf32>
    %136 = arith.addf %134, %135 : vector<50x32xf32>
    %137 = vector.broadcast %23 : vector<1x32xf32> to vector<50x32xf32>
    %138 = arith.mulf %136, %137 : vector<50x32xf32>
    %139 = vector.broadcast %26 : vector<1x32xf32> to vector<50x32xf32>
    %140 = arith.addf %138, %139 : vector<50x32xf32>
    %cst_75 = arith.constant 2.000000e-01 : f32
    %141 = vector.broadcast %cst_75 : f32 to vector<50x32xf32>
    %142 = arith.mulf %141, %140 : vector<50x32xf32>
    %143 = arith.maximumf %140, %142 : vector<50x32xf32>
    %c7_76 = arith.constant 7 : index
    %c0_77 = arith.constant 0 : index
    %c0_78 = arith.constant 0 : index
    %144 = vector.load %arg6[%c7_76, %c0_77, %c0_78] : memref<16x32x64xf32, #tpu.memory_space<vmem>>, vector<1x32x64xf32>
    %145 = vector.shape_cast %144 : vector<1x32x64xf32> to vector<32x64xf32>
    %cst_79 = arith.constant dense<0.000000e+00> : vector<50x64xf32>
    %146 = tpu.matmul %143, %145, %cst_79 {dimension_numbers = #tpu.dot_dimension_numbers<[1], [0], [0], [1], [0, 0, 1, 1], [], []>} : vector<50x32xf32>, vector<32x64xf32>, vector<50x64xf32> -> vector<50x64xf32>
    %c8 = arith.constant 8 : index
    %c0_80 = arith.constant 0 : index
    %c0_81 = arith.constant 0 : index
    %147 = vector.load %arg1[%c8, %c0_80, %c0_81] : memref<16x50x16xf32, #tpu.memory_space<vmem>>, vector<1x50x16xf32>
    %148 = vector.shape_cast %147 : vector<1x50x16xf32> to vector<50x16xf32>
    %cst_82 = arith.constant dense<0.000000e+00> : vector<50x32xf32>
    %149 = tpu.matmul %148, %0, %cst_82 {dimension_numbers = #tpu.dot_dimension_numbers<[1], [0], [0], [1], [0, 0, 1, 1], [], []>} : vector<50x16xf32>, vector<16x32xf32>, vector<50x32xf32> -> vector<50x32xf32>
    %150 = vector.broadcast %1 : vector<1x32xf32> to vector<50x32xf32>
    %151 = arith.addf %149, %150 : vector<50x32xf32>
    %152 = vector.broadcast %23 : vector<1x32xf32> to vector<50x32xf32>
    %153 = arith.mulf %151, %152 : vector<50x32xf32>
    %154 = vector.broadcast %26 : vector<1x32xf32> to vector<50x32xf32>
    %155 = arith.addf %153, %154 : vector<50x32xf32>
    %cst_83 = arith.constant 2.000000e-01 : f32
    %156 = vector.broadcast %cst_83 : f32 to vector<50x32xf32>
    %157 = arith.mulf %156, %155 : vector<50x32xf32>
    %158 = arith.maximumf %155, %157 : vector<50x32xf32>
    %c8_84 = arith.constant 8 : index
    %c0_85 = arith.constant 0 : index
    %c0_86 = arith.constant 0 : index
    %159 = vector.load %arg6[%c8_84, %c0_85, %c0_86] : memref<16x32x64xf32, #tpu.memory_space<vmem>>, vector<1x32x64xf32>
    %160 = vector.shape_cast %159 : vector<1x32x64xf32> to vector<32x64xf32>
    %cst_87 = arith.constant dense<0.000000e+00> : vector<50x64xf32>
    %161 = tpu.matmul %158, %160, %cst_87 {dimension_numbers = #tpu.dot_dimension_numbers<[1], [0], [0], [1], [0, 0, 1, 1], [], []>} : vector<50x32xf32>, vector<32x64xf32>, vector<50x64xf32> -> vector<50x64xf32>
    %c9 = arith.constant 9 : index
    %c0_88 = arith.constant 0 : index
    %c0_89 = arith.constant 0 : index
    %162 = vector.load %arg1[%c9, %c0_88, %c0_89] : memref<16x50x16xf32, #tpu.memory_space<vmem>>, vector<1x50x16xf32>
    %163 = vector.shape_cast %162 : vector<1x50x16xf32> to vector<50x16xf32>
    %cst_90 = arith.constant dense<0.000000e+00> : vector<50x32xf32>
    %164 = tpu.matmul %163, %0, %cst_90 {dimension_numbers = #tpu.dot_dimension_numbers<[1], [0], [0], [1], [0, 0, 1, 1], [], []>} : vector<50x16xf32>, vector<16x32xf32>, vector<50x32xf32> -> vector<50x32xf32>
    %165 = vector.broadcast %1 : vector<1x32xf32> to vector<50x32xf32>
    %166 = arith.addf %164, %165 : vector<50x32xf32>
    %167 = vector.broadcast %23 : vector<1x32xf32> to vector<50x32xf32>
    %168 = arith.mulf %166, %167 : vector<50x32xf32>
    %169 = vector.broadcast %26 : vector<1x32xf32> to vector<50x32xf32>
    %170 = arith.addf %168, %169 : vector<50x32xf32>
    %cst_91 = arith.constant 2.000000e-01 : f32
    %171 = vector.broadcast %cst_91 : f32 to vector<50x32xf32>
    %172 = arith.mulf %171, %170 : vector<50x32xf32>
    %173 = arith.maximumf %170, %172 : vector<50x32xf32>
    %c9_92 = arith.constant 9 : index
    %c0_93 = arith.constant 0 : index
    %c0_94 = arith.constant 0 : index
    %174 = vector.load %arg6[%c9_92, %c0_93, %c0_94] : memref<16x32x64xf32, #tpu.memory_space<vmem>>, vector<1x32x64xf32>
    %175 = vector.shape_cast %174 : vector<1x32x64xf32> to vector<32x64xf32>
    %cst_95 = arith.constant dense<0.000000e+00> : vector<50x64xf32>
    %176 = tpu.matmul %173, %175, %cst_95 {dimension_numbers = #tpu.dot_dimension_numbers<[1], [0], [0], [1], [0, 0, 1, 1], [], []>} : vector<50x32xf32>, vector<32x64xf32>, vector<50x64xf32> -> vector<50x64xf32>
    %c10 = arith.constant 10 : index
    %c0_96 = arith.constant 0 : index
    %c0_97 = arith.constant 0 : index
    %177 = vector.load %arg1[%c10, %c0_96, %c0_97] : memref<16x50x16xf32, #tpu.memory_space<vmem>>, vector<1x50x16xf32>
    %178 = vector.shape_cast %177 : vector<1x50x16xf32> to vector<50x16xf32>
    %cst_98 = arith.constant dense<0.000000e+00> : vector<50x32xf32>
    %179 = tpu.matmul %178, %0, %cst_98 {dimension_numbers = #tpu.dot_dimension_numbers<[1], [0], [0], [1], [0, 0, 1, 1], [], []>} : vector<50x16xf32>, vector<16x32xf32>, vector<50x32xf32> -> vector<50x32xf32>
    %180 = vector.broadcast %1 : vector<1x32xf32> to vector<50x32xf32>
    %181 = arith.addf %179, %180 : vector<50x32xf32>
    %182 = vector.broadcast %23 : vector<1x32xf32> to vector<50x32xf32>
    %183 = arith.mulf %181, %182 : vector<50x32xf32>
    %184 = vector.broadcast %26 : vector<1x32xf32> to vector<50x32xf32>
    %185 = arith.addf %183, %184 : vector<50x32xf32>
    %cst_99 = arith.constant 2.000000e-01 : f32
    %186 = vector.broadcast %cst_99 : f32 to vector<50x32xf32>
    %187 = arith.mulf %186, %185 : vector<50x32xf32>
    %188 = arith.maximumf %185, %187 : vector<50x32xf32>
    %c10_100 = arith.constant 10 : index
    %c0_101 = arith.constant 0 : index
    %c0_102 = arith.constant 0 : index
    %189 = vector.load %arg6[%c10_100, %c0_101, %c0_102] : memref<16x32x64xf32, #tpu.memory_space<vmem>>, vector<1x32x64xf32>
    %190 = vector.shape_cast %189 : vector<1x32x64xf32> to vector<32x64xf32>
    %cst_103 = arith.constant dense<0.000000e+00> : vector<50x64xf32>
    %191 = tpu.matmul %188, %190, %cst_103 {dimension_numbers = #tpu.dot_dimension_numbers<[1], [0], [0], [1], [0, 0, 1, 1], [], []>} : vector<50x32xf32>, vector<32x64xf32>, vector<50x64xf32> -> vector<50x64xf32>
    %c11 = arith.constant 11 : index
    %c0_104 = arith.constant 0 : index
    %c0_105 = arith.constant 0 : index
    %192 = vector.load %arg1[%c11, %c0_104, %c0_105] : memref<16x50x16xf32, #tpu.memory_space<vmem>>, vector<1x50x16xf32>
    %193 = vector.shape_cast %192 : vector<1x50x16xf32> to vector<50x16xf32>
    %cst_106 = arith.constant dense<0.000000e+00> : vector<50x32xf32>
    %194 = tpu.matmul %193, %0, %cst_106 {dimension_numbers = #tpu.dot_dimension_numbers<[1], [0], [0], [1], [0, 0, 1, 1], [], []>} : vector<50x16xf32>, vector<16x32xf32>, vector<50x32xf32> -> vector<50x32xf32>
    %195 = vector.broadcast %1 : vector<1x32xf32> to vector<50x32xf32>
    %196 = arith.addf %194, %195 : vector<50x32xf32>
    %197 = vector.broadcast %23 : vector<1x32xf32> to vector<50x32xf32>
    %198 = arith.mulf %196, %197 : vector<50x32xf32>
    %199 = vector.broadcast %26 : vector<1x32xf32> to vector<50x32xf32>
    %200 = arith.addf %198, %199 : vector<50x32xf32>
    %cst_107 = arith.constant 2.000000e-01 : f32
    %201 = vector.broadcast %cst_107 : f32 to vector<50x32xf32>
    %202 = arith.mulf %201, %200 : vector<50x32xf32>
    %203 = arith.maximumf %200, %202 : vector<50x32xf32>
    %c11_108 = arith.constant 11 : index
    %c0_109 = arith.constant 0 : index
    %c0_110 = arith.constant 0 : index
    %204 = vector.load %arg6[%c11_108, %c0_109, %c0_110] : memref<16x32x64xf32, #tpu.memory_space<vmem>>, vector<1x32x64xf32>
    %205 = vector.shape_cast %204 : vector<1x32x64xf32> to vector<32x64xf32>
    %cst_111 = arith.constant dense<0.000000e+00> : vector<50x64xf32>
    %206 = tpu.matmul %203, %205, %cst_111 {dimension_numbers = #tpu.dot_dimension_numbers<[1], [0], [0], [1], [0, 0, 1, 1], [], []>} : vector<50x32xf32>, vector<32x64xf32>, vector<50x64xf32> -> vector<50x64xf32>
    %c12 = arith.constant 12 : index
    %c0_112 = arith.constant 0 : index
    %c0_113 = arith.constant 0 : index
    %207 = vector.load %arg1[%c12, %c0_112, %c0_113] : memref<16x50x16xf32, #tpu.memory_space<vmem>>, vector<1x50x16xf32>
    %208 = vector.shape_cast %207 : vector<1x50x16xf32> to vector<50x16xf32>
    %cst_114 = arith.constant dense<0.000000e+00> : vector<50x32xf32>
    %209 = tpu.matmul %208, %0, %cst_114 {dimension_numbers = #tpu.dot_dimension_numbers<[1], [0], [0], [1], [0, 0, 1, 1], [], []>} : vector<50x16xf32>, vector<16x32xf32>, vector<50x32xf32> -> vector<50x32xf32>
    %210 = vector.broadcast %1 : vector<1x32xf32> to vector<50x32xf32>
    %211 = arith.addf %209, %210 : vector<50x32xf32>
    %212 = vector.broadcast %23 : vector<1x32xf32> to vector<50x32xf32>
    %213 = arith.mulf %211, %212 : vector<50x32xf32>
    %214 = vector.broadcast %26 : vector<1x32xf32> to vector<50x32xf32>
    %215 = arith.addf %213, %214 : vector<50x32xf32>
    %cst_115 = arith.constant 2.000000e-01 : f32
    %216 = vector.broadcast %cst_115 : f32 to vector<50x32xf32>
    %217 = arith.mulf %216, %215 : vector<50x32xf32>
    %218 = arith.maximumf %215, %217 : vector<50x32xf32>
    %c12_116 = arith.constant 12 : index
    %c0_117 = arith.constant 0 : index
    %c0_118 = arith.constant 0 : index
    %219 = vector.load %arg6[%c12_116, %c0_117, %c0_118] : memref<16x32x64xf32, #tpu.memory_space<vmem>>, vector<1x32x64xf32>
    %220 = vector.shape_cast %219 : vector<1x32x64xf32> to vector<32x64xf32>
    %cst_119 = arith.constant dense<0.000000e+00> : vector<50x64xf32>
    %221 = tpu.matmul %218, %220, %cst_119 {dimension_numbers = #tpu.dot_dimension_numbers<[1], [0], [0], [1], [0, 0, 1, 1], [], []>} : vector<50x32xf32>, vector<32x64xf32>, vector<50x64xf32> -> vector<50x64xf32>
    %c13 = arith.constant 13 : index
    %c0_120 = arith.constant 0 : index
    %c0_121 = arith.constant 0 : index
    %222 = vector.load %arg1[%c13, %c0_120, %c0_121] : memref<16x50x16xf32, #tpu.memory_space<vmem>>, vector<1x50x16xf32>
    %223 = vector.shape_cast %222 : vector<1x50x16xf32> to vector<50x16xf32>
    %cst_122 = arith.constant dense<0.000000e+00> : vector<50x32xf32>
    %224 = tpu.matmul %223, %0, %cst_122 {dimension_numbers = #tpu.dot_dimension_numbers<[1], [0], [0], [1], [0, 0, 1, 1], [], []>} : vector<50x16xf32>, vector<16x32xf32>, vector<50x32xf32> -> vector<50x32xf32>
    %225 = vector.broadcast %1 : vector<1x32xf32> to vector<50x32xf32>
    %226 = arith.addf %224, %225 : vector<50x32xf32>
    %227 = vector.broadcast %23 : vector<1x32xf32> to vector<50x32xf32>
    %228 = arith.mulf %226, %227 : vector<50x32xf32>
    %229 = vector.broadcast %26 : vector<1x32xf32> to vector<50x32xf32>
    %230 = arith.addf %228, %229 : vector<50x32xf32>
    %cst_123 = arith.constant 2.000000e-01 : f32
    %231 = vector.broadcast %cst_123 : f32 to vector<50x32xf32>
    %232 = arith.mulf %231, %230 : vector<50x32xf32>
    %233 = arith.maximumf %230, %232 : vector<50x32xf32>
    %c13_124 = arith.constant 13 : index
    %c0_125 = arith.constant 0 : index
    %c0_126 = arith.constant 0 : index
    %234 = vector.load %arg6[%c13_124, %c0_125, %c0_126] : memref<16x32x64xf32, #tpu.memory_space<vmem>>, vector<1x32x64xf32>
    %235 = vector.shape_cast %234 : vector<1x32x64xf32> to vector<32x64xf32>
    %cst_127 = arith.constant dense<0.000000e+00> : vector<50x64xf32>
    %236 = tpu.matmul %233, %235, %cst_127 {dimension_numbers = #tpu.dot_dimension_numbers<[1], [0], [0], [1], [0, 0, 1, 1], [], []>} : vector<50x32xf32>, vector<32x64xf32>, vector<50x64xf32> -> vector<50x64xf32>
    %c14 = arith.constant 14 : index
    %c0_128 = arith.constant 0 : index
    %c0_129 = arith.constant 0 : index
    %237 = vector.load %arg1[%c14, %c0_128, %c0_129] : memref<16x50x16xf32, #tpu.memory_space<vmem>>, vector<1x50x16xf32>
    %238 = vector.shape_cast %237 : vector<1x50x16xf32> to vector<50x16xf32>
    %cst_130 = arith.constant dense<0.000000e+00> : vector<50x32xf32>
    %239 = tpu.matmul %238, %0, %cst_130 {dimension_numbers = #tpu.dot_dimension_numbers<[1], [0], [0], [1], [0, 0, 1, 1], [], []>} : vector<50x16xf32>, vector<16x32xf32>, vector<50x32xf32> -> vector<50x32xf32>
    %240 = vector.broadcast %1 : vector<1x32xf32> to vector<50x32xf32>
    %241 = arith.addf %239, %240 : vector<50x32xf32>
    %242 = vector.broadcast %23 : vector<1x32xf32> to vector<50x32xf32>
    %243 = arith.mulf %241, %242 : vector<50x32xf32>
    %244 = vector.broadcast %26 : vector<1x32xf32> to vector<50x32xf32>
    %245 = arith.addf %243, %244 : vector<50x32xf32>
    %cst_131 = arith.constant 2.000000e-01 : f32
    %246 = vector.broadcast %cst_131 : f32 to vector<50x32xf32>
    %247 = arith.mulf %246, %245 : vector<50x32xf32>
    %248 = arith.maximumf %245, %247 : vector<50x32xf32>
    %c14_132 = arith.constant 14 : index
    %c0_133 = arith.constant 0 : index
    %c0_134 = arith.constant 0 : index
    %249 = vector.load %arg6[%c14_132, %c0_133, %c0_134] : memref<16x32x64xf32, #tpu.memory_space<vmem>>, vector<1x32x64xf32>
    %250 = vector.shape_cast %249 : vector<1x32x64xf32> to vector<32x64xf32>
    %cst_135 = arith.constant dense<0.000000e+00> : vector<50x64xf32>
    %251 = tpu.matmul %248, %250, %cst_135 {dimension_numbers = #tpu.dot_dimension_numbers<[1], [0], [0], [1], [0, 0, 1, 1], [], []>} : vector<50x32xf32>, vector<32x64xf32>, vector<50x64xf32> -> vector<50x64xf32>
    %c15 = arith.constant 15 : index
    %c0_136 = arith.constant 0 : index
    %c0_137 = arith.constant 0 : index
    %252 = vector.load %arg1[%c15, %c0_136, %c0_137] : memref<16x50x16xf32, #tpu.memory_space<vmem>>, vector<1x50x16xf32>
    %253 = vector.shape_cast %252 : vector<1x50x16xf32> to vector<50x16xf32>
    %cst_138 = arith.constant dense<0.000000e+00> : vector<50x32xf32>
    %254 = tpu.matmul %253, %0, %cst_138 {dimension_numbers = #tpu.dot_dimension_numbers<[1], [0], [0], [1], [0, 0, 1, 1], [], []>} : vector<50x16xf32>, vector<16x32xf32>, vector<50x32xf32> -> vector<50x32xf32>
    %255 = vector.broadcast %1 : vector<1x32xf32> to vector<50x32xf32>
    %256 = arith.addf %254, %255 : vector<50x32xf32>
    %257 = vector.broadcast %23 : vector<1x32xf32> to vector<50x32xf32>
    %258 = arith.mulf %256, %257 : vector<50x32xf32>
    %259 = vector.broadcast %26 : vector<1x32xf32> to vector<50x32xf32>
    %260 = arith.addf %258, %259 : vector<50x32xf32>
    %cst_139 = arith.constant 2.000000e-01 : f32
    %261 = vector.broadcast %cst_139 : f32 to vector<50x32xf32>
    %262 = arith.mulf %261, %260 : vector<50x32xf32>
    %263 = arith.maximumf %260, %262 : vector<50x32xf32>
    %c15_140 = arith.constant 15 : index
    %c0_141 = arith.constant 0 : index
    %c0_142 = arith.constant 0 : index
    %264 = vector.load %arg6[%c15_140, %c0_141, %c0_142] : memref<16x32x64xf32, #tpu.memory_space<vmem>>, vector<1x32x64xf32>
    %265 = vector.shape_cast %264 : vector<1x32x64xf32> to vector<32x64xf32>
    %cst_143 = arith.constant dense<0.000000e+00> : vector<50x64xf32>
    %266 = tpu.matmul %263, %265, %cst_143 {dimension_numbers = #tpu.dot_dimension_numbers<[1], [0], [0], [1], [0, 0, 1, 1], [], []>} : vector<50x32xf32>, vector<32x64xf32>, vector<50x64xf32> -> vector<50x64xf32>
    %267 = arith.addf %41, %56 : vector<50x64xf32>
    %268 = arith.addf %71, %86 : vector<50x64xf32>
    %269 = arith.addf %101, %116 : vector<50x64xf32>
    %270 = arith.addf %131, %146 : vector<50x64xf32>
    %271 = arith.addf %161, %176 : vector<50x64xf32>
    %272 = arith.addf %191, %206 : vector<50x64xf32>
    %273 = arith.addf %221, %236 : vector<50x64xf32>
    %274 = arith.addf %251, %266 : vector<50x64xf32>
    %275 = arith.addf %267, %268 : vector<50x64xf32>
    %276 = arith.addf %269, %270 : vector<50x64xf32>
    %277 = arith.addf %271, %272 : vector<50x64xf32>
    %278 = arith.addf %273, %274 : vector<50x64xf32>
    %279 = arith.addf %275, %276 : vector<50x64xf32>
    %280 = arith.addf %277, %278 : vector<50x64xf32>
    %281 = arith.addf %279, %280 : vector<50x64xf32>
    %c0_144 = arith.constant 0 : index
    %c0_145 = arith.constant 0 : index
    %282 = vector.load %arg7[%c0_144, %c0_145] : memref<1x64xf32, #tpu.memory_space<vmem>>, vector<1x64xf32>
    %283 = vector.broadcast %282 : vector<1x64xf32> to vector<50x64xf32>
    %284 = arith.addf %281, %283 : vector<50x64xf32>
    %cst_146 = arith.constant dense<0.000000e+00> : vector<64xf32>
    %285 = vector.multi_reduction <add>, %284, %cst_146 [0] : vector<50x64xf32> to vector<64xf32>
    %286 = vector.shape_cast %285 : vector<64xf32> to vector<1x64xf32>
    %cst_147 = arith.constant 2.000000e-02 : f32
    %287 = vector.broadcast %cst_147 : f32 to vector<1x64xf32>
    %288 = arith.mulf %286, %287 : vector<1x64xf32>
    %289 = arith.mulf %284, %284 : vector<50x64xf32>
    %cst_148 = arith.constant dense<0.000000e+00> : vector<64xf32>
    %290 = vector.multi_reduction <add>, %289, %cst_148 [0] : vector<50x64xf32> to vector<64xf32>
    %291 = vector.shape_cast %290 : vector<64xf32> to vector<1x64xf32>
    %cst_149 = arith.constant 2.000000e-02 : f32
    %292 = vector.broadcast %cst_149 : f32 to vector<1x64xf32>
    %293 = arith.mulf %291, %292 : vector<1x64xf32>
    %294 = arith.mulf %288, %288 : vector<1x64xf32>
    %295 = arith.subf %293, %294 : vector<1x64xf32>
    %cst_150 = arith.constant 0.000000e+00 : f32
    %296 = vector.broadcast %cst_150 : f32 to vector<1x64xf32>
    %297 = arith.maximumf %295, %296 : vector<1x64xf32>
    %298 = vector.broadcast %288 : vector<1x64xf32> to vector<50x64xf32>
    %299 = arith.subf %284, %298 : vector<50x64xf32>
    %c0_151 = arith.constant 0 : index
    %c0_152 = arith.constant 0 : index
    %300 = vector.load %arg8[%c0_151, %c0_152] : memref<1x64xf32, #tpu.memory_space<vmem>>, vector<1x64xf32>
    %cst_153 = arith.constant 9.99999974E-6 : f32
    %301 = vector.broadcast %cst_153 : f32 to vector<1x64xf32>
    %302 = arith.addf %297, %301 : vector<1x64xf32>
    %303 = math.rsqrt %302 : vector<1x64xf32>
    %304 = arith.mulf %300, %303 : vector<1x64xf32>
    %305 = vector.broadcast %304 : vector<1x64xf32> to vector<50x64xf32>
    %306 = arith.mulf %299, %305 : vector<50x64xf32>
    %c0_154 = arith.constant 0 : index
    %c0_155 = arith.constant 0 : index
    %307 = vector.load %arg9[%c0_154, %c0_155] : memref<1x64xf32, #tpu.memory_space<vmem>>, vector<1x64xf32>
    %308 = vector.broadcast %307 : vector<1x64xf32> to vector<50x64xf32>
    %309 = arith.addf %306, %308 : vector<50x64xf32>
    %cst_156 = arith.constant 2.000000e-01 : f32
    %310 = vector.broadcast %cst_156 : f32 to vector<50x64xf32>
    %311 = arith.mulf %310, %309 : vector<50x64xf32>
    %312 = arith.maximumf %309, %311 : vector<50x64xf32>
    %c0_157 = arith.constant 0 : index
    %c0_158 = arith.constant 0 : index
    %313 = vector.load %arg10[%c0_157, %c0_158] : memref<50x64xf32, #tpu.memory_space<vmem>>, vector<50x64xf32>
    %314 = arith.mulf %312, %313 : vector<50x64xf32>
    %cst_159 = arith.constant dense<0.000000e+00> : vector<50xf32>
    %315 = vector.multi_reduction <add>, %314, %cst_159 [1] : vector<50x64xf32> to vector<50xf32>
    %316 = vector.shape_cast %315 : vector<50xf32> to vector<50x1xf32>
    %c0_160 = arith.constant 0 : index
    %c0_161 = arith.constant 0 : index
    %317 = vector.load %arg11[%c0_160, %c0_161] : memref<50x2xf32, #tpu.memory_space<vmem>>, vector<50x2xf32>
    %318 = vector.broadcast %316 : vector<50x1xf32> to vector<50x2xf32>
    %319 = arith.mulf %318, %317 : vector<50x2xf32>
    %cst_162 = arith.constant dense<0.000000e+00> : vector<2xf32>
    %320 = vector.multi_reduction <add>, %319, %cst_162 [0] : vector<50x2xf32> to vector<2xf32>
    %321 = vector.shape_cast %320 : vector<2xf32> to vector<1x2xf32>
    %c0_163 = arith.constant 0 : index
    %c0_164 = arith.constant 0 : index
    %322 = vector.load %arg12[%c0_163, %c0_164] : memref<1x1xf32, #tpu.memory_space<vmem>>, vector<1x1xf32>
    %323 = vector.broadcast %322 : vector<1x1xf32> to vector<1x2xf32>
    %324 = arith.addf %321, %323 : vector<1x2xf32>
    %c0_165 = arith.constant 0 : index
    %c0_166 = arith.constant 0 : index
    %325 = vector.load %arg13[%c0_165, %c0_166] : memref<1x2xf32, #tpu.memory_space<vmem>>, vector<1x2xf32>
    tpu.vector_store %arg13[%c0_165, %c0_166], %324 {strides = array<i32>} : memref<1x2xf32, #tpu.memory_space<vmem>>, vector<1x2xf32>,
    return
  }
}

</mosaic_0001>

<bundles_post_ra>
// kernel: tile.9
= control target key start
LH: loop header
LB: loop body
LE: loop exit
PB: predicated region body
PF: predicated region fallthrough
CT: control target
= control target key end

     0   :  { %vm3_vm0 = vcmask 523264   ;;  %s16_s6 = smov 3  ;;  %s100_s0 = inlined_call_operand.vmem [shape: f32[2,25,64], index: 0, kind: input, shape index: {}]   ;;  %s101_s1 = inlined_call_operand.vmem [shape: f32[50,64], index: 1, kind: output, shape index: {}]  }
   0x1   :  { %v2_v0 = vld [vmem:[%s100_s0] sm:$0xff]   ;;  %v36_v1 = vld [vmem:[%s100_s0 + $0x8] sm:$0xff]   ;;  %v38_v2 = vld [vmem:[%s100_s0 + $0x10] sm:$0xff]  }
   0x2   :  { %4 = vst.msk [vmem:[%s101_s1] sm:$0xff] %vm3_vm0, %v2_v0   ;;  %37 = vst.msk [vmem:[%s101_s1 + $0x8] sm:$0xff] %vm3_vm0, %v36_v1   ;;  %v40_v3 = vld [vmem:[%s100_s0 + $0x18] ss:$8 sm:%s16_s6]  }
   0x3   :  { %39 = vst.msk [vmem:[%s101_s1 + $0x10] sm:$0xff] %vm3_vm0, %v38_v2   ;;  %v42_v4 = vld [vmem:[%s100_s0 + $0x21] sm:$0xff]   ;;  %v44_v5 = vld [vmem:[%s100_s0 + $0x29] sm:$0xff]   ;;  %41 = vst.msk [vmem:[%s101_s1 + $0x18] sm:$0x3] %vm3_vm0, %v40_v3  }
   0x4   :  { %43 = vst.msk [vmem:[%s101_s1 + $0x1a] sm:$0xff] %vm3_vm0, %v42_v4   ;;  %45 = vst.msk [vmem:[%s101_s1 + $0x22] sm:$0xff] %vm3_vm0, %v44_v5   ;;  %v46_v6 = vld [vmem:[%s100_s0 + $0x31] sm:$0xff]  }
   0x5   :  { %47 = vst.msk [vmem:[%s101_s1 + $0x2a] sm:$0xff] %vm3_vm0, %v46_v6  }

// kernel: discriminator_forward.1
= control target key start
LH: loop header
LB: loop body
LE: loop exit
PB: predicated region body
PF: predicated region fallthrough
CT: control target
= control target key end

     0   :  { %s10259_s0 = inlined_call_operand.vmem [shape: f32[338,16], index: 0, kind: input, shape index: {}]   ;;  %s10260_s1 = inlined_call_operand.vmem [shape: f32[16,50,16], index: 1, kind: input, shape index: {}]   ;;  %s10261_s2 = inlined_call_operand.vmem [shape: f32[16,32], index: 2, kind: input, shape index: {}]   ;;  %s10262_s3 = inlined_call_operand.vmem [shape: f32[1,32], index: 3, kind: input, shape index: {}]   ;;  %s10263_s4 = inlined_call_operand.vmem [shape: f32[1,32], index: 4, kind: input, shape index: {}]   ;;  %s10264_s5 = inlined_call_operand.vmem [shape: f32[1,32], index: 5, kind: input, shape index: {}]   ;;  %s10265_s6 = inlined_call_operand.vmem [shape: f32[16,32,64], index: 6, kind: input, shape index: {}]   ;;  %s10266_s7 = inlined_call_operand.vmem [shape: f32[1,64], index: 7, kind: input, shape index: {}]   ;;  %s10267_s8 = inlined_call_operand.vmem [shape: f32[1,64], index: 8, kind: input, shape index: {}]   ;;  %s10268_s9 = inlined_call_operand.vmem [shape: f32[1,64], index: 9, kind: input, shape index: {}]   ;;  %s10269_s10 = inlined_call_operand.vmem [shape: f32[50,64], index: 10, kind: input, shape index: {}]   ;;  %s10270_s11 = inlined_call_operand.vmem [shape: f32[50,2], index: 11, kind: input, shape index: {}]   ;;  %s10271_s12 = inlined_call_operand.<no memory space> [shape: f32[1,1], index: 12, kind: input, shape index: {}]   ;;  %s10272_s13 = inlined_call_operand.hbm [shape: f32[1,2], index: 13, kind: output, shape index: {}]  }
   0x1   :  { %v18_v0 = vstv %s10271_s12 }
   0x2   :  { %19 = vst [vmem:[#allocation2] sm:$0x1] %v18_v0 }
   0x3   :  { %v47_v1 = vld [vmem:[%s10261_s2] sm:$0xff]  ;;  %v48_v2 = vld [vmem:[%s10261_s2 + $0x8] sm:$0xff]  ;;  %v10273_v3 = vmov 0.0|0.0   ;;  %vm7533_vm0 = vmmov 0   ;;  %v10275_v5 = vmov 0.0   ;;  %vm99_vm1 = vcmask 130048  }
   0x4   :  { %7347 = vmatprep.subr.bf16.mxu0 %v10273_v3  ;;  %v7617_v4 = vpack.c.bf16 %v48_v2, %v47_v1  ;;  %6354 = vmatprep.mubr.msk.f32.mxu0 %vm7533_vm0, %v10275_v5  ;;  %v50_v6 = vld [vmem:[%s10259_s0] sm:$0xff]  ;;  %v51_v7 = vld [vmem:[%s10259_s0 + $0x8] sm:$0xff]  ;;  %v52_v8 = vld [vmem:[%s10259_s0 + $0x10] sm:$0xff] }
   0x5   :  { %7350 = vmatprep.subr.bf16.mxu1 %v10273_v3  ;;  %6487 = vmatprep.mubr.msk.f32.mxu1 %vm7533_vm0, %v10275_v5 }
   0x6   :  { %7349 = vmatpush3.bf16.msra.mxu0 %v7617_v4  ;;  %7352 = vmatpush3.bf16.msra.mxu1 %v7617_v4 }
   0x7   :  { %7377 = vmatprep.subr.bf16.mxu0 %v10273_v3  ;;  %7353 = vmatprep.subr.bf16.mxu1 %v10273_v3 }
   0x9   :  { %6355 = vmatmul.mubr.msk.f32.vlgmr.msra.gmra.mrb[0].mxu0 %vm99_vm1, %v50_v6 }
   0xa   :  { %6357 = vmatprep.mubr.msk.f32.mxu0 %vm7533_vm0, %v10275_v5  ;;  %7379 = vmatpush3.bf16.msra.mxu0 %v7617_v4 }
   0xb   :  { %7386 = vmatprep.subr.bf16.mxu0 %v10273_v3 }
   0xd   :  { %6358 = vmatmul.mubr.msk.f32.gmra.mrb[2].mxu0 %vm99_vm1, %v51_v7 }
   0xe   :  { %6360 = vmatprep.mubr.msk.f32.mxu0 %vm7533_vm0, %v10275_v5 }
   0xf   :  { %20 = vsyncpa [#allocation4], 0  ;;  %v53_v9 = vld [vmem:[%s10259_s0 + $0x18] sm:$0xff]  ;;  %v54_v10 = vld [vmem:[%s10259_s0 + $0x20] sm:$0xff]  ;;  %vm509_vm2 = vcmask 261120   ;;  %vm593_vm3 = vcmask 254976  }
  0x10   :  { %v55_v11 = vld [vmem:[%s10259_s0 + $0x28] sm:$0xff]  ;;  %v56_v12 = vld [vmem:[%s10259_s0 + $0x30] sm:$0xff]  ;;  %v57_v13 = vld [vmem:[%s10259_s0 + $0x38] sm:$0xff]  ;;  %vm5349_vm4 = vcmask 523264   ;;  %vm5361_vm5 = vcmask 517120   ;;  %vm5502_vm6 = vcmask 15360  }
  0x11   :  { %6361 = vmatmul.mubr.msk.f32.gmra.mrb[4].mxu0 %vm99_vm1, %v52_v8  ;;  %v748_v14 = vld [vmem:[%s10260_s1] sm:$0xff]  ;;  %v749_v16 = vld [vmem:[%s10260_s1 + $0x8] sm:$0xff]  ;;  %v750_v18 = vld [vmem:[%s10260_s1 + $0x10] sm:$0xff]  ;;  %vm5514_vm7 = vcmask 9216   ;;  %vm5534_vm8 = vcmask 8192  }
  0x12   :  { %6363 = vmatprep.mubr.msk.f32.mxu0 %vm7533_vm0, %v10275_v5  ;;  %6488 = vmatmul.mubr.msk.f32.vlgmr.msra.gmra.mrb[0].mxu1 %vm99_vm1, %v748_v14  ;;  %v58_v15 = vld [vmem:[%s10259_s0 + $0x40] sm:$0xff]  ;;  %v59_v17 = vld [vmem:[%s10259_s0 + $0x48] sm:$0xff]  ;;  %v60_v19 = vld [vmem:[%s10259_s0 + $0x50] sm:$0xff] }
  0x13   :  { %6490 = vmatprep.mubr.msk.f32.mxu1 %vm7533_vm0, %v10275_v5  ;;  %7355 = vmatpush3.bf16.msra.mxu1 %v7617_v4  ;;  %v751_v20 = vld [vmem:[%s10260_s1 + $0x18] sm:$0xff]  ;;  %v752_v22 = vld [vmem:[%s10260_s1 + $0x20] sm:$0xff]  ;;  %v753_v24 = vld [vmem:[%s10260_s1 + $0x28] sm:$0xff] }
  0x14   :  { %7356 = vmatprep.subr.bf16.mxu1 %v10273_v3  ;;  %v61_v21 = vld [vmem:[%s10259_s0 + $0x58] sm:$0xff]  ;;  %v62_v23 = vld [vmem:[%s10259_s0 + $0x60] sm:$0xff]  ;;  %v63_v25 = vld [vmem:[%s10259_s0 + $0x68] sm:$0xff] }
  0x15   :  { %6364 = vmatmul.mubr.msk.f32.gmra.mrb[6].mxu0 %vm99_vm1, %v53_v9  ;;  %v754_v26 = vld [vmem:[%s10260_s1 + $0x30] sm:$0x3]  ;;  %v5601_v28 = vld [vmem:[%s10260_s1 + $0x38] sm:$0xff]  ;;  %v5602_v30 = vld [vmem:[%s10260_s1 + $0x40] sm:$0xff] }
  0x16   :  { %6366 = vmatprep.mubr.msk.f32.mxu0 %vm7533_vm0, %v10275_v5  ;;  %6491 = vmatmul.mubr.msk.f32.gmra.mrb[2].mxu1 %vm99_vm1, %v749_v16  ;;  %v64_v27 = vld [vmem:[%s10259_s0 + $0x70] sm:$0xff]  ;;  %v65_v29 = vld [vmem:[%s10259_s0 + $0x78] sm:$0xff]  ;;  %v66_v31 = vld [vmem:[%s10259_s0 + $0x80] sm:$0xff] }
  0x17   :  { %6493 = vmatprep.mubr.msk.f32.mxu1 %vm7533_vm0, %v10275_v5  ;;  %v5603_v32 = vld [vmem:[%s10260_s1 + $0x48] sm:$0xff]  ;;  %v5604_v34 = vld [vmem:[%s10260_s1 + $0x50] sm:$0xff]  ;;  %v5605_v36 = vld [vmem:[%s10260_s1 + $0x58] sm:$0xff] }
  0x18   :  { %v67_v33 = vld [vmem:[%s10259_s0 + $0x88] sm:$0xff]  ;;  %v68_v35 = vld [vmem:[%s10259_s0 + $0x90] sm:$0xff]  ;;  %v69_v37 = vld [vmem:[%s10259_s0 + $0x98] sm:$0xff] }
  0x19   :  { %6367 = vmatmul.mubr.msk.f32.gmra.mrb[8].mxu0 %vm99_vm1, %v54_v10  ;;  %v5606_v38 = vld [vmem:[%s10260_s1 + $0x60] sm:$0xff]  ;;  %v5607_v40 = vld [vmem:[%s10260_s1 + $0x68] sm:$0x3]  ;;  %v72_v42 = vld [vmem:[%s10259_s0 + $0xb0] sm:$0xff] }
  0x1a   :  { %6369 = vmatprep.mubr.msk.f32.mxu0 %vm7533_vm0, %v10275_v5  ;;  %6494 = vmatmul.mubr.msk.f32.gmra.mrb[4].mxu1 %vm99_vm1, %v750_v18  ;;  %v70_v39 = vld [vmem:[%s10259_s0 + $0xa0] sm:$0xff]  ;;  %v71_v41 = vld [vmem:[%s10259_s0 + $0xa8] sm:$0xff]  ;;  %v73_v43 = vld [vmem:[%s10259_s0 + $0xb8] sm:$0xff] }
  0x1b   :  { %6496 = vmatprep.mubr.msk.f32.mxu1 %vm7533_vm0, %v10275_v5  ;;  %v74_v44 = vld [vmem:[%s10259_s0 + $0xc0] sm:$0xff]  ;;  %v75_v45 = vld [vmem:[%s10259_s0 + $0xc8] sm:$0xff]  ;;  %v76_v46 = vld [vmem:[%s10259_s0 + $0xd0] sm:$0xff] }
  0x1c   :  { %v77_v47 = vld [vmem:[%s10259_s0 + $0xd8] sm:$0xff]  ;;  %v78_v48 = vld [vmem:[%s10259_s0 + $0xe0] sm:$0xff]  ;;  %v79_v49 = vld [vmem:[%s10259_s0 + $0xe8] sm:$0xff] }
  0x1d   :  { %6370 = vmatmul.mubr.msk.f32.gmra.mrb[10].mxu0 %vm99_vm1, %v55_v11  ;;  %v80_v50 = vld [vmem:[%s10259_s0 + $0xf0] sm:$0xff]  ;;  %v81_v51 = vld [vmem:[%s10259_s0 + $0xf8] sm:$0xff]  ;;  %v82_v52 = vld [vmem:[%s10259_s0 + $0x100] sm:$0xff] }
  0x1e   :  { %6372 = vmatprep.mubr.msk.f32.mxu0 %vm7533_vm0, %v10275_v5  ;;  %6497 = vmatmul.mubr.msk.f32.gmra.mrb[6].mxu1 %vm99_vm1, %v751_v20  ;;  %v83_v53 = vld [vmem:[%s10259_s0 + $0x108] sm:$0xff]  ;;  %v84_v54 = vld [vmem:[%s10259_s0 + $0x110] sm:$0xff]  ;;  %v85_v55 = vld [vmem:[%s10259_s0 + $0x118] sm:$0xff] }
  0x1f   :  { %6499 = vmatprep.mubr.msk.f32.mxu1 %vm7533_vm0, %v10275_v5  ;;  %v86_v56 = vld [vmem:[%s10259_s0 + $0x120] sm:$0xff]  ;;  %v87_v57 = vld [vmem:[%s10259_s0 + $0x128] sm:$0xff]  ;;  %v88_v58 = vld [vmem:[%s10259_s0 + $0x130] sm:$0xff] }
  0x20   :  { %v89_v59 = vld [vmem:[%s10259_s0 + $0x138] sm:$0xff]  ;;  %v90_v60 = vld [vmem:[%s10259_s0 + $0x140] sm:$0xff]  ;;  %v91_v61 = vld [vmem:[%s10259_s0 + $0x148] sm:$0xff] }
  0x21   :  { %6373 = vmatmul.mubr.msk.f32.gmra.mrb[12].mxu0 %vm99_vm1, %v56_v12  ;;  %v92_v62 = vld [vmem:[%s10259_s0 + $0x150] sm:$0x3]  ;;  %v5687_v63 = vld [vmem:[%s10260_s1 + $0x118] sm:$0xff]  ;;  %v5688_v0 = vld [vmem:[%s10260_s1 + $0x120] sm:$0xff] }
  0x22   :  { %6375 = vmatprep.mubr.msk.f32.mxu0 %vm7533_vm0, %v10275_v5  ;;  %6500 = vmatmul.mubr.msk.f32.gmra.mrb[8].mxu1 %vm99_vm1, %v752_v22  ;;  %v5689_v1 = vld [vmem:[%s10260_s1 + $0x128] sm:$0xff]  ;;  %v5690_v2 = vld [vmem:[%s10260_s1 + $0x130] sm:$0xff]  ;;  %v5691_v6 = vld [vmem:[%s10260_s1 + $0x138] sm:$0xff] }
  0x23   :  { %6502 = vmatprep.mubr.msk.f32.mxu1 %vm7533_vm0, %v10275_v5  ;;  %v5692_v7 = vld [vmem:[%s10260_s1 + $0x140] sm:$0xff]  ;;  %v5693_v8 = vld [vmem:[%s10260_s1 + $0x148] sm:$0x3]  ;;  %v5712_v9 = vld [vmem:[%s10260_s1 + $0x150] sm:$0xff] }
  0x24   :  { %v5713_v10 = vld [vmem:[%s10260_s1 + $0x158] sm:$0xff]  ;;  %v5714_v11 = vld [vmem:[%s10260_s1 + $0x160] sm:$0xff] }
  0x25   :  { %6376 = vmatmul.mubr.msk.f32.gmra.mrb[14].mxu0 %vm99_vm1, %v57_v13  ;;  %v8037_v12 = vld [vmem:[%s10262_s3] ss:$0 sm:$0xff]  ;;  %v5715_v13 = vld [vmem:[%s10260_s1 + $0x168] sm:$0xff]  ;;  %v5717_v22 = vld [vmem:[%s10260_s1 + $0x178] sm:$0xff] }
  0x26   :  { %6378 = vmatprep.mubr.msk.f32.mxu0 %vm7533_vm0, %v10275_v5  ;;  %6503 = vmatmul.mubr.msk.f32.gmra.mrb[10].mxu1 %vm99_vm1, %v753_v24 }
  0x27   :  { %6505 = vmatprep.mubr.msk.f32.mxu1 %vm7533_vm0, %v10275_v5 }
  0x29   :  { %6379 = vmatmul.mubr.msk.f32.gmra.mrb[16].mxu0 %vm99_vm1, %v58_v15 }
  0x2a   :  { %6381 = vmatprep.mubr.msk.f32.mxu0 %vm7533_vm0, %v10275_v5  ;;  %6506 = vmatmul.mubr.msk.f32.gmra.mrb[12].mxu1 %vm99_vm1, %v754_v26 }
  0x2b   :  { %6512 = vmatprep.mubr.msk.f32.mxu1 %vm7533_vm0, %v10275_v5 }
  0x2d   :  { %6382 = vmatmul.mubr.msk.f32.gmra.mrb[18].mxu0 %vm99_vm1, %v59_v17  ;;  %v5716_v17 = vld [vmem:[%s10260_s1 + $0x170] sm:$0xff] }
  0x2e   :  { %6384 = vmatprep.mubr.msk.f32.mxu0 %vm7533_vm0, %v10275_v5  ;;  %6513 = vmatmul.mubr.msk.f32.vlgmr.msra.gmra.mrb[14].mxu1 %vm99_vm1, %v5601_v28 }
  0x2f   :  { %6515 = vmatprep.mubr.msk.f32.mxu1 %vm7533_vm0, %v10275_v5 }
  0x31   :  { %6385 = vmatmul.mubr.msk.f32.gmra.mrb[20].mxu0 %vm99_vm1, %v60_v19 }
  0x32   :  { %6387 = vmatprep.mubr.msk.f32.mxu0 %vm7533_vm0, %v10275_v5  ;;  %6516 = vmatmul.mubr.msk.f32.gmra.mrb[16].mxu1 %vm99_vm1, %v5602_v30 }
  0x33   :  { %6518 = vmatprep.mubr.msk.f32.mxu1 %vm7533_vm0, %v10275_v5 }
  0x35   :  { %6388 = vmatmul.mubr.msk.f32.gmra.mrb[22].mxu0 %vm99_vm1, %v61_v21 }
  0x36   :  { %6390 = vmatprep.mubr.msk.f32.mxu0 %vm7533_vm0, %v10275_v5  ;;  %6519 = vmatmul.mubr.msk.f32.gmra.mrb[18].mxu1 %vm99_vm1, %v5603_v32 }
  0x37   :  { %6521 = vmatprep.mubr.msk.f32.mxu1 %vm7533_vm0, %v10275_v5 }
  0x39   :  { %6391 = vmatmul.mubr.msk.f32.gmra.mrb[24].mxu0 %vm99_vm1, %v62_v23 }
  0x3a   :  { %6393 = vmatprep.mubr.msk.f32.mxu0 %vm7533_vm0, %v10275_v5  ;;  %6522 = vmatmul.mubr.msk.f32.gmra.mrb[20].mxu1 %vm99_vm1, %v5604_v34 }
  0x3b   :  { %6524 = vmatprep.mubr.msk.f32.mxu1 %vm7533_vm0, %v10275_v5 }
  0x3d   :  { %6394 = vmatmul.mubr.msk.f32.gmra.mrb[26].mxu0 %vm99_vm1, %v63_v25 }
  0x3e   :  { %6396 = vmatprep.mubr.msk.f32.mxu0 %vm7533_vm0, %v10275_v5  ;;  %6525 = vmatmul.mubr.msk.f32.gmra.mrb[22].mxu1 %vm99_vm1, %v5605_v36 }
  0x3f   :  { %6527 = vmatprep.mubr.msk.f32.mxu1 %vm7533_vm0, %v10275_v5 }
  0x41   :  { %6397 = vmatmul.mubr.msk.f32.gmra.mrb[28].mxu0 %vm99_vm1, %v64_v27 }
  0x42   :  { %6399 = vmatprep.mubr.msk.f32.mxu0 %vm7533_vm0, %v10275_v5  ;;  %6528 = vmatmul.mubr.msk.f32.gmra.mrb[24].mxu1 %vm99_vm1, %v5606_v38 }
  0x43   :  { %6530 = vmatprep.mubr.msk.f32.mxu1 %vm7533_vm0, %v10275_v5 }
  0x45   :  { %6400 = vmatmul.mubr.msk.f32.gmra.mrb[30].mxu0 %vm99_vm1, %v65_v29 }
  0x46   :  { %6402 = vmatprep.mubr.msk.f32.mxu0 %vm7533_vm0, %v10275_v5  ;;  %6531 = vmatmul.mubr.msk.f32.gmra.mrb[26].mxu1 %vm99_vm1, %v5607_v40 }
  0x47   :  { %6541 = vmatprep.mubr.msk.f32.mxu1 %vm7533_vm0, %v10275_v5 }
  0x49   :  { %6403 = vmatmul.mubr.msk.f32.gmra.mrb[32].mxu0 %vm99_vm1, %v66_v31 }
  0x4a   :  { %6405 = vmatprep.mubr.msk.f32.mxu0 %vm7533_vm0, %v10275_v5 }
  0x4d   :  { %6406 = vmatmul.mubr.msk.f32.gmra.mrb[34].mxu0 %vm99_vm1, %v67_v33  ;;  %v5718_v33 = vld [vmem:[%s10260_s1 + $0x180] sm:$0x3] }
  0x4e   :  { %6408 = vmatprep.mubr.msk.f32.mxu0 %vm7533_vm0, %v10275_v5 }
  0x51   :  { %6409 = vmatmul.mubr.msk.f32.gmra.mrb[36].mxu0 %vm99_vm1, %v68_v35 }
  0x52   :  { %6411 = vmatprep.mubr.msk.f32.mxu0 %vm7533_vm0, %v10275_v5 }
  0x55   :  { %6412 = vmatmul.mubr.msk.f32.gmra.mrb[38].mxu0 %vm99_vm1, %v69_v37 }
  0x56   :  { %6414 = vmatprep.mubr.msk.f32.mxu0 %vm7533_vm0, %v10275_v5 }
  0x59   :  { %6415 = vmatmul.mubr.msk.f32.gmra.mrb[40].mxu0 %vm99_vm1, %v70_v39 }
  0x5a   :  { %6417 = vmatprep.mubr.msk.f32.mxu0 %vm7533_vm0, %v10275_v5 }
  0x5d   :  { %6418 = vmatmul.mubr.msk.f32.gmra.mrb[42].mxu0 %vm99_vm1, %v71_v41 }
  0x5e   :  { %6420 = vmatprep.mubr.msk.f32.mxu0 %vm7533_vm0, %v10275_v5 }
  0x61   :  { %6421 = vmatmul.mubr.msk.f32.gmra.mrb[44].mxu0 %vm99_vm1, %v72_v42 }
  0x62   :  { %6423 = vmatprep.mubr.msk.f32.mxu0 %vm7533_vm0, %v10275_v5 }
  0x65   :  { %6424 = vmatmul.mubr.msk.f32.gmra.mrb[46].mxu0 %vm99_vm1, %v73_v43 }
  0x66   :  { %6426 = vmatprep.mubr.msk.f32.mxu0 %vm7533_vm0, %v10275_v5 }
  0x69   :  { %6427 = vmatmul.mubr.msk.f32.gmra.mrb[48].mxu0 %vm99_vm1, %v74_v44 }
  0x6a   :  { %6429 = vmatprep.mubr.msk.f32.mxu0 %vm7533_vm0, %v10275_v5 }
  0x6d   :  { %6430 = vmatmul.mubr.msk.f32.gmra.mrb[50].mxu0 %vm99_vm1, %v75_v45 }
  0x6e   :  { %6432 = vmatprep.mubr.msk.f32.mxu0 %vm7533_vm0, %v10275_v5 }
  0x71   :  { %6433 = vmatmul.mubr.msk.f32.gmra.mrb[52].mxu0 %vm99_vm1, %v76_v46 }
  0x72   :  { %6435 = vmatprep.mubr.msk.f32.mxu0 %vm7533_vm0, %v10275_v5 }
  0x75   :  { %6436 = vmatmul.mubr.msk.f32.gmra.mrb[54].mxu0 %vm99_vm1, %v77_v47 }
  0x76   :  { %6438 = vmatprep.mubr.msk.f32.mxu0 %vm7533_vm0, %v10275_v5 }
  0x79   :  { %6439 = vmatmul.mubr.msk.f32.gmra.mrb[56].mxu0 %vm99_vm1, %v78_v48 }
  0x7a   :  { %6441 = vmatprep.mubr.msk.f32.mxu0 %vm7533_vm0, %v10275_v5 }
  0x7d   :  { %6442 = vmatmul.mubr.msk.f32.gmra.mrb[58].mxu0 %vm99_vm1, %v79_v49 }
  0x7e   :  { %6444 = vmatprep.mubr.msk.f32.mxu0 %vm7533_vm0, %v10275_v5 }
  0x81   :  { %6445 = vmatmul.mubr.msk.f32.gmra.mrb[60].mxu0 %vm99_vm1, %v80_v50 }
  0x82   :  { %6447 = vmatprep.mubr.msk.f32.mxu0 %vm7533_vm0, %v10275_v5 }
  0x85   :  { %6448 = vmatmul.mubr.msk.f32.gmra.mrb[62].mxu0 %vm99_vm1, %v81_v51 }
  0x86   :  { %6450 = vmatprep.mubr.msk.f32.mxu0 %vm7533_vm0, %v10275_v5 }
  0x89   :  { %6451 = vmatmul.mubr.msk.f32.gmra.mrb[64].mxu0 %vm99_vm1, %v82_v52 }
  0x8a   :  { %6453 = vmatprep.mubr.msk.f32.mxu0 %vm7533_vm0, %v10275_v5 }
  0x8d   :  { %6454 = vmatmul.mubr.msk.f32.gmra.mrb[66].mxu0 %vm99_vm1, %v83_v53 }
  0x8e   :  { %6456 = vmatprep.mubr.msk.f32.mxu0 %vm7533_vm0, %v10275_v5 }
  0x91   :  { %6457 = vmatmul.mubr.msk.f32.gmra.mrb[68].mxu0 %vm99_vm1, %v84_v54 }
  0x92   :  { %6459 = vmatprep.mubr.msk.f32.mxu0 %vm7533_vm0, %v10275_v5 }
  0x95   :  { %6460 = vmatmul.mubr.msk.f32.gmra.mrb[70].mxu0 %vm99_vm1, %v85_v55 }
  0x96   :  { %6462 = vmatprep.mubr.msk.f32.mxu0 %vm7533_vm0, %v10275_v5 }
  0x99   :  { %6463 = vmatmul.mubr.msk.f32.gmra.mrb[72].mxu0 %vm99_vm1, %v86_v56 }
  0x9a   :  { %6465 = vmatprep.mubr.msk.f32.mxu0 %vm7533_vm0, %v10275_v5 }
  0x9d   :  { %6466 = vmatmul.mubr.msk.f32.gmra.mrb[74].mxu0 %vm99_vm1, %v87_v57 }
  0x9e   :  { %6468 = vmatprep.mubr.msk.f32.mxu0 %vm7533_vm0, %v10275_v5 }
  0xa1   :  { %6469 = vmatmul.mubr.msk.f32.gmra.mrb[76].mxu0 %vm99_vm1, %v88_v58 }
  0xa2   :  { %6471 = vmatprep.mubr.msk.f32.mxu0 %vm7533_vm0, %v10275_v5 }
  0xa5   :  { %6472 = vmatmul.mubr.msk.f32.gmra.mrb[78].mxu0 %vm99_vm1, %v89_v59 }
  0xa6   :  { %6474 = vmatprep.mubr.msk.f32.mxu0 %vm7533_vm0, %v10275_v5 }
  0xa9   :  { %6475 = vmatmul.mubr.msk.f32.gmra.mrb[80].mxu0 %vm99_vm1, %v90_v60 }
  0xaa   :  { %6477 = vmatprep.mubr.msk.f32.mxu0 %vm7533_vm0, %v10275_v5 }
  0xad   :  { %6478 = vmatmul.mubr.msk.f32.gmra.mrb[82].mxu0 %vm99_vm1, %v91_v61 }
  0xae   :  { %6480 = vmatprep.mubr.msk.f32.mxu0 %vm7533_vm0, %v10275_v5 }
  0xb1   :  { %6481 = vmatmul.mubr.msk.f32.gmra.mrb[84].mxu0 %vm99_vm1, %v92_v62 }
  0xb2   :  { %6670 = vmatprep.mubr.msk.f32.mxu0 %vm7533_vm0, %v10275_v5 }
  0xb5   :  { %6671 = vmatmul.mubr.msk.f32.vlgmr.msra.gmra.mrb[86].mxu0 %vm99_vm1, %v5687_v63 }
  0xb6   :  { %6673 = vmatprep.mubr.msk.f32.mxu0 %vm7533_vm0, %v10275_v5  ;;  %7388 = vmatpush3.bf16.msra.mxu0 %v7617_v4 }
  0xb7   :  { %7392 = vmatprep.subr.bf16.mxu0 %v10273_v3 }
  0xb9   :  { %6674 = vmatmul.mubr.msk.f32.gmra.mrb[88].mxu0 %vm99_vm1, %v5688_v0 }
  0xba   :  { %6676 = vmatprep.mubr.msk.f32.mxu0 %vm7533_vm0, %v10275_v5 }
  0xbd   :  { %6677 = vmatmul.mubr.msk.f32.gmra.mrb[90].mxu0 %vm99_vm1, %v5689_v1 }
  0xbe   :  { %6679 = vmatprep.mubr.msk.f32.mxu0 %vm7533_vm0, %v10275_v5 }
  0xc1   :  { %6680 = vmatmul.mubr.msk.f32.gmra.mrb[92].mxu0 %vm99_vm1, %v5690_v2 }
  0xc2   :  { %6682 = vmatprep.mubr.msk.f32.mxu0 %vm7533_vm0, %v10275_v5 }
  0xc5   :  { %6683 = vmatmul.mubr.msk.f32.gmra.mrb[94].mxu0 %vm99_vm1, %v5691_v6 }
  0xc6   :  { %6685 = vmatprep.mubr.msk.f32.mxu0 %vm7533_vm0, %v10275_v5 }
  0xc9   :  { %6686 = vmatmul.mubr.msk.f32.gmra.mrb[96].mxu0 %vm99_vm1, %v5692_v7 }
  0xca   :  { %6688 = vmatprep.mubr.msk.f32.mxu0 %vm7533_vm0, %v10275_v5 }
  0xcd   :  { %6689 = vmatmul.mubr.msk.f32.gmra.mrb[98].mxu0 %vm99_vm1, %v5693_v8 }
  0xce   :  { %6724 = vmatprep.mubr.msk.f32.mxu0 %vm7533_vm0, %v10275_v5 }
  0xd1   :  { %6725 = vmatmul.mubr.msk.f32.vlgmr.msra.gmra.mrb[100].mxu0 %vm99_vm1, %v5712_v9 }
  0xd2   :  { %6727 = vmatprep.mubr.msk.f32.mxu0 %vm7533_vm0, %v10275_v5 }
  0xd5   :  { %6728 = vmatmul.mubr.msk.f32.gmra.mrb[102].mxu0 %vm99_vm1, %v5713_v10 }
  0xd6   :  { %6730 = vmatprep.mubr.msk.f32.mxu0 %vm7533_vm0, %v10275_v5 }
  0xd9   :  { %6731 = vmatmul.mubr.msk.f32.gmra.mrb[104].mxu0 %vm99_vm1, %v5714_v11 }
  0xda   :  { %6733 = vmatprep.mubr.msk.f32.mxu0 %vm7533_vm0, %v10275_v5 }
  0xdc   :  { %v295_v14 = vpop.f32.mrb[0].mxu0 }
  0xdd   :  { %v296_v15 = vadd.f32 %v8037_v12, %v295_v14  ;;  %v6356_v16 = vpop.f32.mrb[1].mxu0  ;;  %6734 = vmatmul.mubr.msk.f32.gmra.mrb[106].mxu0 %vm99_vm1, %v5715_v13 }
  0xde   :  { %6736 = vmatprep.mubr.msk.f32.mxu0 %vm7533_vm0, %v10275_v5 }
  0xdf   :  { %v603_v19 = vmul.f32 %v296_v15, %v296_v15  ;;  %v510_v23 = vsel %vm509_vm2, %v296_v15, 0.0 }
  0xe0   :  { %v300_v18 = vpop.f32.mrb[2].mxu0 }
  0xe1   :  { %v301_v20 = vadd.f32 %v8037_v12, %v300_v18  ;;  %v6359_v21 = vpop.f32.mrb[3].mxu0  ;;  %6737 = vmatmul.mubr.msk.f32.gmra.mrb[108].mxu0 %vm99_vm1, %v5716_v17  ;;  %v646_v28 = vsel %vm509_vm2, %v603_v19, 0.0 }
  0xe2   :  { %6739 = vmatprep.mubr.msk.f32.mxu0 %vm7533_vm0, %v10275_v5 }
  0xe3   :  { %v511_v24 = vsel %vm509_vm2, %v301_v20, 0.0  ;;  %v604_v25 = vmul.f32 %v301_v20, %v301_v20 }
  0xe4   :  { %v512_v26 = vadd.f32 %v511_v24, %v510_v23  ;;  %v305_v27 = vpop.f32.mrb[4].mxu0 }
  0xe5   :  { %v647_v29 = vsel %vm509_vm2, %v604_v25, 0.0  ;;  %v306_v30 = vadd.f32 %v8037_v12, %v305_v27  ;;  %v6362_v31 = vpop.f32.mrb[5].mxu0  ;;  %6740 = vmatmul.mubr.msk.f32.gmra.mrb[110].mxu0 %vm99_vm1, %v5717_v22 }
  0xe6   :  { %v648_v32 = vadd.f32 %v647_v29, %v646_v28  ;;  %6742 = vmatprep.mubr.msk.f32.mxu0 %vm7533_vm0, %v10275_v5 }
  0xe7   :  { %v513_v34 = vsel %vm509_vm2, %v306_v30, 0.0  ;;  %v605_v35 = vmul.f32 %v306_v30, %v306_v30 }
  0xe8   :  { %v514_v36 = vadd.f32 %v513_v34, %v512_v26  ;;  %v310_v37 = vpop.f32.mrb[6].mxu0 }
  0xe9   :  { %v649_v38 = vsel %vm509_vm2, %v605_v35, 0.0  ;;  %v311_v39 = vadd.f32 %v8037_v12, %v310_v37  ;;  %v6365_v40 = vpop.f32.mrb[7].mxu0  ;;  %6743 = vmatmul.mubr.msk.f32.gmra.mrb[112].mxu0 %vm99_vm1, %v5718_v33 }
  0xea   :  { %v650_v41 = vadd.f32 %v649_v38, %v648_v32  ;;  %6778 = vmatprep.mubr.msk.f32.mxu0 %vm7533_vm0, %v10275_v5 }
  0xeb   :  { %v515_v42 = vsel %vm509_vm2, %v311_v39, 0.0  ;;  %v606_v43 = vmul.f32 %v311_v39, %v311_v39 }
  0xec   :  { %v516_v44 = vadd.f32 %v515_v42, %v514_v36  ;;  %v315_v45 = vpop.f32.mrb[8].mxu0 }
  0xed   :  { %v651_v46 = vsel %vm509_vm2, %v606_v43, 0.0  ;;  %v316_v47 = vadd.f32 %v8037_v12, %v315_v45  ;;  %v6368_v48 = vpop.f32.mrb[9].mxu0 }
  0xee   :  { %v652_v49 = vadd.f32 %v651_v46, %v650_v41 }
  0xef   :  { %v517_v50 = vsel %vm509_vm2, %v316_v47, 0.0  ;;  %v607_v51 = vmul.f32 %v316_v47, %v316_v47 }
  0xf0   :  { %v518_v52 = vadd.f32 %v517_v50, %v516_v44  ;;  %v320_v53 = vpop.f32.mrb[10].mxu0 }
  0xf1   :  { %v653_v54 = vsel %vm509_vm2, %v607_v51, 0.0  ;;  %v321_v55 = vadd.f32 %v8037_v12, %v320_v53  ;;  %v6371_v56 = vpop.f32.mrb[11].mxu0 }
  0xf2   :  { %v654_v57 = vadd.f32 %v653_v54, %v652_v49 }
  0xf3   :  { %v519_v58 = vsel %vm509_vm2, %v321_v55, 0.0  ;;  %v608_v59 = vmul.f32 %v321_v55, %v321_v55 }
  0xf4   :  { %v520_v60 = vadd.f32 %v519_v58, %v518_v52  ;;  %v325_v61 = vpop.f32.mrb[12].mxu0 }
  0xf5   :  { %v655_v62 = vsel %vm509_vm2, %v608_v59, 0.0  ;;  %v326_v63 = vadd.f32 %v8037_v12, %v325_v61  ;;  %v6374_v0 = vpop.f32.mrb[13].mxu0  ;;  %v8105_v61 = vpop.f32.mrb[0].mxu1 }
  0xf6   :  { %v656_v1 = vadd.f32 %v655_v62, %v654_v57 }
  0xf7   :  { %v521_v2 = vsel %vm509_vm2, %v326_v63, 0.0  ;;  %v609_v6 = vmul.f32 %v326_v63, %v326_v63  ;;  %v6489_v63 = vpop.f32.mrb[1].mxu1 }
  0xf8   :  { %v522_v7 = vadd.f32 %v521_v2, %v520_v60  ;;  %v330_v8 = vpop.f32.mrb[14].mxu0 }
  0xf9   :  { %v657_v9 = vsel %vm509_vm2, %v609_v6, 0.0  ;;  %v331_v10 = vadd.f32 %v8037_v12, %v330_v8  ;;  %v6377_v11 = vpop.f32.mrb[15].mxu0 }
  0xfa   :  { %v658_v13 = vadd.f32 %v657_v9, %v656_v1 }
  0xfb   :  { %v523_v14 = vsel %vm509_vm2, %v331_v10, 0.0  ;;  %v610_v15 = vmul.f32 %v331_v10, %v331_v10 }
  0xfc   :  { %v524_v16 = vadd.f32 %v523_v14, %v522_v7  ;;  %v335_v17 = vpop.f32.mrb[16].mxu0  ;;  %v8108_v7 = vpop.f32.mrb[2].mxu1 }
  0xfd   :  { %v659_v18 = vsel %vm509_vm2, %v610_v15, 0.0  ;;  %v336_v19 = vadd.f32 %v8037_v12, %v335_v17  ;;  %v6380_v20 = vpop.f32.mrb[17].mxu0  ;;  %v6492_v11 = vpop.f32.mrb[3].mxu1 }
  0xfe   :  { %v660_v21 = vadd.f32 %v659_v18, %v658_v13  ;;  %v8112_v14 = vpop.f32.mrb[4].mxu1 }
  0xff   :  { %v525_v22 = vsel %vm509_vm2, %v336_v19, 0.0  ;;  %v611_v23 = vmul.f32 %v336_v19, %v336_v19  ;;  %v6495_v17 = vpop.f32.mrb[5].mxu1 }
 0x100   :  { %v526_v24 = vadd.f32 %v525_v22, %v524_v16  ;;  %v340_v25 = vpop.f32.mrb[18].mxu0  ;;  %v8115_v20 = vpop.f32.mrb[6].mxu1 }
 0x101   :  { %v661_v26 = vsel %vm509_vm2, %v611_v23, 0.0  ;;  %v341_v27 = vadd.f32 %v8037_v12, %v340_v25  ;;  %v6383_v28 = vpop.f32.mrb[19].mxu0 }
 0x102   :  { %v662_v29 = vadd.f32 %v661_v26, %v660_v21 }
 0x103   :  { %v527_v30 = vsel %vm509_vm2, %v341_v27, 0.0  ;;  %v612_v31 = vmul.f32 %v341_v27, %v341_v27 }
 0x104   :  { %v528_v32 = vadd.f32 %v527_v30, %v526_v24  ;;  %v345_v33 = vpop.f32.mrb[20].mxu0  ;;  %v6498_v24 = vpop.f32.mrb[7].mxu1 }
 0x105   :  { %v663_v34 = vsel %vm509_vm2, %v612_v31, 0.0  ;;  %v346_v35 = vadd.f32 %v8037_v12, %v345_v33  ;;  %v6386_v36 = vpop.f32.mrb[21].mxu0  ;;  %v8120_v28 = vpop.f32.mrb[8].mxu1 }
 0x106   :  { %v664_v37 = vadd.f32 %v663_v34, %v662_v29  ;;  %v6501_v31 = vpop.f32.mrb[9].mxu1 }
 0x107   :  { %v529_v38 = vsel %vm509_vm2, %v346_v35, 0.0  ;;  %v613_v39 = vmul.f32 %v346_v35, %v346_v35  ;;  %v8124_v35 = vpop.f32.mrb[10].mxu1  ;;  %v5616_v31 = vld [vmem:[%s10265_s6 + $0x28] sm:$0xff] }
 0x108   :  { %v530_v40 = vadd.f32 %v529_v38, %v528_v32  ;;  %v350_v41 = vpop.f32.mrb[22].mxu0 }
 0x109   :  { %v665_v42 = vsel %vm509_vm2, %v613_v39, 0.0  ;;  %v351_v43 = vadd.f32 %v8037_v12, %v350_v41  ;;  %v6389_v44 = vpop.f32.mrb[23].mxu0 }
 0x10a   :  { %v666_v45 = vadd.f32 %v665_v42, %v664_v37  ;;  %v6504_v37 = vpop.f32.mrb[11].mxu1 }
 0x10b   :  { %v531_v46 = vsel %vm509_vm2, %v351_v43, 0.0  ;;  %v614_v47 = vmul.f32 %v351_v43, %v351_v43  ;;  %v8127_v42 = vpop.f32.mrb[12].mxu1 }
 0x10c   :  { %v532_v48 = vadd.f32 %v531_v46, %v530_v40  ;;  %v355_v49 = vpop.f32.mrb[24].mxu0  ;;  %v6507_v46 = vpop.f32.mrb[13].mxu1 }
 0x10d   :  { %v667_v50 = vsel %vm509_vm2, %v614_v47, 0.0  ;;  %v356_v51 = vadd.f32 %v8037_v12, %v355_v49  ;;  %v6392_v52 = vpop.f32.mrb[25].mxu0 }
 0x10e   :  { %v668_v53 = vadd.f32 %v667_v50, %v666_v45 }
 0x10f   :  { %v533_v54 = vsel %vm509_vm2, %v356_v51, 0.0  ;;  %v615_v55 = vmul.f32 %v356_v51, %v356_v51 }
 0x110   :  { %v534_v56 = vadd.f32 %v533_v54, %v532_v48  ;;  %v360_v57 = vpop.f32.mrb[26].mxu0  ;;  %v8131_v48 = vpop.f32.mrb[14].mxu1 }
 0x111   :  { %v669_v58 = vsel %vm509_vm2, %v615_v55, 0.0  ;;  %v361_v59 = vadd.f32 %v8037_v12, %v360_v57  ;;  %v6395_v60 = vpop.f32.mrb[27].mxu0  ;;  %v6514_v51 = vpop.f32.mrb[15].mxu1 }
 0x112   :  { %v670_v62 = vadd.f32 %v669_v58, %v668_v53  ;;  %v8136_v57 = vpop.f32.mrb[16].mxu1 }
 0x113   :  { %v535_v0 = vsel %vm509_vm2, %v361_v59, 0.0  ;;  %v616_v1 = vmul.f32 %v361_v59, %v361_v59  ;;  %v6517_v59 = vpop.f32.mrb[17].mxu1 }
 0x114   :  { %v536_v2 = vadd.f32 %v535_v0, %v534_v56  ;;  %v365_v6 = vpop.f32.mrb[28].mxu0  ;;  %v8142_v11 = vpop.f32.mrb[18].mxu1 }
 0x115   :  { %v671_v8 = vsel %vm509_vm2, %v616_v1, 0.0  ;;  %v366_v9 = vadd.f32 %v8037_v12, %v365_v6  ;;  %v6398_v10 = vpop.f32.mrb[29].mxu0 }
 0x116   :  { %v672_v13 = vadd.f32 %v671_v8, %v670_v62 }
 0x117   :  { %v537_v15 = vsel %vm509_vm2, %v366_v9, 0.0  ;;  %v617_v16 = vmul.f32 %v366_v9, %v366_v9 }
 0x118   :  { %v538_v18 = vadd.f32 %v537_v15, %v536_v2  ;;  %v370_v19 = vpop.f32.mrb[30].mxu0 }
 0x119   :  { %v673_v21 = vsel %vm509_vm2, %v617_v16, 0.0  ;;  %v371_v22 = vadd.f32 %v8037_v12, %v370_v19  ;;  %v6401_v23 = vpop.f32.mrb[31].mxu0  ;;  %v6520_v16 = vpop.f32.mrb[19].mxu1 }
 0x11a   :  { %v674_v25 = vadd.f32 %v673_v21, %v672_v13 }
 0x11b   :  { %v539_v26 = vsel %vm509_vm2, %v371_v22, 0.0  ;;  %v618_v27 = vmul.f32 %v371_v22, %v371_v22 }
 0x11c   :  { %v540_v29 = vadd.f32 %v539_v26, %v538_v18  ;;  %v375_v30 = vpop.f32.mrb[32].mxu0 }
 0x11d   :  { %v675_v32 = vsel %vm509_vm2, %v618_v27, 0.0  ;;  %v376_v33 = vadd.f32 %v8037_v12, %v375_v30  ;;  %v6404_v34 = vpop.f32.mrb[33].mxu0  ;;  %v5615_v30 = vld [vmem:[%s10265_s6 + $0x20] sm:$0xff] }
 0x11e   :  { %v676_v36 = vadd.f32 %v675_v32, %v674_v25  ;;  %v8155_v32 = vpop.f32.mrb[20].mxu1  ;;  %v7357_v34 = vpack.c.bf16 %v5616_v31, %v5615_v30 }
 0x11f   :  { %v541_v38 = vsel %vm509_vm2, %v376_v33, 0.0  ;;  %v619_v39 = vmul.f32 %v376_v33, %v376_v33 }
 0x120   :  { %v542_v40 = vadd.f32 %v541_v38, %v540_v29  ;;  %v380_v41 = vpop.f32.mrb[34].mxu0  ;;  %7358 = vmatpush3.bf16.msra.mxu1 %v7357_v34 }
 0x121   :  { %v677_v43 = vsel %vm509_vm2, %v619_v39, 0.0  ;;  %v381_v44 = vadd.f32 %v8037_v12, %v380_v41  ;;  %v6407_v45 = vpop.f32.mrb[35].mxu0  ;;  %7359 = vmatprep.subr.bf16.mxu1 %v10273_v3 }
 0x122   :  { %v678_v47 = vadd.f32 %v677_v43, %v676_v36  ;;  %v6523_v36 = vpop.f32.mrb[21].mxu1 }
 0x123   :  { %v543_v49 = vsel %vm509_vm2, %v381_v44, 0.0  ;;  %v620_v50 = vmul.f32 %v381_v44, %v381_v44  ;;  %v8158_v41 = vpop.f32.mrb[22].mxu1 }
 0x124   :  { %v544_v52 = vadd.f32 %v543_v49, %v542_v40  ;;  %v385_v53 = vpop.f32.mrb[36].mxu0  ;;  %v6526_v46 = vpop.f32.mrb[23].mxu1 }
 0x125   :  { %v679_v54 = vsel %vm509_vm2, %v620_v50, 0.0  ;;  %v386_v55 = vadd.f32 %v8037_v12, %v385_v53  ;;  %v6410_v56 = vpop.f32.mrb[37].mxu0  ;;  %v8164_v51 = vpop.f32.mrb[24].mxu1 }
 0x126   :  { %v680_v58 = vadd.f32 %v679_v54, %v678_v47  ;;  %v6529_v54 = vpop.f32.mrb[25].mxu1 }
 0x127   :  { %v545_v60 = vsel %vm509_vm2, %v386_v55, 0.0  ;;  %v621_v62 = vmul.f32 %v386_v55, %v386_v55 }
 0x128   :  { %v546_v63 = vadd.f32 %v545_v60, %v544_v52  ;;  %v390_v0 = vpop.f32.mrb[38].mxu0 }
 0x129   :  { %v681_v1 = vsel %vm509_vm2, %v621_v62, 0.0  ;;  %v391_v2 = vadd.f32 %v8037_v12, %v390_v0  ;;  %v6413_v6 = vpop.f32.mrb[39].mxu0 }
 0x12a   :  { %v682_v8 = vadd.f32 %v681_v1, %v680_v58 }
 0x12b   :  { %v547_v9 = vsel %vm509_vm2, %v391_v2, 0.0  ;;  %v622_v10 = vmul.f32 %v391_v2, %v391_v2 }
 0x12c   :  { %v548_v13 = vadd.f32 %v547_v9, %v546_v63  ;;  %v395_v15 = vpop.f32.mrb[40].mxu0 }
 0x12d   :  { %v683_v17 = vsel %vm509_vm2, %v622_v10, 0.0  ;;  %v396_v18 = vadd.f32 %v8037_v12, %v395_v15  ;;  %v6416_v19 = vpop.f32.mrb[41].mxu0 }
 0x12e   :  { %v684_v21 = vadd.f32 %v683_v17, %v682_v8  ;;  %v8171_v8 = vpop.f32.mrb[26].mxu1 }
 0x12f   :  { %v549_v22 = vsel %vm509_vm2, %v396_v18, 0.0  ;;  %v623_v23 = vmul.f32 %v396_v18, %v396_v18  ;;  %v6532_v10 = vpop.f32.mrb[27].mxu1 }
 0x130   :  { %v550_v24 = vadd.f32 %v549_v22, %v548_v13  ;;  %v400_v25 = vpop.f32.mrb[42].mxu0 }
 0x131   :  { %v685_v26 = vsel %vm509_vm2, %v623_v23, 0.0  ;;  %v401_v27 = vadd.f32 %v8037_v12, %v400_v25  ;;  %v6419_v29 = vpop.f32.mrb[43].mxu0 }
 0x132   :  { %v686_v33 = vadd.f32 %v685_v26, %v684_v21  ;;  %v5618_v29 = vld [vmem:[%s10265_s6 + $0x38] sm:$0xff] }
 0x133   :  { %v551_v37 = vsel %vm509_vm2, %v401_v27, 0.0  ;;  %v624_v38 = vmul.f32 %v401_v27, %v401_v27  ;;  %v5617_v27 = vld [vmem:[%s10265_s6 + $0x30] sm:$0xff] }
 0x134   :  { %v552_v39 = vadd.f32 %v551_v37, %v550_v24  ;;  %v405_v40 = vpop.f32.mrb[44].mxu0  ;;  %v7360_v34 = vpack.c.bf16 %v5618_v29, %v5617_v27 }
 0x135   :  { %v687_v43 = vsel %vm509_vm2, %v624_v38, 0.0  ;;  %v406_v44 = vadd.f32 %v8037_v12, %v405_v40  ;;  %v6422_v45 = vpop.f32.mrb[45].mxu0 }
 0x136   :  { %v688_v47 = vadd.f32 %v687_v43, %v686_v33  ;;  %7361 = vmatpush3.bf16.msra.mxu1 %v7360_v34 }
 0x137   :  { %v553_v49 = vsel %vm509_vm2, %v406_v44, 0.0  ;;  %v625_v50 = vmul.f32 %v406_v44, %v406_v44  ;;  %7362 = vmatprep.subr.bf16.mxu1 %v10273_v3 }
 0x138   :  { %v554_v52 = vadd.f32 %v553_v49, %v552_v39  ;;  %v410_v53 = vpop.f32.mrb[46].mxu0 }
 0x139   :  { %v689_v55 = vsel %vm509_vm2, %v625_v50, 0.0  ;;  %v411_v56 = vadd.f32 %v8037_v12, %v410_v53  ;;  %v6425_v58 = vpop.f32.mrb[47].mxu0 }
 0x13a   :  { %v690_v59 = vadd.f32 %v689_v55, %v688_v47 }
 0x13b   :  { %v555_v60 = vsel %vm509_vm2, %v411_v56, 0.0  ;;  %v626_v62 = vmul.f32 %v411_v56, %v411_v56 }
 0x13c   :  { %v556_v63 = vadd.f32 %v555_v60, %v554_v52  ;;  %v415_v0 = vpop.f32.mrb[48].mxu0 }
 0x13d   :  { %v691_v1 = vsel %vm509_vm2, %v626_v62, 0.0  ;;  %v416_v2 = vadd.f32 %v8037_v12, %v415_v0  ;;  %v6428_v6 = vpop.f32.mrb[49].mxu0 }
 0x13e   :  { %v692_v9 = vadd.f32 %v691_v1, %v690_v59 }
 0x13f   :  { %v557_v13 = vsel %vm509_vm2, %v416_v2, 0.0  ;;  %v627_v15 = vmul.f32 %v416_v2, %v416_v2 }
 0x140   :  { %v558_v16 = vadd.f32 %v557_v13, %v556_v63  ;;  %v420_v17 = vpop.f32.mrb[50].mxu0 }
 0x141   :  { %v693_v18 = vsel %vm509_vm2, %v627_v15, 0.0  ;;  %v421_v19 = vadd.f32 %v8037_v12, %v420_v17  ;;  %v6431_v21 = vpop.f32.mrb[51].mxu0 }
 0x142   :  { %v694_v22 = vadd.f32 %v693_v18, %v692_v9 }
 0x143   :  { %v559_v23 = vsel %vm509_vm2, %v421_v19, 0.0  ;;  %v628_v24 = vmul.f32 %v421_v19, %v421_v19 }
 0x144   :  { %v560_v25 = vadd.f32 %v559_v23, %v558_v16  ;;  %v425_v26 = vpop.f32.mrb[52].mxu0 }
 0x145   :  { %v695_v30 = vsel %vm509_vm2, %v628_v24, 0.0  ;;  %v426_v31 = vadd.f32 %v8037_v12, %v425_v26  ;;  %v6434_v33 = vpop.f32.mrb[53].mxu0 }
 0x146   :  { %v696_v36 = vadd.f32 %v695_v30, %v694_v22 }
 0x147   :  { %v561_v37 = vsel %vm509_vm2, %v426_v31, 0.0  ;;  %v629_v38 = vmul.f32 %v426_v31, %v426_v31 }
 0x148   :  { %v562_v39 = vadd.f32 %v561_v37, %v560_v25  ;;  %v430_v40 = vpop.f32.mrb[54].mxu0 }
 0x149   :  { %v697_v43 = vsel %vm509_vm2, %v629_v38, 0.0  ;;  %v431_v44 = vadd.f32 %v8037_v12, %v430_v40  ;;  %v6437_v45 = vpop.f32.mrb[55].mxu0 }
 0x14a   :  { %v698_v46 = vadd.f32 %v697_v43, %v696_v36 }
 0x14b   :  { %v563_v47 = vsel %vm509_vm2, %v431_v44, 0.0  ;;  %v630_v49 = vmul.f32 %v431_v44, %v431_v44 }
 0x14c   :  { %v564_v50 = vadd.f32 %v563_v47, %v562_v39  ;;  %v435_v52 = vpop.f32.mrb[56].mxu0 }
 0x14d   :  { %v699_v53 = vsel %vm509_vm2, %v630_v49, 0.0  ;;  %v436_v54 = vadd.f32 %v8037_v12, %v435_v52  ;;  %v6440_v55 = vpop.f32.mrb[57].mxu0 }
 0x14e   :  { %v700_v56 = vadd.f32 %v699_v53, %v698_v46 }
 0x14f   :  { %v565_v58 = vsel %vm509_vm2, %v436_v54, 0.0  ;;  %v631_v59 = vmul.f32 %v436_v54, %v436_v54 }
 0x150   :  { %v566_v60 = vadd.f32 %v565_v58, %v564_v50  ;;  %v440_v62 = vpop.f32.mrb[58].mxu0 }
 0x151   :  { %v701_v63 = vsel %vm509_vm2, %v631_v59, 0.0  ;;  %v441_v0 = vadd.f32 %v8037_v12, %v440_v62  ;;  %v6443_v1 = vpop.f32.mrb[59].mxu0 }
 0x152   :  { %v702_v2 = vadd.f32 %v701_v63, %v700_v56 }
 0x153   :  { %v567_v6 = vsel %vm509_vm2, %v441_v0, 0.0  ;;  %v632_v9 = vmul.f32 %v441_v0, %v441_v0 }
 0x154   :  { %v568_v10 = vadd.f32 %v567_v6, %v566_v60  ;;  %v445_v13 = vpop.f32.mrb[60].mxu0 }
 0x155   :  { %v703_v15 = vsel %vm509_vm2, %v632_v9, 0.0  ;;  %v446_v16 = vadd.f32 %v8037_v12, %v445_v13  ;;  %v6446_v17 = vpop.f32.mrb[61].mxu0 }
 0x156   :  { %v704_v18 = vadd.f32 %v703_v15, %v702_v2 }
 0x157   :  { %v569_v19 = vsel %vm509_vm2, %v446_v16, 0.0  ;;  %v633_v21 = vmul.f32 %v446_v16, %v446_v16 }
 0x158   :  { %v570_v22 = vadd.f32 %v569_v19, %v568_v10  ;;  %v450_v23 = vpop.f32.mrb[62].mxu0 }
 0x159   :  { %v705_v24 = vsel %vm509_vm2, %v633_v21, 0.0  ;;  %v451_v25 = vadd.f32 %v8037_v12, %v450_v23  ;;  %v6449_v26 = vpop.f32.mrb[63].mxu0 }
 0x15a   :  { %v706_v27 = vadd.f32 %v705_v24, %v704_v18 }
 0x15b   :  { %v571_v29 = vsel %vm509_vm2, %v451_v25, 0.0  ;;  %v634_v30 = vmul.f32 %v451_v25, %v451_v25 }
 0x15c   :  { %v572_v31 = vadd.f32 %v571_v29, %v570_v22  ;;  %v455_v33 = vpop.f32.mrb[64].mxu0 }
 0x15d   :  { %v707_v34 = vsel %vm509_vm2, %v634_v30, 0.0  ;;  %v456_v36 = vadd.f32 %v8037_v12, %v455_v33  ;;  %v6452_v37 = vpop.f32.mrb[65].mxu0 }
 0x15e   :  { %v708_v38 = vadd.f32 %v707_v34, %v706_v27 }
 0x15f   :  { %v573_v39 = vsel %vm509_vm2, %v456_v36, 0.0  ;;  %v635_v40 = vmul.f32 %v456_v36, %v456_v36 }
 0x160   :  { %v574_v43 = vadd.f32 %v573_v39, %v572_v31  ;;  %v460_v44 = vpop.f32.mrb[66].mxu0 }
 0x161   :  { %v709_v45 = vsel %vm509_vm2, %v635_v40, 0.0  ;;  %v461_v46 = vadd.f32 %v8037_v12, %v460_v44  ;;  %v6455_v47 = vpop.f32.mrb[67].mxu0 }
 0x162   :  { %v710_v49 = vadd.f32 %v709_v45, %v708_v38 }
 0x163   :  { %v575_v50 = vsel %vm509_vm2, %v461_v46, 0.0  ;;  %v636_v52 = vmul.f32 %v461_v46, %v461_v46 }
 0x164   :  { %v576_v53 = vadd.f32 %v575_v50, %v574_v43  ;;  %v465_v54 = vpop.f32.mrb[68].mxu0 }
 0x165   :  { %v711_v55 = vsel %vm509_vm2, %v636_v52, 0.0  ;;  %v466_v56 = vadd.f32 %v8037_v12, %v465_v54  ;;  %v6458_v58 = vpop.f32.mrb[69].mxu0 }
 0x166   :  { %v712_v59 = vadd.f32 %v711_v55, %v710_v49 }
 0x167   :  { %v577_v60 = vsel %vm509_vm2, %v466_v56, 0.0  ;;  %v637_v62 = vmul.f32 %v466_v56, %v466_v56 }
 0x168   :  { %v578_v63 = vadd.f32 %v577_v60, %v576_v53  ;;  %v470_v0 = vpop.f32.mrb[70].mxu0 }
 0x169   :  { %v713_v1 = vsel %vm509_vm2, %v637_v62, 0.0  ;;  %v471_v2 = vadd.f32 %v8037_v12, %v470_v0  ;;  %v6461_v6 = vpop.f32.mrb[71].mxu0 }
 0x16a   :  { %v714_v9 = vadd.f32 %v713_v1, %v712_v59 }
 0x16b   :  { %v579_v10 = vsel %vm509_vm2, %v471_v2, 0.0  ;;  %v638_v13 = vmul.f32 %v471_v2, %v471_v2 }
 0x16c   :  { %v580_v15 = vadd.f32 %v579_v10, %v578_v63  ;;  %v475_v16 = vpop.f32.mrb[72].mxu0 }
 0x16d   :  { %v715_v17 = vsel %vm509_vm2, %v638_v13, 0.0  ;;  %v476_v18 = vadd.f32 %v8037_v12, %v475_v16  ;;  %v6464_v19 = vpop.f32.mrb[73].mxu0 }
 0x16e   :  { %v716_v21 = vadd.f32 %v715_v17, %v714_v9 }
 0x16f   :  { %v581_v22 = vsel %vm509_vm2, %v476_v18, 0.0  ;;  %v639_v23 = vmul.f32 %v476_v18, %v476_v18 }
 0x170   :  { %v582_v24 = vadd.f32 %v581_v22, %v580_v15  ;;  %v480_v25 = vpop.f32.mrb[74].mxu0 }
 0x171   :  { %v717_v26 = vsel %vm509_vm2, %v639_v23, 0.0  ;;  %v481_v27 = vadd.f32 %v8037_v12, %v480_v25  ;;  %v6467_v29 = vpop.f32.mrb[75].mxu0 }
 0x172   :  { %v718_v30 = vadd.f32 %v717_v26, %v716_v21 }
 0x173   :  { %v583_v31 = vsel %vm509_vm2, %v481_v27, 0.0  ;;  %v640_v33 = vmul.f32 %v481_v27, %v481_v27 }
 0x174   :  { %v584_v34 = vadd.f32 %v583_v31, %v582_v24  ;;  %v485_v36 = vpop.f32.mrb[76].mxu0 }
 0x175   :  { %v719_v37 = vsel %vm509_vm2, %v640_v33, 0.0  ;;  %v486_v38 = vadd.f32 %v8037_v12, %v485_v36  ;;  %v6470_v39 = vpop.f32.mrb[77].mxu0 }
 0x176   :  { %v720_v40 = vadd.f32 %v719_v37, %v718_v30 }
 0x177   :  { %v585_v43 = vsel %vm509_vm2, %v486_v38, 0.0  ;;  %v641_v44 = vmul.f32 %v486_v38, %v486_v38 }
 0x178   :  { %v586_v45 = vadd.f32 %v585_v43, %v584_v34  ;;  %v490_v46 = vpop.f32.mrb[78].mxu0 }
 0x179   :  { %v721_v47 = vsel %vm509_vm2, %v641_v44, 0.0  ;;  %v491_v49 = vadd.f32 %v8037_v12, %v490_v46  ;;  %v6473_v50 = vpop.f32.mrb[79].mxu0 }
 0x17a   :  { %v722_v52 = vadd.f32 %v721_v47, %v720_v40 }
 0x17b   :  { %v587_v53 = vsel %vm509_vm2, %v491_v49, 0.0  ;;  %v642_v54 = vmul.f32 %v491_v49, %v491_v49 }
 0x17c   :  { %v588_v55 = vadd.f32 %v587_v53, %v586_v45  ;;  %v495_v56 = vpop.f32.mrb[80].mxu0 }
 0x17d   :  { %v723_v58 = vsel %vm509_vm2, %v642_v54, 0.0  ;;  %v496_v59 = vadd.f32 %v8037_v12, %v495_v56  ;;  %v6476_v60 = vpop.f32.mrb[81].mxu0 }
 0x17e   :  { %v724_v62 = vadd.f32 %v723_v58, %v722_v52 }
 0x17f   :  { %v589_v63 = vsel %vm509_vm2, %v496_v59, 0.0  ;;  %v643_v0 = vmul.f32 %v496_v59, %v496_v59 }
 0x180   :  { %v590_v1 = vadd.f32 %v589_v63, %v588_v55  ;;  %v500_v2 = vpop.f32.mrb[82].mxu0 }
 0x181   :  { %v725_v6 = vsel %vm509_vm2, %v643_v0, 0.0  ;;  %v501_v9 = vadd.f32 %v8037_v12, %v500_v2  ;;  %v6479_v10 = vpop.f32.mrb[83].mxu0 }
 0x182   :  { %v726_v13 = vadd.f32 %v725_v6, %v724_v62 }
 0x183   :  { %v591_v15 = vsel %vm509_vm2, %v501_v9, 0.0  ;;  %v644_v16 = vmul.f32 %v501_v9, %v501_v9 }
 0x184   :  { %v592_v17 = vadd.f32 %v591_v15, %v590_v1  ;;  %v505_v18 = vpop.f32.mrb[84].mxu0 }
 0x185   :  { %v727_v19 = vsel %vm509_vm2, %v644_v16, 0.0  ;;  %v506_v21 = vadd.f32 %v8037_v12, %v505_v18  ;;  %v6482_v22 = vpop.f32.mrb[85].mxu0  ;;  %v741_v18 = vld [vmem:[%s10263_s4] sm:$0x1] }
 0x186   :  { %v728_v23 = vadd.f32 %v727_v19, %v726_v13  ;;  %v877_v13 = vlaneseq }
 0x187   :  { %v594_v24 = vsel %vm593_vm3, %v506_v21, 0.0  ;;  %v645_v25 = vmul.f32 %v506_v21, %v506_v21 }
 0x188   :  { %v595_v26 = vadd.f32 %v594_v24, %v592_v17  ;;  %v8234_v27 = vpop.f32.mrb[86].mxu0  ;;  %v878_v17 = vshrl.u32 %v877_v13, 7  ;;  %v1041_v13 = vadd.f32 %v8037_v12, %v8164_v51 }
 0x189   :  { %v729_v29 = vsel %vm593_vm3, %v645_v25, 0.0  ;;  %v6672_v30 = vpop.f32.mrb[87].mxu0  ;;  %v745_v25 = vld [vmem:[%s10264_s5] sm:$0x1] }
 0x18a   :  { %v596_v31 = vrot.slane %v595_v26, 4  ;;  %v730_v33 = vadd.f32 %v729_v29, %v728_v23  ;;  %v8255_v24 = vsub.s32 0, %v878_v17 }
 0x18c   :  { %v597_v34 = vadd.f32 %v596_v31, %v595_v26  ;;  %v731_v36 = vrot.slane %v730_v33, 4  ;;  %v8236_v37 = vpop.f32.mrb[88].mxu0  ;;  %10280 = vst [vmem:[#allocation7_spill] sm:$0xff] %v8255_v24 }
 0x18d   :  { %v6675_v38 = vpop.f32.mrb[89].mxu0 }
 0x18e   :  { %v598_v39 = vrot.slane %v597_v34, 2  ;;  %v732_v40 = vadd.f32 %v731_v36, %v730_v33 }
 0x190   :  { %v599_v43 = vadd.f32 %v598_v39, %v597_v34  ;;  %v733_v44 = vrot.slane %v732_v40, 2  ;;  %v8238_v45 = vpop.f32.mrb[90].mxu0  ;;  %v1016_v34 = vadd.f32 %v8037_v12, %v8131_v48 }
 0x191   :  { %v6678_v46 = vpop.f32.mrb[91].mxu0 }
 0x192   :  { %v600_v47 = vrot.slane %v599_v43, 1  ;;  %v734_v49 = vadd.f32 %v733_v44, %v732_v40 }
 0x194   :  { %v601_v50 = vadd.f32 %v600_v47, %v599_v43  ;;  %v735_v52 = vrot.slane %v734_v49, 1  ;;  %v8240_v53 = vpop.f32.mrb[92].mxu0  ;;  %v1021_v43 = vadd.f32 %v8037_v12, %v8136_v57 }
 0x195   :  { %v6681_v54 = vpop.f32.mrb[93].mxu0 }
 0x196   :  { %v602_v55 = vmul.f32 0.00295858, %v601_v50  ;;  %v736_v56 = vadd.f32 %v735_v52, %v734_v49  ;;  %v1026_v49 = vadd.f32 %v8037_v12, %v8142_v11  ;;  %v1031_v52 = vadd.f32 %v8037_v12, %v8155_v32 }
 0x197   :  { %v1036_v11 = vadd.f32 %v8037_v12, %v8158_v41 }
 0x198   :  { %v737_v58 = vmul.f32 0.00295858, %v736_v56  ;;  %v738_v59 = vmul.f32 %v602_v55, %v602_v55  ;;  %v8242_v60 = vpop.f32.mrb[94].mxu0 }
 0x199   :  { %v6684_v62 = vpop.f32.mrb[95].mxu0 }
 0x19a   :  { %v739_v63 = vsub.f32 %v737_v58, %v738_v59 }
 0x19c   :  { %v740_v0 = vmax.f32 %v739_v63, 0.0  ;;  %v8244_v1 = vpop.f32.mrb[96].mxu0 }
 0x19d   :  { %v6687_v2 = vpop.f32.mrb[97].mxu0 }
 0x19e   :  { %v742_v6 = vadd.f32 1e-05, %v740_v0 }
 0x1a0   :  { %7501 = vrsqrt.f32 %v742_v6  ;;  %v8246_v9 = vpop.f32.mrb[98].mxu0 }
 0x1a1   :  { %v6690_v10 = vpop.f32.mrb[99].mxu0 }
 0x1a4   :  { %v8248_v15 = vpop.f32.mrb[100].mxu0 }
 0x1a5   :  { %v6726_v16 = vpop.f32.mrb[101].mxu0 }
 0x1a8   :  { %v8253_v19 = vpop.f32.mrb[102].mxu0 }
 0x1a9   :  { %10279 = vst [vmem:[#allocation6_spill] sm:$0xff] %v8253_v19  ;;  %v6729_v21 = vpop.f32.mrb[103].mxu0 }
 0x1aa   :  { %v7502_v22 = vpop.eup %7501 }
 0x1ab   :  { %v744_v23 = vmul.f32 %v7502_v22, %v741_v18  ;;  %v1046_v22 = vadd.f32 %v8037_v12, %v8171_v8 }
 0x1ac   :  { %v8260_v26 = vpop.f32.mrb[104].mxu0 }
 0x1ad   :  { %10281 = vst [vmem:[#allocation8_spill] sm:$0xff] %v8260_v26  ;;  %v746_v29 = vmul.f32 %v744_v23, %v602_v55  ;;  %v6732_v30 = vpop.f32.mrb[105].mxu0  ;;  %v8263_v33 = vrot.slane %v744_v23, %v8255_v24 }
 0x1af   :  { %v747_v31 = vsub.f32 %v745_v25, %v746_v29  ;;  %v1049_v40 = vmul.f32 %v1016_v34, %v8263_v33  ;;  %v1050_v50 = vmul.f32 %v1021_v43, %v8263_v33  ;;  %v1051_v58 = vmul.f32 %v1026_v49, %v8263_v33  ;;  %v5627_v43 = vld [vmem:[%s10260_s1 + $0x78] sm:$0xff]  ;;  %v5630_v49 = vld [vmem:[%s10260_s1 + $0x90] sm:$0xff] }
 0x1b0   :  { %v8267_v36 = vpop.f32.mrb[106].mxu0  ;;  %v1052_v62 = vmul.f32 %v1031_v52, %v8263_v33  ;;  %v1053_v41 = vmul.f32 %v1036_v11, %v8263_v33  ;;  %v1054_v21 = vmul.f32 %v1041_v13, %v8263_v33  ;;  %v1055_v29 = vmul.f32 %v1046_v22, %v8263_v33  ;;  %v5644_v52 = vld [vmem:[%s10260_s1 + $0xa8] sm:$0xff]  ;;  %v5658_v11 = vld [vmem:[%s10265_s6 + $0x60] sm:$0xff] }
 0x1b1   :  { %10282 = vst [vmem:[#allocation9_spill] sm:$0xff] %v8267_v36  ;;  %v8270_v38 = vrot.slane %v747_v31, %v8255_v24  ;;  %v6735_v39 = vpop.f32.mrb[107].mxu0 }
 0x1b3   :  { %v1056_v46 = vadd.f32 %v1049_v40, %v8270_v38  ;;  %v1057_v56 = vadd.f32 %v1050_v50, %v8270_v38  ;;  %v1058_v63 = vadd.f32 %v1051_v58, %v8270_v38  ;;  %v1059_v2 = vadd.f32 %v1052_v62, %v8270_v38  ;;  %v5626_v40 = vld [vmem:[%s10260_s1 + $0x70] sm:$0xff]  ;;  %v5632_v50 = vld [vmem:[%s10260_s1 + $0xa0] sm:$0x3]  ;;  %v5648_v58 = vld [vmem:[%s10260_s1 + $0xc8] sm:$0xff] }
 0x1b4   :  { %v8275_v44 = vpop.f32.mrb[108].mxu0  ;;  %v1060_v18 = vadd.f32 %v1053_v41, %v8270_v38  ;;  %v1061_v25 = vadd.f32 %v1054_v21, %v8270_v38  ;;  %v1062_v12 = vadd.f32 %v1055_v29, %v8270_v38  ;;  %v5650_v62 = vld [vmem:[%s10260_s1 + $0xd8] sm:$0x3] }
 0x1b5   :  { %10283 = vst [vmem:[#allocation10_spill] sm:$0xff] %v8275_v44  ;;  %v6738_v47 = vpop.f32.mrb[109].mxu0  ;;  %v1063_v48 = vmul.f32 0.2, %v1056_v46  ;;  %v1064_v59 = vmul.f32 0.2, %v1057_v56 }
 0x1b6   :  { %v1065_v10 = vmul.f32 0.2, %v1058_v63  ;;  %v1066_v17 = vmul.f32 0.2, %v1059_v2  ;;  %v1067_v23 = vmul.f32 0.2, %v1060_v18 }
 0x1b7   :  { %v1070_v55 = vmax.f32 %v1056_v46, %v1063_v48  ;;  %v1071_v0 = vmax.f32 %v1057_v56, %v1064_v59  ;;  %v1068_v31 = vmul.f32 0.2, %v1061_v25  ;;  %v1069_v34 = vmul.f32 0.2, %v1062_v12  ;;  %v5628_v46 = vld [vmem:[%s10260_s1 + $0x80] sm:$0xff]  ;;  %v5629_v47 = vld [vmem:[%s10260_s1 + $0x88] sm:$0xff] }
 0x1b8   :  { %v8283_v54 = vpop.f32.mrb[110].mxu0  ;;  %v1072_v16 = vmax.f32 %v1058_v63, %v1065_v10  ;;  %v1073_v51 = vmax.f32 %v1059_v2, %v1066_v17  ;;  %v1074_v30 = vmax.f32 %v1060_v18, %v1067_v23  ;;  %v5631_v48 = vld [vmem:[%s10260_s1 + $0x98] sm:$0xff]  ;;  %v5649_v59 = vld [vmem:[%s10260_s1 + $0xd0] sm:$0xff]  ;;  %v5659_v63 = vld [vmem:[%s10265_s6 + $0x68] sm:$0xff] }
 0x1b9   :  { %10284 = vst [vmem:[#allocation11_spill] sm:$0xff] %v8283_v54  ;;  %v6741_v57 = vpop.f32.mrb[111].mxu0  ;;  %6542 = vmatmul.mubr.msk.f32.vlgmr.msra.gmra.mrb[28].mxu1 %vm509_vm2, %v1070_v55  ;;  %v1075_v8 = vmax.f32 %v1061_v25, %v1068_v31  ;;  %v1076_v39 = vmax.f32 %v1062_v12, %v1069_v34  ;;  %v5645_v55 = vld [vmem:[%s10260_s1 + $0xb0] sm:$0xff]  ;;  %v5646_v56 = vld [vmem:[%s10260_s1 + $0xb8] sm:$0xff] }
 0x1ba   :  { %7364 = vmatpush3.bf16.msra.mxu1 %v7617_v4  ;;  %6544 = vmatprep.mubr.msk.f32.mxu1 %vm7533_vm0, %v10275_v5  ;;  %v5647_v57 = vld [vmem:[%s10260_s1 + $0xc0] sm:$0xff]  ;;  %v5660_v2 = vld [vmem:[%s10265_s6 + $0x70] sm:$0xff] }
 0x1bb   :  { %7365 = vmatprep.subr.bf16.mxu1 %v10273_v3 }
 0x1bc   :  { %v8295_v32 = vpop.f32.mrb[112].mxu0 }
 0x1bd   :  { %10285 = vst [vmem:[#allocation12_spill] sm:$0xff] %v8295_v32  ;;  %v6744_v6 = vpop.f32.mrb[113].mxu0  ;;  %6545 = vmatmul.mubr.msk.f32.gmra.mrb[30].mxu1 %vm509_vm2, %v1071_v0  ;;  %v7369_v0 = vpack.c.bf16 %v5659_v63, %v5658_v11 }
 0x1be   :  { %6547 = vmatprep.mubr.msk.f32.mxu1 %vm7533_vm0, %v10275_v5  ;;  %v5661_v6 = vld [vmem:[%s10265_s6 + $0x78] sm:$0xff] }
 0x1bf   :  { %v7372_v10 = vpack.c.bf16 %v5661_v6, %v5660_v2 }
 0x1c1   :  { %6548 = vmatmul.mubr.msk.f32.gmra.mrb[32].mxu1 %vm509_vm2, %v1072_v16 }
 0x1c2   :  { %6550 = vmatprep.mubr.msk.f32.mxu1 %vm7533_vm0, %v10275_v5 }
 0x1c5   :  { %6551 = vmatmul.mubr.msk.f32.gmra.mrb[34].mxu1 %vm509_vm2, %v1073_v51 }
 0x1c6   :  { %6553 = vmatprep.mubr.msk.f32.mxu1 %vm7533_vm0, %v10275_v5 }
 0x1c9   :  { %6554 = vmatmul.mubr.msk.f32.gmra.mrb[36].mxu1 %vm509_vm2, %v1074_v30 }
 0x1ca   :  { %6556 = vmatprep.mubr.msk.f32.mxu1 %vm7533_vm0, %v10275_v5 }
 0x1cd   :  { %6557 = vmatmul.mubr.msk.f32.gmra.mrb[38].mxu1 %vm509_vm2, %v1075_v8 }
 0x1ce   :  { %6559 = vmatprep.mubr.msk.f32.mxu1 %vm7533_vm0, %v10275_v5 }
 0x1d1   :  { %6560 = vmatmul.mubr.msk.f32.gmra.mrb[40].mxu1 %vm509_vm2, %v1076_v39 }
 0x1d2   :  { %6566 = vmatprep.mubr.msk.f32.mxu1 %vm7533_vm0, %v10275_v5 }
 0x1d5   :  { %6567 = vmatmul.mubr.msk.f32.vlgmr.msra.gmra.mrb[42].mxu1 %vm99_vm1, %v5626_v40 }
 0x1d6   :  { %7367 = vmatpush3.bf16.msra.mxu1 %v7617_v4  ;;  %6569 = vmatprep.mubr.msk.f32.mxu1 %vm7533_vm0, %v10275_v5 }
 0x1d7   :  { %7368 = vmatprep.subr.bf16.mxu1 %v10273_v3 }
 0x1d9   :  { %6570 = vmatmul.mubr.msk.f32.gmra.mrb[44].mxu1 %vm99_vm1, %v5627_v43 }
 0x1da   :  { %6572 = vmatprep.mubr.msk.f32.mxu1 %vm7533_vm0, %v10275_v5 }
 0x1dd   :  { %6573 = vmatmul.mubr.msk.f32.gmra.mrb[46].mxu1 %vm99_vm1, %v5628_v46 }
 0x1de   :  { %6575 = vmatprep.mubr.msk.f32.mxu1 %vm7533_vm0, %v10275_v5 }
 0x1e1   :  { %6576 = vmatmul.mubr.msk.f32.gmra.mrb[48].mxu1 %vm99_vm1, %v5629_v47 }
 0x1e2   :  { %6578 = vmatprep.mubr.msk.f32.mxu1 %vm7533_vm0, %v10275_v5 }
 0x1e5   :  { %6579 = vmatmul.mubr.msk.f32.gmra.mrb[50].mxu1 %vm99_vm1, %v5630_v49 }
 0x1e6   :  { %6581 = vmatprep.mubr.msk.f32.mxu1 %vm7533_vm0, %v10275_v5 }
 0x1e9   :  { %6582 = vmatmul.mubr.msk.f32.gmra.mrb[52].mxu1 %vm99_vm1, %v5631_v48 }
 0x1ea   :  { %6584 = vmatprep.mubr.msk.f32.mxu1 %vm7533_vm0, %v10275_v5 }
 0x1ed   :  { %6585 = vmatmul.mubr.msk.f32.gmra.mrb[54].mxu1 %vm99_vm1, %v5632_v50 }
 0x1ee   :  { %6591 = vmatprep.mubr.msk.f32.mxu1 %vm7533_vm0, %v10275_v5 }
 0x1f1   :  { %6592 = vmatmul.mubr.msk.f32.vlgmr.msra.gmra.mrb[56].mxu1 %vm99_vm1, %v5644_v52 }
 0x1f2   :  { %6594 = vmatprep.mubr.msk.f32.mxu1 %vm7533_vm0, %v10275_v5  ;;  %7370 = vmatpush3.bf16.msra.mxu1 %v7369_v0 }
 0x1f3   :  { %7371 = vmatprep.subr.bf16.mxu1 %v10273_v3 }
 0x1f5   :  { %6595 = vmatmul.mubr.msk.f32.gmra.mrb[58].mxu1 %vm99_vm1, %v5645_v55 }
 0x1f6   :  { %6597 = vmatprep.mubr.msk.f32.mxu1 %vm7533_vm0, %v10275_v5  ;;  %7373 = vmatpush3.bf16.msra.mxu1 %v7372_v10 }
 0x1f7   :  { %7374 = vmatprep.subr.bf16.mxu1 %v10273_v3 }
 0x1f9   :  { %6598 = vmatmul.mubr.msk.f32.gmra.mrb[60].mxu1 %vm99_vm1, %v5646_v56 }
 0x1fa   :  { %6600 = vmatprep.mubr.msk.f32.mxu1 %vm7533_vm0, %v10275_v5 }
 0x1fd   :  { %6601 = vmatmul.mubr.msk.f32.gmra.mrb[62].mxu1 %vm99_vm1, %v5647_v57 }
 0x1fe   :  { %6603 = vmatprep.mubr.msk.f32.mxu1 %vm7533_vm0, %v10275_v5 }
 0x201   :  { %6604 = vmatmul.mubr.msk.f32.gmra.mrb[64].mxu1 %vm99_vm1, %v5648_v58 }
 0x202   :  { %6606 = vmatprep.mubr.msk.f32.mxu1 %vm7533_vm0, %v10275_v5 }
 0x205   :  { %6607 = vmatmul.mubr.msk.f32.gmra.mrb[66].mxu1 %vm99_vm1, %v5649_v59  ;;  %v8458_v59 = vld [vmem:[%s10262_s3] ss:$0 sm:$0xff] }
 0x206   :  { %6609 = vmatprep.mubr.msk.f32.mxu1 %vm7533_vm0, %v10275_v5 }
 0x209   :  { %6610 = vmatmul.mubr.msk.f32.gmra.mrb[68].mxu1 %vm99_vm1, %v5650_v62 }
 0x20a   :  { %6620 = vmatprep.mubr.msk.f32.mxu1 %vm7533_vm0, %v10275_v5 }
 0x28c   :  { %v8427_v41 = vpop.f32.mrb[28].mxu1 }
 0x28d   :  { %v6543_v13 = vpop.f32.mrb[29].mxu1 }
 0x290   :  { %v8429_v16 = vpop.f32.mrb[30].mxu1 }
 0x291   :  { %v6546_v17 = vpop.f32.mrb[31].mxu1 }
 0x294   :  { %v8431_v18 = vpop.f32.mrb[32].mxu1 }
 0x295   :  { %v6549_v21 = vpop.f32.mrb[33].mxu1 }
 0x298   :  { %v8433_v22 = vpop.f32.mrb[34].mxu1 }
 0x299   :  { %v6552_v51 = vpop.f32.mrb[35].mxu1 }
 0x29c   :  { %v8435_v23 = vpop.f32.mrb[36].mxu1 }
 0x29d   :  { %v6555_v25 = vpop.f32.mrb[37].mxu1 }
 0x2a0   :  { %v8437_v29 = vpop.f32.mrb[38].mxu1 }
 0x2a1   :  { %v6558_v30 = vpop.f32.mrb[39].mxu1 }
 0x2a4   :  { %v8439_v31 = vpop.f32.mrb[40].mxu1 }
 0x2a5   :  { %v6561_v12 = vpop.f32.mrb[41].mxu1 }
 0x2a8   :  { %v8441_v8 = vpop.f32.mrb[42].mxu1 }
 0x2a9   :  { %v6568_v34 = vpop.f32.mrb[43].mxu1 }
 0x2ac   :  { %v8443_v39 = vpop.f32.mrb[44].mxu1 }
 0x2ad   :  { %v6571_v40 = vpop.f32.mrb[45].mxu1 }
 0x2b0   :  { %v8445_v43 = vpop.f32.mrb[46].mxu1 }
 0x2b1   :  { %v6574_v46 = vpop.f32.mrb[47].mxu1 }
 0x2b4   :  { %v8447_v47 = vpop.f32.mrb[48].mxu1 }
 0x2b5   :  { %v6577_v49 = vpop.f32.mrb[49].mxu1 }
 0x2b8   :  { %v8449_v48 = vpop.f32.mrb[50].mxu1 }
 0x2b9   :  { %v6580_v50 = vpop.f32.mrb[51].mxu1 }
 0x2bc   :  { %v8451_v52 = vpop.f32.mrb[52].mxu1 }
 0x2bd   :  { %v6583_v55 = vpop.f32.mrb[53].mxu1 }
 0x2c0   :  { %v8453_v56 = vpop.f32.mrb[54].mxu1 }
 0x2c1   :  { %v6586_v57 = vpop.f32.mrb[55].mxu1 }
 0x2c4   :  { %v1460_v58 = vpop.f32.mrb[56].mxu1 }
 0x2c5   :  { %v1461_v62 = vadd.f32 %v8458_v59, %v1460_v58  ;;  %v6593_v11 = vpop.f32.mrb[57].mxu1 }
 0x2c7   :  { %v1494_v63 = vmul.f32 %v1461_v62, %v8263_v33 }
 0x2c8   :  { %v1465_v0 = vpop.f32.mrb[58].mxu1 }
 0x2c9   :  { %v1501_v2 = vadd.f32 %v1494_v63, %v8270_v38  ;;  %v1466_v6 = vadd.f32 %v8458_v59, %v1465_v0  ;;  %v6596_v10 = vpop.f32.mrb[59].mxu1 }
 0x2cb   :  { %v1508_v13 = vmul.f32 0.2, %v1501_v2  ;;  %v1495_v17 = vmul.f32 %v1466_v6, %v8263_v33 }
 0x2cc   :  { %v1470_v21 = vpop.f32.mrb[60].mxu1 }
 0x2cd   :  { %v1515_v51 = vmax.f32 %v1501_v2, %v1508_v13  ;;  %v1502_v25 = vadd.f32 %v1495_v17, %v8270_v38  ;;  %v1471_v30 = vadd.f32 %v8458_v59, %v1470_v21  ;;  %v6599_v12 = vpop.f32.mrb[61].mxu1 }
 0x2cf   :  { %v1509_v34 = vmul.f32 0.2, %v1502_v25  ;;  %v1496_v40 = vmul.f32 %v1471_v30, %v8263_v33  ;;  %6621 = vmatmul.mubr.msk.f32.vlgmr.msra.gmra.mrb[70].mxu1 %vm509_vm2, %v1515_v51 }
 0x2d0   :  { %7376 = vmatpush3.bf16.msra.mxu1 %v7617_v4  ;;  %v1475_v46 = vpop.f32.mrb[62].mxu1  ;;  %6623 = vmatprep.mubr.msk.f32.mxu1 %vm7533_vm0, %v10275_v5 }
 0x2d1   :  { %v1516_v49 = vmax.f32 %v1502_v25, %v1509_v34  ;;  %v1503_v50 = vadd.f32 %v1496_v40, %v8270_v38  ;;  %v1476_v55 = vadd.f32 %v8458_v59, %v1475_v46  ;;  %v6602_v57 = vpop.f32.mrb[63].mxu1  ;;  %7380 = vmatprep.subr.bf16.mxu1 %v10273_v3 }
 0x2d3   :  { %v1510_v58 = vmul.f32 0.2, %v1503_v50  ;;  %v1497_v62 = vmul.f32 %v1476_v55, %v8263_v33  ;;  %6624 = vmatmul.mubr.msk.f32.gmra.mrb[72].mxu1 %vm509_vm2, %v1516_v49 }
 0x2d4   :  { %v1480_v11 = vpop.f32.mrb[64].mxu1  ;;  %6626 = vmatprep.mubr.msk.f32.mxu1 %vm7533_vm0, %v10275_v5 }
 0x2d5   :  { %v1517_v63 = vmax.f32 %v1503_v50, %v1510_v58  ;;  %v1504_v0 = vadd.f32 %v1497_v62, %v8270_v38  ;;  %v1481_v2 = vadd.f32 %v8458_v59, %v1480_v11  ;;  %v6605_v6 = vpop.f32.mrb[65].mxu1 }
 0x2d6   :  { %v5702_v6 = vld [vmem:[%s10265_s6 + $0xa8] sm:$0xff] }
 0x2d7   :  { %v1511_v10 = vmul.f32 0.2, %v1504_v0  ;;  %v1498_v13 = vmul.f32 %v1481_v2, %v8263_v33  ;;  %6627 = vmatmul.mubr.msk.f32.gmra.mrb[74].mxu1 %vm509_vm2, %v1517_v63  ;;  %v5701_v2 = vld [vmem:[%s10265_s6 + $0xa0] sm:$0xff] }
 0x2d8   :  { %v1485_v17 = vpop.f32.mrb[66].mxu1  ;;  %6629 = vmatprep.mubr.msk.f32.mxu1 %vm7533_vm0, %v10275_v5 }
 0x2d9   :  { %v1518_v21 = vmax.f32 %v1504_v0, %v1511_v10  ;;  %v1505_v51 = vadd.f32 %v1498_v13, %v8270_v38  ;;  %v1486_v25 = vadd.f32 %v8458_v59, %v1485_v17  ;;  %v6608_v30 = vpop.f32.mrb[67].mxu1  ;;  %v5669_v10 = vld [vmem:[%s10260_s1 + $0xe0] sm:$0xff]  ;;  %v7381_v13 = vpack.c.bf16 %v5702_v6, %v5701_v2  ;;  %v5703_v17 = vld [vmem:[%s10265_s6 + $0xb0] sm:$0xff] }
 0x2da   :  { %v5671_v30 = vld [vmem:[%s10260_s1 + $0xf0] sm:$0xff] }
 0x2db   :  { %v1512_v12 = vmul.f32 0.2, %v1505_v51  ;;  %v1499_v34 = vmul.f32 %v1486_v25, %v8263_v33  ;;  %6630 = vmatmul.mubr.msk.f32.gmra.mrb[76].mxu1 %vm509_vm2, %v1518_v21  ;;  %v5704_v21 = vld [vmem:[%s10265_s6 + $0xb8] sm:$0xff] }
 0x2dc   :  { %v1490_v40 = vpop.f32.mrb[68].mxu1  ;;  %6632 = vmatprep.mubr.msk.f32.mxu1 %vm7533_vm0, %v10275_v5  ;;  %v7384_v25 = vpack.c.bf16 %v5704_v21, %v5703_v17 }
 0x2dd   :  { %v1519_v46 = vmax.f32 %v1505_v51, %v1512_v12  ;;  %v1506_v49 = vadd.f32 %v1499_v34, %v8270_v38  ;;  %v1491_v50 = vadd.f32 %v8458_v59, %v1490_v40  ;;  %v6611_v55 = vpop.f32.mrb[69].mxu1  ;;  %v5670_v51 = vld [vmem:[%s10260_s1 + $0xe8] sm:$0xff]  ;;  %v5672_v12 = vld [vmem:[%s10260_s1 + $0xf8] sm:$0xff]  ;;  %v1906_v34 = vadd.f32 %v8458_v59, %v8234_v27  ;;  %v5673_v40 = vld [vmem:[%s10260_s1 + $0x100] sm:$0xff] }
 0x2de   :  { %v5674_v27 = vld [vmem:[%s10260_s1 + $0x108] sm:$0xff] }
 0x2df   :  { %v1513_v57 = vmul.f32 0.2, %v1506_v49  ;;  %v1500_v58 = vmul.f32 %v1491_v50, %v8263_v33  ;;  %6633 = vmatmul.mubr.msk.f32.gmra.mrb[78].mxu1 %vm509_vm2, %v1519_v46  ;;  %v1939_v46 = vmul.f32 %v1906_v34, %v8263_v33  ;;  %v1936_v34 = vadd.f32 %v8458_v59, %v8246_v9 }
 0x2e0   :  { %6635 = vmatprep.mubr.msk.f32.mxu1 %vm7533_vm0, %v10275_v5 }
 0x2e1   :  { %v1520_v62 = vmax.f32 %v1506_v49, %v1513_v57  ;;  %v1507_v11 = vadd.f32 %v1500_v58, %v8270_v38  ;;  %v1911_v49 = vadd.f32 %v8458_v59, %v8236_v37  ;;  %v1946_v50 = vadd.f32 %v1939_v46, %v8270_v38  ;;  %v5675_v37 = vld [vmem:[%s10260_s1 + $0x110] sm:$0x3] }
 0x2e2   :  { %v1916_v57 = vadd.f32 %v8458_v59, %v8238_v45 }
 0x2e3   :  { %v1514_v63 = vmul.f32 0.2, %v1507_v11  ;;  %6636 = vmatmul.mubr.msk.f32.gmra.mrb[80].mxu1 %vm509_vm2, %v1520_v62  ;;  %v1940_v55 = vmul.f32 %v1911_v49, %v8263_v33  ;;  %v1953_v58 = vmul.f32 0.2, %v1946_v50  ;;  %v1945_v49 = vmul.f32 %v1936_v34, %v8263_v33  ;;  %v5747_v34 = vld [vmem:[%s10265_s6 + $0xf8] sm:$0xff] }
 0x2e4   :  { %6638 = vmatprep.mubr.msk.f32.mxu1 %vm7533_vm0, %v10275_v5 }
 0x2e5   :  { %v1521_v0 = vmax.f32 %v1507_v11, %v1514_v63  ;;  %v1947_v62 = vadd.f32 %v1940_v55, %v8270_v38  ;;  %v1941_v11 = vmul.f32 %v1916_v57, %v8263_v33  ;;  %v1921_v63 = vadd.f32 %v8458_v59, %v8240_v53 }
 0x2e6   :  { %v1960_v45 = vmax.f32 %v1946_v50, %v1953_v58  ;;  %v1952_v9 = vadd.f32 %v1945_v49, %v8270_v38  ;;  %v5730_v58 = vld [vmem:[%s10260_s1 + $0x188] sm:$0xff] }
 0x2e7   :  { %6639 = vmatmul.mubr.msk.f32.gmra.mrb[82].mxu1 %vm509_vm2, %v1521_v0  ;;  %v1954_v0 = vmul.f32 0.2, %v1947_v62  ;;  %v1948_v2 = vadd.f32 %v1941_v11, %v8270_v38  ;;  %v1942_v6 = vmul.f32 %v1921_v63, %v8263_v33  ;;  %v5732_v11 = vld [vmem:[%s10260_s1 + $0x198] sm:$0xff]  ;;  %v5733_v63 = vld [vmem:[%s10260_s1 + $0x1a0] sm:$0xff] }
 0x2e8   :  { %6645 = vmatprep.mubr.msk.f32.mxu1 %vm7533_vm0, %v10275_v5  ;;  %v1959_v57 = vmul.f32 0.2, %v1952_v9 }
 0x2e9   :  { %v1961_v53 = vmax.f32 %v1947_v62, %v1954_v0  ;;  %v1949_v17 = vadd.f32 %v1942_v6, %v8270_v38  ;;  %v5731_v62 = vld [vmem:[%s10260_s1 + $0x190] sm:$0xff]  ;;  %v5755_v6 = vld [vmem:[%s10260_s1 + $0x1c0] sm:$0xff] }
 0x2ea   :  { %v5735_v0 = vld [vmem:[%s10260_s1 + $0x1b0] sm:$0xff] }
 0x2eb   :  { %6646 = vmatmul.mubr.msk.f32.vlgmr.msra.gmra.mrb[84].mxu1 %vm99_vm1, %v5669_v10  ;;  %v1926_v10 = vadd.f32 %v8458_v59, %v8242_v60 }
 0x2ec   :  { %7382 = vmatpush3.bf16.msra.mxu1 %v7381_v13  ;;  %6648 = vmatprep.mubr.msk.f32.mxu1 %vm7533_vm0, %v10275_v5  ;;  %v1955_v13 = vmul.f32 0.2, %v1948_v2 }
 0x2ed   :  { %7383 = vmatprep.subr.bf16.mxu1 %v10273_v3  ;;  %v1943_v21 = vmul.f32 %v1926_v10, %v8263_v33  ;;  %v5756_v10 = vld [vmem:[%s10260_s1 + $0x1c8] sm:$0xff] }
 0x2ee   :  { %v1962_v60 = vmax.f32 %v1948_v2, %v1955_v13  ;;  %v5736_v2 = vld [vmem:[%s10260_s1 + $0x1b8] sm:$0x3] }
 0x2ef   :  { %6649 = vmatmul.mubr.msk.f32.gmra.mrb[86].mxu1 %vm99_vm1, %v5670_v51  ;;  %v1931_v51 = vadd.f32 %v8458_v59, %v8244_v1  ;;  %v5758_v13 = vld [vmem:[%s10260_s1 + $0x1d8] sm:$0xff] }
 0x2f0   :  { %6651 = vmatprep.mubr.msk.f32.mxu1 %vm7533_vm0, %v10275_v5  ;;  %7385 = vmatpush3.bf16.msra.mxu1 %v7384_v25  ;;  %v1956_v25 = vmul.f32 0.2, %v1949_v17 }
 0x2f1   :  { %7389 = vmatprep.subr.bf16.mxu1 %v10273_v3 }
 0x2f2   :  { %v1963_v1 = vmax.f32 %v1949_v17, %v1956_v25  ;;  %v5759_v17 = vld [vmem:[%s10260_s1 + $0x1e0] sm:$0xff]  ;;  %v5745_v25 = vld [vmem:[%s10265_s6 + $0xe8] sm:$0xff] }
 0x2f3   :  { %6652 = vmatmul.mubr.msk.f32.gmra.mrb[88].mxu1 %vm99_vm1, %v5671_v30  ;;  %v1950_v30 = vadd.f32 %v1943_v21, %v8270_v38  ;;  %v5760_v21 = vld [vmem:[%s10260_s1 + $0x1e8] sm:$0xff] }
 0x2f4   :  { %6654 = vmatprep.mubr.msk.f32.mxu1 %vm7533_vm0, %v10275_v5 }
 0x2f7   :  { %6655 = vmatmul.mubr.msk.f32.gmra.mrb[90].mxu1 %vm99_vm1, %v5672_v12  ;;  %v1944_v12 = vmul.f32 %v1931_v51, %v8263_v33  ;;  %v5761_v51 = vld [vmem:[%s10260_s1 + $0x1f0] sm:$0x3] }
 0x2f8   :  { %6657 = vmatprep.mubr.msk.f32.mxu1 %vm7533_vm0, %v10275_v5 }
 0x2f9   :  { %v1951_v46 = vadd.f32 %v1944_v12, %v8270_v38  ;;  %v5746_v12 = vld [vmem:[%s10265_s6 + $0xf0] sm:$0xff] }
 0x2fb   :  { %6658 = vmatmul.mubr.msk.f32.gmra.mrb[92].mxu1 %vm99_vm1, %v5673_v40  ;;  %v1957_v40 = vmul.f32 0.2, %v1950_v30  ;;  %v1958_v50 = vmul.f32 0.2, %v1951_v46 }
 0x2fc   :  { %6660 = vmatprep.mubr.msk.f32.mxu1 %vm7533_vm0, %v10275_v5 }
 0x2fd   :  { %v1965_v55 = vmax.f32 %v1951_v46, %v1958_v50 }
 0x2ff   :  { %6661 = vmatmul.mubr.msk.f32.gmra.mrb[94].mxu1 %vm99_vm1, %v5674_v27  ;;  %v1964_v27 = vmax.f32 %v1950_v30, %v1957_v40 }
 0x300   :  { %6663 = vmatprep.mubr.msk.f32.mxu1 %vm7533_vm0, %v10275_v5 }
 0x303   :  { %6664 = vmatmul.mubr.msk.f32.gmra.mrb[96].mxu1 %vm99_vm1, %v5675_v37  ;;  %v1966_v37 = vmax.f32 %v1952_v9, %v1959_v57 }
 0x304   :  { %6699 = vmatprep.mubr.msk.f32.mxu1 %vm7533_vm0, %v10275_v5 }
 0x307   :  { %6700 = vmatmul.mubr.msk.f32.vlgmr.msra.gmra.mrb[98].mxu1 %vm509_vm2, %v1960_v45  ;;  %v5734_v45 = vld [vmem:[%s10260_s1 + $0x1a8] sm:$0xff] }
 0x308   :  { %7391 = vmatpush3.bf16.msra.mxu1 %v7617_v4  ;;  %6702 = vmatprep.mubr.msk.f32.mxu1 %vm7533_vm0, %v10275_v5 }
 0x309   :  { %7398 = vmatprep.subr.bf16.mxu1 %v10273_v3 }
 0x30b   :  { %6703 = vmatmul.mubr.msk.f32.gmra.mrb[100].mxu1 %vm509_vm2, %v1961_v53  ;;  %v5757_v53 = vld [vmem:[%s10260_s1 + $0x1d0] sm:$0xff] }
 0x30c   :  { %6705 = vmatprep.mubr.msk.f32.mxu1 %vm7533_vm0, %v10275_v5 }
 0x30f   :  { %6706 = vmatmul.mubr.msk.f32.gmra.mrb[102].mxu1 %vm509_vm2, %v1962_v60  ;;  %v5744_v60 = vld [vmem:[%s10265_s6 + $0xe0] sm:$0xff] }
 0x310   :  { %6708 = vmatprep.mubr.msk.f32.mxu1 %vm7533_vm0, %v10275_v5  ;;  %v7393_v30 = vpack.c.bf16 %v5745_v25, %v5744_v60 }
 0x312   :  { %7394 = vmatpush3.bf16.msra.mxu0 %v7393_v30 }
 0x313   :  { %6709 = vmatmul.mubr.msk.f32.gmra.mrb[104].mxu1 %vm509_vm2, %v1963_v1  ;;  %7395 = vmatprep.subr.bf16.mxu0 %v10273_v3  ;;  %v7396_v1 = vpack.c.bf16 %v5747_v34, %v5746_v12 }
 0x314   :  { %6711 = vmatprep.mubr.msk.f32.mxu1 %vm7533_vm0, %v10275_v5 }
 0x316   :  { %7397 = vmatpush3.bf16.msra.mxu0 %v7396_v1 }
 0x317   :  { %6712 = vmatmul.mubr.msk.f32.gmra.mrb[106].mxu1 %vm509_vm2, %v1964_v27  ;;  %7401 = vmatprep.subr.bf16.mxu0 %v10273_v3 }
 0x318   :  { %6714 = vmatprep.mubr.msk.f32.mxu1 %vm7533_vm0, %v10275_v5 }
 0x31b   :  { %6715 = vmatmul.mubr.msk.f32.gmra.mrb[108].mxu1 %vm509_vm2, %v1965_v55 }
 0x31c   :  { %6717 = vmatprep.mubr.msk.f32.mxu1 %vm7533_vm0, %v10275_v5 }
 0x31f   :  { %6718 = vmatmul.mubr.msk.f32.gmra.mrb[110].mxu1 %vm509_vm2, %v1966_v37 }
 0x320   :  { %6749 = vmatprep.mubr.msk.f32.mxu1 %vm7533_vm0, %v10275_v5 }
 0x323   :  { %6750 = vmatmul.mubr.msk.f32.vlgmr.msra.gmra.mrb[112].mxu1 %vm99_vm1, %v5730_v58 }
 0x324   :  { %6752 = vmatprep.mubr.msk.f32.mxu1 %vm7533_vm0, %v10275_v5  ;;  %7400 = vmatpush3.bf16.msra.mxu1 %v7617_v4 }
 0x325   :  { %7404 = vmatprep.subr.bf16.mxu1 %v10273_v3 }
 0x327   :  { %6753 = vmatmul.mubr.msk.f32.gmra.mrb[114].mxu1 %vm99_vm1, %v5731_v62 }
 0x328   :  { %6755 = vmatprep.mubr.msk.f32.mxu1 %vm7533_vm0, %v10275_v5 }
 0x32b   :  { %6756 = vmatmul.mubr.msk.f32.gmra.mrb[116].mxu1 %vm99_vm1, %v5732_v11 }
 0x32c   :  { %6758 = vmatprep.mubr.msk.f32.mxu1 %vm7533_vm0, %v10275_v5 }
 0x32f   :  { %6759 = vmatmul.mubr.msk.f32.gmra.mrb[118].mxu1 %vm99_vm1, %v5733_v63 }
 0x330   :  { %6761 = vmatprep.mubr.msk.f32.mxu1 %vm7533_vm0, %v10275_v5 }
 0x333   :  { %6762 = vmatmul.mubr.msk.f32.gmra.mrb[120].mxu1 %vm99_vm1, %v5734_v45 }
 0x334   :  { %6764 = vmatprep.mubr.msk.f32.mxu1 %vm7533_vm0, %v10275_v5 }
 0x337   :  { %6765 = vmatmul.mubr.msk.f32.gmra.mrb[122].mxu1 %vm99_vm1, %v5735_v0 }
 0x338   :  { %6767 = vmatprep.mubr.msk.f32.mxu1 %vm7533_vm0, %v10275_v5 }
 0x33b   :  { %6768 = vmatmul.mubr.msk.f32.gmra.mrb[124].mxu1 %vm99_vm1, %v5736_v2 }
 0x33c   :  { %6803 = vmatprep.mubr.msk.f32.mxu1 %vm7533_vm0, %v10275_v5 }
 0x33f   :  { %6804 = vmatmul.mubr.msk.f32.vlgmr.msra.gmra.mrb[126].mxu1 %vm99_vm1, %v5755_v6 }
 0x340   :  { %6806 = vmatprep.mubr.msk.f32.mxu1 %vm7533_vm0, %v10275_v5 }
 0x343   :  { %6807 = vmatmul.mubr.msk.f32.gmra.mrb[128].mxu1 %vm99_vm1, %v5756_v10 }
 0x344   :  { %6809 = vmatprep.mubr.msk.f32.mxu1 %vm7533_vm0, %v10275_v5 }
 0x347   :  { %6810 = vmatmul.mubr.msk.f32.gmra.mrb[130].mxu1 %vm99_vm1, %v5757_v53 }
 0x348   :  { %6812 = vmatprep.mubr.msk.f32.mxu1 %vm7533_vm0, %v10275_v5 }
 0x34b   :  { %6813 = vmatmul.mubr.msk.f32.gmra.mrb[132].mxu1 %vm99_vm1, %v5758_v13 }
 0x34c   :  { %6815 = vmatprep.mubr.msk.f32.mxu1 %vm7533_vm0, %v10275_v5 }
 0x34f   :  { %6816 = vmatmul.mubr.msk.f32.gmra.mrb[134].mxu1 %vm99_vm1, %v5759_v17 }
 0x350   :  { %6818 = vmatprep.mubr.msk.f32.mxu1 %vm7533_vm0, %v10275_v5 }
 0x353   :  { %6819 = vmatmul.mubr.msk.f32.gmra.mrb[136].mxu1 %vm99_vm1, %v5760_v21 }
 0x354   :  { %6821 = vmatprep.mubr.msk.f32.mxu1 %vm7533_vm0, %v10275_v5 }
 0x357   :  { %6822 = vmatmul.mubr.msk.f32.gmra.mrb[138].mxu1 %vm99_vm1, %v5761_v51 }
 0x358   :  { %6857 = vmatprep.mubr.msk.f32.mxu1 %vm7533_vm0, %v10275_v5 }
 0x3a2   :  { %v8711_v40 = vpop.f32.mrb[70].mxu1 }
 0x3a3   :  { %10286 = vst [vmem:[#allocation13_spill] sm:$0xff] %v8711_v40  ;;  %v6622_v46 = vpop.f32.mrb[71].mxu1 }
 0x3a6   :  { %v8713_v49 = vpop.f32.mrb[72].mxu1 }
 0x3a7   :  { %10287 = vst [vmem:[#allocation14_spill] sm:$0xff] %v8713_v49  ;;  %v6625_v27 = vpop.f32.mrb[73].mxu1 }
 0x3aa   :  { %v8715_v50 = vpop.f32.mrb[74].mxu1 }
 0x3ab   :  { %10288 = vst [vmem:[#allocation15_spill] sm:$0xff] %v8715_v50  ;;  %v6628_v9 = vpop.f32.mrb[75].mxu1 }
 0x3ae   :  { %v8717_v55 = vpop.f32.mrb[76].mxu1 }
 0x3af   :  { %10289 = vst [vmem:[#allocation16_spill] sm:$0xff] %v8717_v55  ;;  %v6631_v57 = vpop.f32.mrb[77].mxu1 }
 0x3b2   :  { %v8719_v37 = vpop.f32.mrb[78].mxu1 }
 0x3b3   :  { %10290 = vst [vmem:[#allocation17_spill] sm:$0xff] %v8719_v37  ;;  %v6634_v58 = vpop.f32.mrb[79].mxu1 }
 0x3b6   :  { %v8721_v62 = vpop.f32.mrb[80].mxu1 }
 0x3b7   :  { %10291 = vst [vmem:[#allocation18_spill] sm:$0xff] %v8721_v62  ;;  %v6637_v11 = vpop.f32.mrb[81].mxu1 }
 0x3ba   :  { %v8723_v63 = vpop.f32.mrb[82].mxu1 }
 0x3bb   :  { %10292 = vst [vmem:[#allocation19_spill] sm:$0xff] %v8723_v63  ;;  %v6640_v45 = vpop.f32.mrb[83].mxu1 }
 0x3be   :  { %v8725_v0 = vpop.f32.mrb[84].mxu1 }
 0x3bf   :  { %v6647_v2 = vpop.f32.mrb[85].mxu1 }
 0x3c2   :  { %v8727_v6 = vpop.f32.mrb[86].mxu1 }
 0x3c3   :  { %v6650_v10 = vpop.f32.mrb[87].mxu1 }
 0x3c6   :  { %v8729_v53 = vpop.f32.mrb[88].mxu1 }
 0x3c7   :  { %v6653_v13 = vpop.f32.mrb[89].mxu1 }
 0x3ca   :  { %v8731_v17 = vpop.f32.mrb[90].mxu1 }
 0x3cb   :  { %v6656_v21 = vpop.f32.mrb[91].mxu1 }
 0x3ce   :  { %v8733_v51 = vpop.f32.mrb[92].mxu1 }
 0x3cf   :  { %v6659_v60 = vpop.f32.mrb[93].mxu1 }
 0x3d2   :  { %v8735_v25 = vpop.f32.mrb[94].mxu1 }
 0x3d3   :  { %v6662_v30 = vpop.f32.mrb[95].mxu1 }
 0x3d6   :  { %v8737_v12 = vpop.f32.mrb[96].mxu1 }
 0x3d7   :  { %v6665_v34 = vpop.f32.mrb[97].mxu1 }
 0x3da   :  { %v8739_v1 = vpop.f32.mrb[98].mxu1 }
 0x3db   :  { %10293 = vst [vmem:[#allocation20_spill] sm:$0xff] %v8739_v1  ;;  %v6701_v46 = vpop.f32.mrb[99].mxu1 }
 0x3de   :  { %v8741_v27 = vpop.f32.mrb[100].mxu1 }
 0x3df   :  { %10294 = vst [vmem:[#allocation21_spill] sm:$0xff] %v8741_v27  ;;  %v6704_v9 = vpop.f32.mrb[101].mxu1 }
 0x3e2   :  { %v8743_v57 = vpop.f32.mrb[102].mxu1 }
 0x3e3   :  { %10295 = vst [vmem:[#allocation22_spill] sm:$0xff] %v8743_v57  ;;  %v6707_v58 = vpop.f32.mrb[103].mxu1 }
 0x3e6   :  { %v8745_v11 = vpop.f32.mrb[104].mxu1 }
 0x3e7   :  { %10296 = vst [vmem:[#allocation23_spill] sm:$0xff] %v8745_v11  ;;  %v6710_v45 = vpop.f32.mrb[105].mxu1 }
 0x3ea   :  { %v8747_v2 = vpop.f32.mrb[106].mxu1 }
 0x3eb   :  { %10297 = vst [vmem:[#allocation24_spill] sm:$0xff] %v8747_v2  ;;  %v6713_v10 = vpop.f32.mrb[107].mxu1 }
 0x3ee   :  { %v8749_v13 = vpop.f32.mrb[108].mxu1 }
 0x3ef   :  { %10298 = vst [vmem:[#allocation25_spill] sm:$0xff] %v8749_v13  ;;  %v6716_v21 = vpop.f32.mrb[109].mxu1 }
 0x3f2   :  { %v8751_v60 = vpop.f32.mrb[110].mxu1 }
 0x3f3   :  { %10299 = vst [vmem:[#allocation26_spill] sm:$0xff] %v8751_v60  ;;  %v6719_v30 = vpop.f32.mrb[111].mxu1 }
 0x3f6   :  { %v2350_v34 = vpop.f32.mrb[112].mxu1 }
 0x3f7   :  { %v2351_v46 = vadd.f32 %v8458_v59, %v2350_v34  ;;  %v6751_v3 = vpop.f32.mrb[113].mxu1 }
 0x3f9   :  { %v2384_v9 = vmul.f32 %v2351_v46, %v8263_v33 }
 0x3fa   :  { %v2355_v5 = vpop.f32.mrb[114].mxu1 }
 0x3fb   :  { %v2391_v58 = vadd.f32 %v2384_v9, %v8270_v38  ;;  %v2356_v45 = vadd.f32 %v8458_v59, %v2355_v5  ;;  %v6754_v24 = vpop.f32.mrb[115].mxu1  ;;  %v10300_v5 = vmov 0.0  }
 0x3fd   :  { %v2398_v63 = vmul.f32 0.2, %v2391_v58  ;;  %v2385_v10 = vmul.f32 %v2356_v45, %v8263_v33  ;;  %v10301_v45 = vmov 0.0|0.0  }
 0x3fe   :  { %v2360_v62 = vpop.f32.mrb[116].mxu1 }
 0x3ff   :  { %v2405_v21 = vmax.f32 %v2391_v58, %v2398_v63  ;;  %v2392_v37 = vadd.f32 %v2385_v10, %v8270_v38  ;;  %v2361_v30 = vadd.f32 %v8458_v59, %v2360_v62  ;;  %v6757_v55 = vpop.f32.mrb[117].mxu1 }
 0x401   :  { %v2399_v34 = vmul.f32 0.2, %v2392_v37  ;;  %v2386_v3 = vmul.f32 %v2361_v30, %v8263_v33  ;;  %6779 = vmatmul.mubr.msk.f32.vlgmr.msra.gmra.mrb[114].mxu0 %vm509_vm2, %v2405_v21 }
 0x402   :  { %7403 = vmatpush3.bf16.msra.mxu0 %v7617_v4  ;;  %v2365_v46 = vpop.f32.mrb[118].mxu1  ;;  %6781 = vmatprep.mubr.msk.f32.mxu0 %vm7533_vm0, %v10300_v5 }
 0x403   :  { %v2406_v24 = vmax.f32 %v2392_v37, %v2399_v34  ;;  %v2393_v9 = vadd.f32 %v2386_v3, %v8270_v38  ;;  %v2366_v63 = vadd.f32 %v8458_v59, %v2365_v46  ;;  %v6760_v58 = vpop.f32.mrb[119].mxu1  ;;  %7410 = vmatprep.subr.bf16.mxu0 %v10301_v45 }
 0x405   :  { %v2400_v55 = vmul.f32 0.2, %v2393_v9  ;;  %v2387_v62 = vmul.f32 %v2366_v63, %v8263_v33  ;;  %6782 = vmatmul.mubr.msk.f32.gmra.mrb[116].mxu0 %vm509_vm2, %v2406_v24 }
 0x406   :  { %v2370_v10 = vpop.f32.mrb[120].mxu1  ;;  %6784 = vmatprep.mubr.msk.f32.mxu0 %vm7533_vm0, %v10300_v5 }
 0x407   :  { %v2407_v21 = vmax.f32 %v2393_v9, %v2400_v55  ;;  %v2394_v30 = vadd.f32 %v2387_v62, %v8270_v38  ;;  %v2371_v37 = vadd.f32 %v8458_v59, %v2370_v10  ;;  %v6763_v34 = vpop.f32.mrb[121].mxu1 }
 0x409   :  { %v2401_v3 = vmul.f32 0.2, %v2394_v30  ;;  %v2388_v46 = vmul.f32 %v2371_v37, %v8263_v33  ;;  %6785 = vmatmul.mubr.msk.f32.gmra.mrb[118].mxu0 %vm509_vm2, %v2407_v21 }
 0x40a   :  { %v2375_v58 = vpop.f32.mrb[122].mxu1  ;;  %6787 = vmatprep.mubr.msk.f32.mxu0 %vm7533_vm0, %v10300_v5 }
 0x40b   :  { %v2408_v24 = vmax.f32 %v2394_v30, %v2401_v3  ;;  %v2395_v63 = vadd.f32 %v2388_v46, %v8270_v38  ;;  %v2376_v50 = vadd.f32 %v8458_v59, %v2375_v58  ;;  %v6766_v9 = vpop.f32.mrb[123].mxu1 }
 0x40d   :  { %v2402_v55 = vmul.f32 0.2, %v2395_v63  ;;  %v2389_v62 = vmul.f32 %v2376_v50, %v8263_v33  ;;  %6788 = vmatmul.mubr.msk.f32.gmra.mrb[120].mxu0 %vm509_vm2, %v2408_v24 }
 0x40e   :  { %v2380_v10 = vpop.f32.mrb[124].mxu1  ;;  %6790 = vmatprep.mubr.msk.f32.mxu0 %vm7533_vm0, %v10300_v5 }
 0x40f   :  { %v2409_v21 = vmax.f32 %v2395_v63, %v2402_v55  ;;  %v2396_v37 = vadd.f32 %v2389_v62, %v8270_v38  ;;  %v2381_v34 = vadd.f32 %v8458_v59, %v2380_v10  ;;  %v6769_v30 = vpop.f32.mrb[125].mxu1 }
 0x411   :  { %v2403_v3 = vmul.f32 0.2, %v2396_v37  ;;  %v2390_v46 = vmul.f32 %v2381_v34, %v8263_v33  ;;  %6791 = vmatmul.mubr.msk.f32.gmra.mrb[122].mxu0 %vm509_vm2, %v2409_v21 }
 0x412   :  { %v8788_v58 = vpop.f32.mrb[126].mxu1  ;;  %6793 = vmatprep.mubr.msk.f32.mxu0 %vm7533_vm0, %v10300_v5 }
 0x413   :  { %v2410_v50 = vmax.f32 %v2396_v37, %v2403_v3  ;;  %v2397_v24 = vadd.f32 %v2390_v46, %v8270_v38  ;;  %v6805_v9 = vpop.f32.mrb[127].mxu1  ;;  %v5773_v37 = vld [vmem:[%s10260_s1 + $0x1f8] sm:$0xff]  ;;  %v5774_v3 = vld [vmem:[%s10260_s1 + $0x200] sm:$0xff] }
 0x415   :  { %v2404_v63 = vmul.f32 0.2, %v2397_v24  ;;  %6794 = vmatmul.mubr.msk.f32.gmra.mrb[124].mxu0 %vm509_vm2, %v2410_v50 }
 0x416   :  { %v8794_v55 = vpop.f32.mrb[128].mxu1  ;;  %6796 = vmatprep.mubr.msk.f32.mxu0 %vm7533_vm0, %v10300_v5 }
 0x417   :  { %v2411_v62 = vmax.f32 %v2397_v24, %v2404_v63  ;;  %v6808_v10 = vpop.f32.mrb[129].mxu1  ;;  %v5775_v24 = vld [vmem:[%s10260_s1 + $0x208] sm:$0xff] }
 0x419   :  { %6797 = vmatmul.mubr.msk.f32.gmra.mrb[126].mxu0 %vm509_vm2, %v2411_v62  ;;  %v5776_v62 = vld [vmem:[%s10260_s1 + $0x210] sm:$0xff] }
 0x41a   :  { %v8799_v21 = vpop.f32.mrb[130].mxu1  ;;  %6828 = vmatprep.mubr.msk.f32.mxu0 %vm7533_vm0, %v10300_v5 }
 0x41b   :  { %v6811_v34 = vpop.f32.mrb[131].mxu1 }
 0x41c   :  { %v5777_v34 = vld [vmem:[%s10260_s1 + $0x218] sm:$0xff] }
 0x41d   :  { %6829 = vmatmul.mubr.msk.f32.vlgmr.msra.gmra.mrb[128].mxu0 %vm99_vm1, %v5773_v37 }
 0x41e   :  { %v8807_v30 = vpop.f32.mrb[132].mxu1  ;;  %6831 = vmatprep.mubr.msk.f32.mxu0 %vm7533_vm0, %v10300_v5  ;;  %7412 = vmatpush3.bf16.msra.mxu0 %v7617_v4 }
 0x41f   :  { %v6814_v46 = vpop.f32.mrb[133].mxu1  ;;  %7416 = vmatprep.subr.bf16.mxu0 %v10301_v45 }
 0x420   :  { %v5778_v46 = vld [vmem:[%s10260_s1 + $0x220] sm:$0xff] }
 0x421   :  { %6832 = vmatmul.mubr.msk.f32.gmra.mrb[130].mxu0 %vm99_vm1, %v5774_v3 }
 0x422   :  { %v8817_v50 = vpop.f32.mrb[134].mxu1  ;;  %6834 = vmatprep.mubr.msk.f32.mxu0 %vm7533_vm0, %v10300_v5 }
 0x423   :  { %v6817_v9 = vpop.f32.mrb[135].mxu1 }
 0x424   :  { %v5798_v9 = vld [vmem:[%s10260_s1 + $0x230] sm:$0xff] }
 0x425   :  { %6835 = vmatmul.mubr.msk.f32.gmra.mrb[132].mxu0 %vm99_vm1, %v5775_v24  ;;  %v5779_v24 = vld [vmem:[%s10260_s1 + $0x228] sm:$0x3] }
 0x426   :  { %v8825_v63 = vpop.f32.mrb[136].mxu1  ;;  %6837 = vmatprep.mubr.msk.f32.mxu0 %vm7533_vm0, %v10300_v5 }
 0x427   :  { %v6820_v10 = vpop.f32.mrb[137].mxu1 }
 0x428   :  { %v5800_v10 = vld [vmem:[%s10260_s1 + $0x240] sm:$0xff] }
 0x429   :  { %6838 = vmatmul.mubr.msk.f32.gmra.mrb[134].mxu0 %vm99_vm1, %v5776_v62  ;;  %v5799_v62 = vld [vmem:[%s10260_s1 + $0x238] sm:$0xff] }
 0x42a   :  { %v8833_v37 = vpop.f32.mrb[138].mxu1  ;;  %6840 = vmatprep.mubr.msk.f32.mxu0 %vm7533_vm0, %v10300_v5 }
 0x42b   :  { %v6823_v3 = vpop.f32.mrb[139].mxu1 }
 0x42c   :  { %v5802_v3 = vld [vmem:[%s10260_s1 + $0x250] sm:$0xff] }
 0x42d   :  { %6841 = vmatmul.mubr.msk.f32.gmra.mrb[136].mxu0 %vm99_vm1, %v5777_v34  ;;  %v5801_v34 = vld [vmem:[%s10260_s1 + $0x248] sm:$0xff] }
 0x42e   :  { %6843 = vmatprep.mubr.msk.f32.mxu0 %vm7533_vm0, %v10300_v5 }
 0x431   :  { %6844 = vmatmul.mubr.msk.f32.gmra.mrb[138].mxu0 %vm99_vm1, %v5778_v46  ;;  %v5803_v46 = vld [vmem:[%s10260_s1 + $0x258] sm:$0xff] }
 0x432   :  { %6846 = vmatprep.mubr.msk.f32.mxu0 %vm7533_vm0, %v10300_v5 }
 0x435   :  { %6847 = vmatmul.mubr.msk.f32.gmra.mrb[140].mxu0 %vm99_vm1, %v5779_v24  ;;  %v5804_v24 = vld [vmem:[%s10260_s1 + $0x260] sm:$0x3] }
 0x436   :  { %6882 = vmatprep.mubr.msk.f32.mxu0 %vm7533_vm0, %v10300_v5 }
 0x439   :  { %6883 = vmatmul.mubr.msk.f32.vlgmr.msra.gmra.mrb[142].mxu0 %vm99_vm1, %v5798_v9  ;;  %v5787_v9 = vld [vmem:[%s10265_s6 + $0x120] sm:$0xff] }
 0x43a   :  { %6885 = vmatprep.mubr.msk.f32.mxu0 %vm7533_vm0, %v10300_v5 }
 0x43d   :  { %6886 = vmatmul.mubr.msk.f32.gmra.mrb[144].mxu0 %vm99_vm1, %v5799_v62  ;;  %v5788_v62 = vld [vmem:[%s10265_s6 + $0x128] sm:$0xff] }
 0x43e   :  { %6888 = vmatprep.mubr.msk.f32.mxu0 %vm7533_vm0, %v10300_v5 }
 0x441   :  { %6889 = vmatmul.mubr.msk.f32.gmra.mrb[146].mxu0 %vm99_vm1, %v5800_v10  ;;  %v7405_v10 = vpack.c.bf16 %v5788_v62, %v5787_v9 }
 0x442   :  { %6891 = vmatprep.mubr.msk.f32.mxu0 %vm7533_vm0, %v10300_v5 }
 0x443   :  { %7406 = vmatpush3.bf16.msra.mxu1 %v7405_v10 }
 0x444   :  { %7407 = vmatprep.subr.bf16.mxu1 %v10301_v45 }
 0x445   :  { %6892 = vmatmul.mubr.msk.f32.gmra.mrb[148].mxu0 %vm99_vm1, %v5801_v34  ;;  %v5789_v34 = vld [vmem:[%s10265_s6 + $0x130] sm:$0xff] }
 0x446   :  { %6894 = vmatprep.mubr.msk.f32.mxu0 %vm7533_vm0, %v10300_v5 }
 0x449   :  { %6895 = vmatmul.mubr.msk.f32.gmra.mrb[150].mxu0 %vm99_vm1, %v5802_v3  ;;  %v5790_v3 = vld [vmem:[%s10265_s6 + $0x138] sm:$0xff] }
 0x44a   :  { %6897 = vmatprep.mubr.msk.f32.mxu0 %vm7533_vm0, %v10300_v5 }
 0x44d   :  { %6898 = vmatmul.mubr.msk.f32.gmra.mrb[152].mxu0 %vm99_vm1, %v5803_v46  ;;  %v7408_v46 = vpack.c.bf16 %v5790_v3, %v5789_v34 }
 0x44e   :  { %6900 = vmatprep.mubr.msk.f32.mxu0 %vm7533_vm0, %v10300_v5 }
 0x44f   :  { %7409 = vmatpush3.bf16.msra.mxu1 %v7408_v46 }
 0x450   :  { %7413 = vmatprep.subr.bf16.mxu1 %v10301_v45 }
 0x451   :  { %6901 = vmatmul.mubr.msk.f32.gmra.mrb[154].mxu0 %vm99_vm1, %v5804_v24 }
 0x452   :  { %6936 = vmatprep.mubr.msk.f32.mxu0 %vm7533_vm0, %v10300_v5 }
 0x4d4   :  { %v8911_v24 = vpop.f32.mrb[114].mxu0 }
 0x4d5   :  { %10302 = vst [vmem:[#allocation27_spill] sm:$0xff] %v8911_v24  ;;  %v6780_v49 = vpop.f32.mrb[115].mxu0 }
 0x4d8   :  { %v8913_v40 = vpop.f32.mrb[116].mxu0 }
 0x4d9   :  { %10303 = vst [vmem:[#allocation28_spill] sm:$0xff] %v8913_v40  ;;  %v6783_v9 = vpop.f32.mrb[117].mxu0 }
 0x4dc   :  { %v8915_v62 = vpop.f32.mrb[118].mxu0 }
 0x4dd   :  { %10304 = vst [vmem:[#allocation29_spill] sm:$0xff] %v8915_v62  ;;  %v6786_v10 = vpop.f32.mrb[119].mxu0 }
 0x4e0   :  { %v8917_v60 = vpop.f32.mrb[120].mxu0 }
 0x4e1   :  { %10305 = vst [vmem:[#allocation30_spill] sm:$0xff] %v8917_v60  ;;  %v6789_v13 = vpop.f32.mrb[121].mxu0 }
 0x4e4   :  { %v8919_v2 = vpop.f32.mrb[122].mxu0 }
 0x4e5   :  { %10306 = vst [vmem:[#allocation31_spill] sm:$0xff] %v8919_v2  ;;  %v6792_v32 = vpop.f32.mrb[123].mxu0 }
 0x4e8   :  { %v8921_v11 = vpop.f32.mrb[124].mxu0 }
 0x4e9   :  { %10307 = vst [vmem:[#allocation32_spill] sm:$0xff] %v8921_v11  ;;  %v6795_v34 = vpop.f32.mrb[125].mxu0 }
 0x4ec   :  { %v8923_v3 = vpop.f32.mrb[126].mxu0 }
 0x4ed   :  { %10308 = vst [vmem:[#allocation33_spill] sm:$0xff] %v8923_v3  ;;  %v6798_v46 = vpop.f32.mrb[127].mxu0 }
 0x4f0   :  { %v2795_v24 = vpop.f32.mrb[128].mxu0 }
 0x4f1   :  { %v2796_v49 = vadd.f32 %v8458_v59, %v2795_v24  ;;  %v6830_v40 = vpop.f32.mrb[129].mxu0 }
 0x4f3   :  { %v2829_v9 = vmul.f32 %v2796_v49, %v8263_v33 }
 0x4f4   :  { %v2800_v62 = vpop.f32.mrb[130].mxu0 }
 0x4f5   :  { %v2836_v10 = vadd.f32 %v2829_v9, %v8270_v38  ;;  %v2801_v13 = vadd.f32 %v8458_v59, %v2800_v62  ;;  %v6833_v60 = vpop.f32.mrb[131].mxu0 }
 0x4f7   :  { %v2843_v2 = vmul.f32 0.2, %v2836_v10  ;;  %v2830_v32 = vmul.f32 %v2801_v13, %v8263_v33 }
 0x4f8   :  { %v2805_v11 = vpop.f32.mrb[132].mxu0 }
 0x4f9   :  { %v2850_v34 = vmax.f32 %v2836_v10, %v2843_v2  ;;  %v2837_v3 = vadd.f32 %v2830_v32, %v8270_v38  ;;  %v2806_v46 = vadd.f32 %v8458_v59, %v2805_v11  ;;  %v6836_v54 = vpop.f32.mrb[133].mxu0 }
 0x4fb   :  { %v2844_v24 = vmul.f32 0.2, %v2837_v3  ;;  %v2831_v40 = vmul.f32 %v2806_v46, %v8263_v33  ;;  %6858 = vmatmul.mubr.msk.f32.vlgmr.msra.gmra.mrb[140].mxu1 %vm509_vm2, %v2850_v34 }
 0x4fc   :  { %7415 = vmatpush3.bf16.msra.mxu1 %v7617_v4  ;;  %v2810_v49 = vpop.f32.mrb[134].mxu0  ;;  %6860 = vmatprep.mubr.msk.f32.mxu1 %vm7533_vm0, %v10300_v5 }
 0x4fd   :  { %v2851_v60 = vmax.f32 %v2837_v3, %v2844_v24  ;;  %v2838_v62 = vadd.f32 %v2831_v40, %v8270_v38  ;;  %v2811_v2 = vadd.f32 %v8458_v59, %v2810_v49  ;;  %v6839_v9 = vpop.f32.mrb[135].mxu0  ;;  %7422 = vmatprep.subr.bf16.mxu1 %v10301_v45 }
 0x4ff   :  { %v2845_v54 = vmul.f32 0.2, %v2838_v62  ;;  %v2832_v11 = vmul.f32 %v2811_v2, %v8263_v33  ;;  %6861 = vmatmul.mubr.msk.f32.gmra.mrb[142].mxu1 %vm509_vm2, %v2851_v60 }
 0x500   :  { %v2815_v10 = vpop.f32.mrb[136].mxu0  ;;  %6863 = vmatprep.mubr.msk.f32.mxu1 %vm7533_vm0, %v10300_v5 }
 0x501   :  { %v2852_v13 = vmax.f32 %v2838_v62, %v2845_v54  ;;  %v2839_v32 = vadd.f32 %v2832_v11, %v8270_v38  ;;  %v2816_v3 = vadd.f32 %v8458_v59, %v2815_v10  ;;  %v6842_v34 = vpop.f32.mrb[137].mxu0 }
 0x503   :  { %v2846_v46 = vmul.f32 0.2, %v2839_v32  ;;  %v2833_v24 = vmul.f32 %v2816_v3, %v8263_v33  ;;  %6864 = vmatmul.mubr.msk.f32.gmra.mrb[144].mxu1 %vm509_vm2, %v2852_v13 }
 0x504   :  { %v2820_v40 = vpop.f32.mrb[138].mxu0  ;;  %6866 = vmatprep.mubr.msk.f32.mxu1 %vm7533_vm0, %v10300_v5 }
 0x505   :  { %v2853_v49 = vmax.f32 %v2839_v32, %v2846_v46  ;;  %v2840_v60 = vadd.f32 %v2833_v24, %v8270_v38  ;;  %v2821_v2 = vadd.f32 %v8458_v59, %v2820_v40  ;;  %v6845_v62 = vpop.f32.mrb[139].mxu0 }
 0x507   :  { %v2847_v9 = vmul.f32 0.2, %v2840_v60  ;;  %v2834_v54 = vmul.f32 %v2821_v2, %v8263_v33  ;;  %6867 = vmatmul.mubr.msk.f32.gmra.mrb[146].mxu1 %vm509_vm2, %v2853_v49 }
 0x508   :  { %v2825_v11 = vpop.f32.mrb[140].mxu0  ;;  %6869 = vmatprep.mubr.msk.f32.mxu1 %vm7533_vm0, %v10300_v5 }
 0x509   :  { %v2854_v10 = vmax.f32 %v2840_v60, %v2847_v9  ;;  %v2841_v13 = vadd.f32 %v2834_v54, %v8270_v38  ;;  %v2826_v3 = vadd.f32 %v8458_v59, %v2825_v11  ;;  %v6848_v32 = vpop.f32.mrb[141].mxu0  ;;  %v5816_v11 = vld [vmem:[%s10260_s1 + $0x268] sm:$0xff] }
 0x50b   :  { %v2848_v34 = vmul.f32 0.2, %v2841_v13  ;;  %v2835_v46 = vmul.f32 %v2826_v3, %v8263_v33  ;;  %6870 = vmatmul.mubr.msk.f32.gmra.mrb[148].mxu1 %vm509_vm2, %v2854_v10  ;;  %v5817_v3 = vld [vmem:[%s10260_s1 + $0x270] sm:$0xff] }
 0x50c   :  { %v8960_v24 = vpop.f32.mrb[142].mxu0  ;;  %6872 = vmatprep.mubr.msk.f32.mxu1 %vm7533_vm0, %v10300_v5 }
 0x50d   :  { %10309 = vst [vmem:[#allocation34_spill] sm:$0xff] %v8960_v24  ;;  %v2855_v40 = vmax.f32 %v2841_v13, %v2848_v34  ;;  %v2842_v49 = vadd.f32 %v2835_v46, %v8270_v38  ;;  %v6884_v2 = vpop.f32.mrb[143].mxu0  ;;  %v5818_v46 = vld [vmem:[%s10260_s1 + $0x278] sm:$0xff] }
 0x50e   :  { %v5819_v2 = vld [vmem:[%s10260_s1 + $0x280] sm:$0xff] }
 0x50f   :  { %v2849_v60 = vmul.f32 0.2, %v2842_v49  ;;  %6873 = vmatmul.mubr.msk.f32.gmra.mrb[150].mxu1 %vm509_vm2, %v2855_v40 }
 0x510   :  { %v8966_v62 = vpop.f32.mrb[144].mxu0  ;;  %6875 = vmatprep.mubr.msk.f32.mxu1 %vm7533_vm0, %v10300_v5 }
 0x511   :  { %10310 = vst [vmem:[#allocation35_spill] sm:$0xff] %v8966_v62  ;;  %v2856_v59 = vmax.f32 %v2842_v49, %v2849_v60  ;;  %v6887_v9 = vpop.f32.mrb[145].mxu0 }
 0x512   :  { %v5820_v9 = vld [vmem:[%s10260_s1 + $0x288] sm:$0xff] }
 0x513   :  { %6876 = vmatmul.mubr.msk.f32.gmra.mrb[152].mxu1 %vm509_vm2, %v2856_v59 }
 0x514   :  { %v8971_v54 = vpop.f32.mrb[146].mxu0  ;;  %6907 = vmatprep.mubr.msk.f32.mxu1 %vm7533_vm0, %v10300_v5 }
 0x515   :  { %10311 = vst [vmem:[#allocation36_spill] sm:$0xff] %v8971_v54  ;;  %v6890_v10 = vpop.f32.mrb[147].mxu0 }
 0x516   :  { %v5821_v10 = vld [vmem:[%s10260_s1 + $0x290] sm:$0xff] }
 0x517   :  { %6908 = vmatmul.mubr.msk.f32.vlgmr.msra.gmra.mrb[154].mxu1 %vm99_vm1, %v5816_v11 }
 0x518   :  { %v8979_v13 = vpop.f32.mrb[148].mxu0  ;;  %6910 = vmatprep.mubr.msk.f32.mxu1 %vm7533_vm0, %v10300_v5  ;;  %7424 = vmatpush3.bf16.msra.mxu1 %v7617_v4 }
 0x519   :  { %10312 = vst [vmem:[#allocation37_spill] sm:$0xff] %v8979_v13  ;;  %v6893_v32 = vpop.f32.mrb[149].mxu0  ;;  %7428 = vmatprep.subr.bf16.mxu1 %v10301_v45 }
 0x51a   :  { %v5841_v32 = vld [vmem:[%s10260_s1 + $0x2a0] sm:$0xff] }
 0x51b   :  { %6911 = vmatmul.mubr.msk.f32.gmra.mrb[156].mxu1 %vm99_vm1, %v5817_v3  ;;  %v5822_v3 = vld [vmem:[%s10260_s1 + $0x298] sm:$0x3] }
 0x51c   :  { %v8989_v34 = vpop.f32.mrb[150].mxu0  ;;  %6913 = vmatprep.mubr.msk.f32.mxu1 %vm7533_vm0, %v10300_v5 }
 0x51d   :  { %10313 = vst [vmem:[#allocation38_spill] sm:$0xff] %v8989_v34  ;;  %v6896_v40 = vpop.f32.mrb[151].mxu0 }
 0x51e   :  { %v5843_v40 = vld [vmem:[%s10260_s1 + $0x2b0] sm:$0xff] }
 0x51f   :  { %6914 = vmatmul.mubr.msk.f32.gmra.mrb[158].mxu1 %vm99_vm1, %v5818_v46  ;;  %v5842_v46 = vld [vmem:[%s10260_s1 + $0x2a8] sm:$0xff] }
 0x520   :  { %v8997_v49 = vpop.f32.mrb[152].mxu0  ;;  %6916 = vmatprep.mubr.msk.f32.mxu1 %vm7533_vm0, %v10300_v5 }
 0x521   :  { %10314 = vst [vmem:[#allocation39_spill] sm:$0xff] %v8997_v49  ;;  %v6899_v60 = vpop.f32.mrb[153].mxu0 }
 0x522   :  { %v5845_v60 = vld [vmem:[%s10260_s1 + $0x2c0] sm:$0xff] }
 0x523   :  { %6917 = vmatmul.mubr.msk.f32.gmra.mrb[160].mxu1 %vm99_vm1, %v5819_v2  ;;  %v5844_v2 = vld [vmem:[%s10260_s1 + $0x2b8] sm:$0xff] }
 0x524   :  { %v9005_v59 = vpop.f32.mrb[154].mxu0  ;;  %6919 = vmatprep.mubr.msk.f32.mxu1 %vm7533_vm0, %v10300_v5 }
 0x525   :  { %10315 = vst [vmem:[#allocation40_spill] sm:$0xff] %v9005_v59  ;;  %v6902_v11 = vpop.f32.mrb[155].mxu0 }
 0x526   :  { %v5847_v11 = vld [vmem:[%s10260_s1 + $0x2d0] sm:$0x3] }
 0x527   :  { %6920 = vmatmul.mubr.msk.f32.gmra.mrb[162].mxu1 %vm99_vm1, %v5820_v9  ;;  %v5846_v9 = vld [vmem:[%s10260_s1 + $0x2c8] sm:$0xff] }
 0x528   :  { %6922 = vmatprep.mubr.msk.f32.mxu1 %vm7533_vm0, %v10300_v5 }
 0x52b   :  { %6923 = vmatmul.mubr.msk.f32.gmra.mrb[164].mxu1 %vm99_vm1, %v5821_v10  ;;  %v5830_v10 = vld [vmem:[%s10265_s6 + $0x160] sm:$0xff] }
 0x52c   :  { %6925 = vmatprep.mubr.msk.f32.mxu1 %vm7533_vm0, %v10300_v5 }
 0x52f   :  { %6926 = vmatmul.mubr.msk.f32.gmra.mrb[166].mxu1 %vm99_vm1, %v5822_v3  ;;  %v5831_v3 = vld [vmem:[%s10265_s6 + $0x168] sm:$0xff] }
 0x530   :  { %6961 = vmatprep.mubr.msk.f32.mxu1 %vm7533_vm0, %v10300_v5 }
 0x533   :  { %6962 = vmatmul.mubr.msk.f32.vlgmr.msra.gmra.mrb[168].mxu1 %vm99_vm1, %v5841_v32  ;;  %v7417_v32 = vpack.c.bf16 %v5831_v3, %v5830_v10 }
 0x534   :  { %6964 = vmatprep.mubr.msk.f32.mxu1 %vm7533_vm0, %v10300_v5 }
 0x535   :  { %7418 = vmatpush3.bf16.msra.mxu0 %v7417_v32 }
 0x536   :  { %7419 = vmatprep.subr.bf16.mxu0 %v10301_v45 }
 0x537   :  { %6965 = vmatmul.mubr.msk.f32.gmra.mrb[170].mxu1 %vm99_vm1, %v5842_v46  ;;  %v5832_v46 = vld [vmem:[%s10265_s6 + $0x170] sm:$0xff] }
 0x538   :  { %6967 = vmatprep.mubr.msk.f32.mxu1 %vm7533_vm0, %v10300_v5 }
 0x53b   :  { %6968 = vmatmul.mubr.msk.f32.gmra.mrb[172].mxu1 %vm99_vm1, %v5843_v40  ;;  %v5833_v40 = vld [vmem:[%s10265_s6 + $0x178] sm:$0xff] }
 0x53c   :  { %6970 = vmatprep.mubr.msk.f32.mxu1 %vm7533_vm0, %v10300_v5 }
 0x53f   :  { %6971 = vmatmul.mubr.msk.f32.gmra.mrb[174].mxu1 %vm99_vm1, %v5844_v2  ;;  %v7420_v2 = vpack.c.bf16 %v5833_v40, %v5832_v46 }
 0x540   :  { %6973 = vmatprep.mubr.msk.f32.mxu1 %vm7533_vm0, %v10300_v5 }
 0x541   :  { %7421 = vmatpush3.bf16.msra.mxu0 %v7420_v2 }
 0x542   :  { %7425 = vmatprep.subr.bf16.mxu0 %v10301_v45 }
 0x543   :  { %6974 = vmatmul.mubr.msk.f32.gmra.mrb[176].mxu1 %vm99_vm1, %v5845_v60 }
 0x544   :  { %6976 = vmatprep.mubr.msk.f32.mxu1 %vm7533_vm0, %v10300_v5 }
 0x547   :  { %6977 = vmatmul.mubr.msk.f32.gmra.mrb[178].mxu1 %vm99_vm1, %v5846_v9 }
 0x548   :  { %6979 = vmatprep.mubr.msk.f32.mxu1 %vm7533_vm0, %v10300_v5 }
 0x54b   :  { %6980 = vmatmul.mubr.msk.f32.gmra.mrb[180].mxu1 %vm99_vm1, %v5847_v11 }
 0x54c   :  { %7015 = vmatprep.mubr.msk.f32.mxu1 %vm7533_vm0, %v10300_v5 }
 0x5ce   :  { %v9083_v60 = vpop.f32.mrb[140].mxu1 }
 0x5cf   :  { %10316 = vst [vmem:[#allocation41_spill] sm:$0xff] %v9083_v60  ;;  %v6859_v9 = vpop.f32.mrb[141].mxu1 }
 0x5d0   :  { %v9100_v9 = vld [vmem:[%s10262_s3] ss:$0 sm:$0xff] }
 0x5d2   :  { %v9085_v11 = vpop.f32.mrb[142].mxu1 }
 0x5d3   :  { %10317 = vst [vmem:[#allocation42_spill] sm:$0xff] %v9085_v11  ;;  %v6862_v10 = vpop.f32.mrb[143].mxu1 }
 0x5d6   :  { %v9087_v3 = vpop.f32.mrb[144].mxu1 }
 0x5d7   :  { %10318 = vst [vmem:[#allocation43_spill] sm:$0xff] %v9087_v3  ;;  %v6865_v32 = vpop.f32.mrb[145].mxu1 }
 0x5da   :  { %v9089_v59 = vpop.f32.mrb[146].mxu1 }
 0x5db   :  { %10319 = vst [vmem:[#allocation44_spill] sm:$0xff] %v9089_v59  ;;  %v6868_v49 = vpop.f32.mrb[147].mxu1 }
 0x5de   :  { %v9091_v34 = vpop.f32.mrb[148].mxu1 }
 0x5df   :  { %10320 = vst [vmem:[#allocation45_spill] sm:$0xff] %v9091_v34  ;;  %v6871_v13 = vpop.f32.mrb[149].mxu1 }
 0x5e2   :  { %v9093_v54 = vpop.f32.mrb[150].mxu1 }
 0x5e3   :  { %10321 = vst [vmem:[#allocation46_spill] sm:$0xff] %v9093_v54  ;;  %v6874_v46 = vpop.f32.mrb[151].mxu1 }
 0x5e6   :  { %v9095_v40 = vpop.f32.mrb[152].mxu1 }
 0x5e7   :  { %10322 = vst [vmem:[#allocation47_spill] sm:$0xff] %v9095_v40  ;;  %v6877_v2 = vpop.f32.mrb[153].mxu1 }
 0x5ea   :  { %v3240_v60 = vpop.f32.mrb[154].mxu1 }
 0x5eb   :  { %v3241_v10 = vadd.f32 %v9100_v9, %v3240_v60  ;;  %v6909_v32 = vpop.f32.mrb[155].mxu1 }
 0x5ed   :  { %v3274_v49 = vmul.f32 %v3241_v10, %v8263_v33 }
 0x5ee   :  { %v3245_v59 = vpop.f32.mrb[156].mxu1 }
 0x5ef   :  { %v3281_v13 = vadd.f32 %v3274_v49, %v8270_v38  ;;  %v3246_v54 = vadd.f32 %v9100_v9, %v3245_v59  ;;  %v6912_v46 = vpop.f32.mrb[157].mxu1 }
 0x5f1   :  { %v3288_v34 = vmul.f32 0.2, %v3281_v13  ;;  %v3275_v2 = vmul.f32 %v3246_v54, %v8263_v33 }
 0x5f2   :  { %v3250_v40 = vpop.f32.mrb[158].mxu1 }
 0x5f3   :  { %v3295_v3 = vmax.f32 %v3281_v13, %v3288_v34  ;;  %v3282_v11 = vadd.f32 %v3275_v2, %v8270_v38  ;;  %v3251_v62 = vadd.f32 %v9100_v9, %v3250_v40  ;;  %v6915_v24 = vpop.f32.mrb[159].mxu1 }
 0x5f5   :  { %v3289_v60 = vmul.f32 0.2, %v3282_v11  ;;  %v3276_v32 = vmul.f32 %v3251_v62, %v8263_v33  ;;  %6937 = vmatmul.mubr.msk.f32.vlgmr.msra.gmra.mrb[156].mxu0 %vm509_vm2, %v3295_v3 }
 0x5f6   :  { %7427 = vmatpush3.bf16.msra.mxu0 %v7617_v4  ;;  %v3255_v10 = vpop.f32.mrb[160].mxu1  ;;  %6939 = vmatprep.mubr.msk.f32.mxu0 %vm7533_vm0, %v10300_v5 }
 0x5f7   :  { %v3296_v59 = vmax.f32 %v3282_v11, %v3289_v60  ;;  %v3283_v54 = vadd.f32 %v3276_v32, %v8270_v38  ;;  %v3256_v34 = vadd.f32 %v9100_v9, %v3255_v10  ;;  %v6918_v49 = vpop.f32.mrb[161].mxu1  ;;  %7434 = vmatprep.subr.bf16.mxu0 %v10301_v45 }
 0x5f9   :  { %v3290_v24 = vmul.f32 0.2, %v3283_v54  ;;  %v3277_v40 = vmul.f32 %v3256_v34, %v8263_v33  ;;  %6940 = vmatmul.mubr.msk.f32.gmra.mrb[158].mxu0 %vm509_vm2, %v3296_v59 }
 0x5fa   :  { %v3260_v62 = vpop.f32.mrb[162].mxu1  ;;  %6942 = vmatprep.mubr.msk.f32.mxu0 %vm7533_vm0, %v10300_v5 }
 0x5fb   :  { %v3297_v3 = vmax.f32 %v3283_v54, %v3290_v24  ;;  %v3284_v13 = vadd.f32 %v3277_v40, %v8270_v38  ;;  %v3261_v11 = vadd.f32 %v9100_v9, %v3260_v62  ;;  %v6921_v46 = vpop.f32.mrb[163].mxu1 }
 0x5fd   :  { %v3291_v2 = vmul.f32 0.2, %v3284_v13  ;;  %v3278_v60 = vmul.f32 %v3261_v11, %v8263_v33  ;;  %6943 = vmatmul.mubr.msk.f32.gmra.mrb[160].mxu0 %vm509_vm2, %v3297_v3 }
 0x5fe   :  { %v3265_v32 = vpop.f32.mrb[164].mxu1  ;;  %6945 = vmatprep.mubr.msk.f32.mxu0 %vm7533_vm0, %v10300_v5 }
 0x5ff   :  { %v3298_v10 = vmax.f32 %v3284_v13, %v3291_v2  ;;  %v3285_v59 = vadd.f32 %v3278_v60, %v8270_v38  ;;  %v3266_v34 = vadd.f32 %v9100_v9, %v3265_v32  ;;  %v6924_v54 = vpop.f32.mrb[165].mxu1 }
 0x601   :  { %v3292_v49 = vmul.f32 0.2, %v3285_v59  ;;  %v3279_v24 = vmul.f32 %v3266_v34, %v8263_v33  ;;  %6946 = vmatmul.mubr.msk.f32.gmra.mrb[162].mxu0 %vm509_vm2, %v3298_v10 }
 0x602   :  { %v3270_v40 = vpop.f32.mrb[166].mxu1  ;;  %6948 = vmatprep.mubr.msk.f32.mxu0 %vm7533_vm0, %v10300_v5 }
 0x603   :  { %v3299_v62 = vmax.f32 %v3285_v59, %v3292_v49  ;;  %v3286_v3 = vadd.f32 %v3279_v24, %v8270_v38  ;;  %v3271_v11 = vadd.f32 %v9100_v9, %v3270_v40  ;;  %v6927_v13 = vpop.f32.mrb[167].mxu1 }
 0x604   :  { %v5860_v13 = vld [vmem:[%s10260_s1 + $0x2e0] sm:$0xff] }
 0x605   :  { %v3293_v46 = vmul.f32 0.2, %v3286_v3  ;;  %v3280_v2 = vmul.f32 %v3271_v11, %v8263_v33  ;;  %6949 = vmatmul.mubr.msk.f32.gmra.mrb[164].mxu0 %vm509_vm2, %v3299_v62  ;;  %v5859_v62 = vld [vmem:[%s10260_s1 + $0x2d8] sm:$0xff] }
 0x606   :  { %v9137_v60 = vpop.f32.mrb[168].mxu1  ;;  %6951 = vmatprep.mubr.msk.f32.mxu0 %vm7533_vm0, %v10300_v5 }
 0x607   :  { %v3300_v32 = vmax.f32 %v3286_v3, %v3293_v46  ;;  %v3287_v10 = vadd.f32 %v3280_v2, %v8270_v38  ;;  %v6963_v34 = vpop.f32.mrb[169].mxu1 }
 0x609   :  { %v3294_v59 = vmul.f32 0.2, %v3287_v10  ;;  %6952 = vmatmul.mubr.msk.f32.gmra.mrb[166].mxu0 %vm509_vm2, %v3300_v32  ;;  %v5861_v32 = vld [vmem:[%s10260_s1 + $0x2e8] sm:$0xff] }
 0x60a   :  { %v9143_v54 = vpop.f32.mrb[170].mxu1  ;;  %6954 = vmatprep.mubr.msk.f32.mxu0 %vm7533_vm0, %v10300_v5 }
 0x60b   :  { %v3301_v49 = vmax.f32 %v3287_v10, %v3294_v59  ;;  %v6966_v24 = vpop.f32.mrb[171].mxu1  ;;  %v5862_v59 = vld [vmem:[%s10260_s1 + $0x2f0] sm:$0xff] }
 0x60d   :  { %6955 = vmatmul.mubr.msk.f32.gmra.mrb[168].mxu0 %vm509_vm2, %v3301_v49 }
 0x60e   :  { %v9148_v40 = vpop.f32.mrb[172].mxu1  ;;  %6986 = vmatprep.mubr.msk.f32.mxu0 %vm7533_vm0, %v10300_v5 }
 0x60f   :  { %v6969_v3 = vpop.f32.mrb[173].mxu1 }
 0x611   :  { %6987 = vmatmul.mubr.msk.f32.vlgmr.msra.gmra.mrb[170].mxu0 %vm99_vm1, %v5859_v62  ;;  %v5863_v62 = vld [vmem:[%s10260_s1 + $0x2f8] sm:$0xff] }
 0x612   :  { %v9156_v11 = vpop.f32.mrb[174].mxu1  ;;  %6989 = vmatprep.mubr.msk.f32.mxu0 %vm7533_vm0, %v10300_v5  ;;  %7436 = vmatpush3.bf16.msra.mxu0 %v7617_v4 }
 0x613   :  { %v6972_v46 = vpop.f32.mrb[175].mxu1  ;;  %7440 = vmatprep.subr.bf16.mxu0 %v10301_v45 }
 0x614   :  { %v5865_v46 = vld [vmem:[%s10260_s1 + $0x308] sm:$0x3] }
 0x615   :  { %6990 = vmatmul.mubr.msk.f32.gmra.mrb[172].mxu0 %vm99_vm1, %v5860_v13  ;;  %v5864_v13 = vld [vmem:[%s10260_s1 + $0x300] sm:$0xff] }
 0x616   :  { %v9166_v2 = vpop.f32.mrb[176].mxu1  ;;  %6992 = vmatprep.mubr.msk.f32.mxu0 %vm7533_vm0, %v10300_v5 }
 0x617   :  { %v6975_v10 = vpop.f32.mrb[177].mxu1 }
 0x618   :  { %v5885_v10 = vld [vmem:[%s10260_s1 + $0x318] sm:$0xff] }
 0x619   :  { %6993 = vmatmul.mubr.msk.f32.gmra.mrb[174].mxu0 %vm99_vm1, %v5861_v32  ;;  %v5884_v32 = vld [vmem:[%s10260_s1 + $0x310] sm:$0xff] }
 0x61a   :  { %v9174_v34 = vpop.f32.mrb[178].mxu1  ;;  %6995 = vmatprep.mubr.msk.f32.mxu0 %vm7533_vm0, %v10300_v5 }
 0x61b   :  { %v6978_v49 = vpop.f32.mrb[179].mxu1 }
 0x61c   :  { %v5887_v49 = vld [vmem:[%s10260_s1 + $0x328] sm:$0xff] }
 0x61d   :  { %6996 = vmatmul.mubr.msk.f32.gmra.mrb[176].mxu0 %vm99_vm1, %v5862_v59  ;;  %v5886_v59 = vld [vmem:[%s10260_s1 + $0x320] sm:$0xff] }
 0x61e   :  { %v9182_v24 = vpop.f32.mrb[180].mxu1  ;;  %6998 = vmatprep.mubr.msk.f32.mxu0 %vm7533_vm0, %v10300_v5 }
 0x61f   :  { %v6981_v3 = vpop.f32.mrb[181].mxu1 }
 0x620   :  { %v5889_v3 = vld [vmem:[%s10260_s1 + $0x338] sm:$0xff] }
 0x621   :  { %6999 = vmatmul.mubr.msk.f32.gmra.mrb[178].mxu0 %vm99_vm1, %v5863_v62  ;;  %v5888_v62 = vld [vmem:[%s10260_s1 + $0x330] sm:$0xff] }
 0x622   :  { %7001 = vmatprep.mubr.msk.f32.mxu0 %vm7533_vm0, %v10300_v5 }
 0x625   :  { %7002 = vmatmul.mubr.msk.f32.gmra.mrb[180].mxu0 %vm99_vm1, %v5864_v13  ;;  %v5890_v13 = vld [vmem:[%s10260_s1 + $0x340] sm:$0x3] }
 0x626   :  { %7004 = vmatprep.mubr.msk.f32.mxu0 %vm7533_vm0, %v10300_v5 }
 0x629   :  { %7005 = vmatmul.mubr.msk.f32.gmra.mrb[182].mxu0 %vm99_vm1, %v5865_v46  ;;  %v5873_v46 = vld [vmem:[%s10265_s6 + $0x1a0] sm:$0xff] }
 0x62a   :  { %7040 = vmatprep.mubr.msk.f32.mxu0 %vm7533_vm0, %v10300_v5 }
 0x62d   :  { %7041 = vmatmul.mubr.msk.f32.vlgmr.msra.gmra.mrb[184].mxu0 %vm99_vm1, %v5884_v32  ;;  %v5874_v32 = vld [vmem:[%s10265_s6 + $0x1a8] sm:$0xff] }
 0x62e   :  { %7043 = vmatprep.mubr.msk.f32.mxu0 %vm7533_vm0, %v10300_v5 }
 0x631   :  { %7044 = vmatmul.mubr.msk.f32.gmra.mrb[186].mxu0 %vm99_vm1, %v5885_v10  ;;  %v7429_v10 = vpack.c.bf16 %v5874_v32, %v5873_v46 }
 0x632   :  { %7046 = vmatprep.mubr.msk.f32.mxu0 %vm7533_vm0, %v10300_v5 }
 0x633   :  { %7430 = vmatpush3.bf16.msra.mxu1 %v7429_v10 }
 0x634   :  { %7431 = vmatprep.subr.bf16.mxu1 %v10301_v45 }
 0x635   :  { %7047 = vmatmul.mubr.msk.f32.gmra.mrb[188].mxu0 %vm99_vm1, %v5886_v59  ;;  %v5875_v59 = vld [vmem:[%s10265_s6 + $0x1b0] sm:$0xff] }
 0x636   :  { %7049 = vmatprep.mubr.msk.f32.mxu0 %vm7533_vm0, %v10300_v5 }
 0x639   :  { %7050 = vmatmul.mubr.msk.f32.gmra.mrb[190].mxu0 %vm99_vm1, %v5887_v49  ;;  %v5876_v49 = vld [vmem:[%s10265_s6 + $0x1b8] sm:$0xff] }
 0x63a   :  { %7052 = vmatprep.mubr.msk.f32.mxu0 %vm7533_vm0, %v10300_v5 }
 0x63d   :  { %7053 = vmatmul.mubr.msk.f32.gmra.mrb[192].mxu0 %vm99_vm1, %v5888_v62  ;;  %v7432_v62 = vpack.c.bf16 %v5876_v49, %v5875_v59 }
 0x63e   :  { %7055 = vmatprep.mubr.msk.f32.mxu0 %vm7533_vm0, %v10300_v5 }
 0x63f   :  { %7433 = vmatpush3.bf16.msra.mxu1 %v7432_v62 }
 0x640   :  { %7437 = vmatprep.subr.bf16.mxu1 %v10301_v45 }
 0x641   :  { %7056 = vmatmul.mubr.msk.f32.gmra.mrb[194].mxu0 %vm99_vm1, %v5889_v3 }
 0x642   :  { %7058 = vmatprep.mubr.msk.f32.mxu0 %vm7533_vm0, %v10300_v5 }
 0x645   :  { %7059 = vmatmul.mubr.msk.f32.gmra.mrb[196].mxu0 %vm99_vm1, %v5890_v13 }
 0x646   :  { %7094 = vmatprep.mubr.msk.f32.mxu0 %vm7533_vm0, %v10300_v5 }
 0x6c8   :  { %v9260_v3 = vpop.f32.mrb[156].mxu0 }
 0x6c9   :  { %10323 = vst [vmem:[#allocation48_spill] sm:$0xff] %v9260_v3  ;;  %v6938_v13 = vpop.f32.mrb[157].mxu0 }
 0x6cc   :  { %v9262_v57 = vpop.f32.mrb[158].mxu0 }
 0x6cd   :  { %10324 = vst [vmem:[#allocation49_spill] sm:$0xff] %v9262_v57  ;;  %v6941_v46 = vpop.f32.mrb[159].mxu0 }
 0x6d0   :  { %v9264_v32 = vpop.f32.mrb[160].mxu0 }
 0x6d1   :  { %10325 = vst [vmem:[#allocation50_spill] sm:$0xff] %v9264_v32  ;;  %v6944_v10 = vpop.f32.mrb[161].mxu0 }
 0x6d4   :  { %v9266_v44 = vpop.f32.mrb[162].mxu0 }
 0x6d5   :  { %10326 = vst [vmem:[#allocation51_spill] sm:$0xff] %v9266_v44  ;;  %v6947_v27 = vpop.f32.mrb[163].mxu0 }
 0x6d8   :  { %v9268_v36 = vpop.f32.mrb[164].mxu0 }
 0x6d9   :  { %10327 = vst [vmem:[#allocation52_spill] sm:$0xff] %v9268_v36  ;;  %v6950_v26 = vpop.f32.mrb[165].mxu0 }
 0x6dc   :  { %v9270_v1 = vpop.f32.mrb[166].mxu0 }
 0x6dd   :  { %10328 = vst [vmem:[#allocation53_spill] sm:$0xff] %v9270_v1  ;;  %v6953_v59 = vpop.f32.mrb[167].mxu0 }
 0x6e0   :  { %v9272_v49 = vpop.f32.mrb[168].mxu0 }
 0x6e1   :  { %10329 = vst [vmem:[#allocation54_spill] sm:$0xff] %v9272_v49  ;;  %v6956_v62 = vpop.f32.mrb[169].mxu0 }
 0x6e4   :  { %v3685_v3 = vpop.f32.mrb[170].mxu0 }
 0x6e5   :  { %v3686_v13 = vadd.f32 %v9100_v9, %v3685_v3  ;;  %v6988_v57 = vpop.f32.mrb[171].mxu0 }
 0x6e7   :  { %v3719_v46 = vmul.f32 %v3686_v13, %v8263_v33 }
 0x6e8   :  { %v3690_v32 = vpop.f32.mrb[172].mxu0 }
 0x6e9   :  { %v3726_v10 = vadd.f32 %v3719_v46, %v8270_v38  ;;  %v3691_v27 = vadd.f32 %v9100_v9, %v3690_v32  ;;  %v6991_v44 = vpop.f32.mrb[173].mxu0 }
 0x6eb   :  { %v3733_v36 = vmul.f32 0.2, %v3726_v10  ;;  %v3720_v26 = vmul.f32 %v3691_v27, %v8263_v33 }
 0x6ec   :  { %v3695_v1 = vpop.f32.mrb[174].mxu0 }
 0x6ed   :  { %v3740_v59 = vmax.f32 %v3726_v10, %v3733_v36  ;;  %v3727_v49 = vadd.f32 %v3720_v26, %v8270_v38  ;;  %v3696_v62 = vadd.f32 %v9100_v9, %v3695_v1  ;;  %v6994_v19 = vpop.f32.mrb[175].mxu0 }
 0x6ef   :  { %v3734_v3 = vmul.f32 0.2, %v3727_v49  ;;  %v3721_v57 = vmul.f32 %v3696_v62, %v8263_v33  ;;  %7016 = vmatmul.mubr.msk.f32.vlgmr.msra.gmra.mrb[182].mxu1 %vm509_vm2, %v3740_v59 }
 0x6f0   :  { %7439 = vmatpush3.bf16.msra.mxu1 %v7617_v4  ;;  %v3700_v13 = vpop.f32.mrb[176].mxu0  ;;  %7018 = vmatprep.mubr.msk.f32.mxu1 %vm7533_vm0, %v10300_v5 }
 0x6f1   :  { %v3741_v44 = vmax.f32 %v3727_v49, %v3734_v3  ;;  %v3728_v32 = vadd.f32 %v3721_v57, %v8270_v38  ;;  %v3701_v36 = vadd.f32 %v9100_v9, %v3700_v13  ;;  %v6997_v46 = vpop.f32.mrb[177].mxu0  ;;  %7446 = vmatprep.subr.bf16.mxu1 %v10301_v45 }
 0x6f3   :  { %v3735_v19 = vmul.f32 0.2, %v3728_v32  ;;  %v3722_v1 = vmul.f32 %v3701_v36, %v8263_v33  ;;  %7019 = vmatmul.mubr.msk.f32.gmra.mrb[184].mxu1 %vm509_vm2, %v3741_v44 }
 0x6f4   :  { %v3705_v10 = vpop.f32.mrb[178].mxu0  ;;  %7021 = vmatprep.mubr.msk.f32.mxu1 %vm7533_vm0, %v10300_v5 }
 0x6f5   :  { %v3742_v4 = vmax.f32 %v3728_v32, %v3735_v19  ;;  %v3729_v27 = vadd.f32 %v3722_v1, %v8270_v38  ;;  %v3706_v49 = vadd.f32 %v9100_v9, %v3705_v10  ;;  %v7000_v26 = vpop.f32.mrb[179].mxu0 }
 0x6f7   :  { %v3736_v59 = vmul.f32 0.2, %v3729_v27  ;;  %v3723_v62 = vmul.f32 %v3706_v49, %v8263_v33  ;;  %7022 = vmatmul.mubr.msk.f32.gmra.mrb[186].mxu1 %vm509_vm2, %v3742_v4 }
 0x6f8   :  { %v3710_v3 = vpop.f32.mrb[180].mxu0  ;;  %7024 = vmatprep.mubr.msk.f32.mxu1 %vm7533_vm0, %v10300_v5 }
 0x6f9   :  { %v3743_v57 = vmax.f32 %v3729_v27, %v3736_v59  ;;  %v3730_v13 = vadd.f32 %v3723_v62, %v8270_v38  ;;  %v3711_v44 = vadd.f32 %v9100_v9, %v3710_v3  ;;  %v7003_v32 = vpop.f32.mrb[181].mxu0 }
 0x6fb   :  { %v3737_v36 = vmul.f32 0.2, %v3730_v13  ;;  %v3724_v46 = vmul.f32 %v3711_v44, %v8263_v33  ;;  %7025 = vmatmul.mubr.msk.f32.gmra.mrb[188].mxu1 %vm509_vm2, %v3743_v57 }
 0x6fc   :  { %v3715_v19 = vpop.f32.mrb[182].mxu0  ;;  %7027 = vmatprep.mubr.msk.f32.mxu1 %vm7533_vm0, %v10300_v5 }
 0x6fd   :  { %v3744_v1 = vmax.f32 %v3730_v13, %v3737_v36  ;;  %v3731_v10 = vadd.f32 %v3724_v46, %v8270_v38  ;;  %v3716_v4 = vadd.f32 %v9100_v9, %v3715_v19  ;;  %v7006_v27 = vpop.f32.mrb[183].mxu0  ;;  %v916_v46 = vld [vmem:[%s10265_s6] sm:$0xff]  ;;  %v917_v19 = vld [vmem:[%s10265_s6 + $0x8] sm:$0xff] }
 0x6ff   :  { %v3738_v49 = vmul.f32 0.2, %v3731_v10  ;;  %v3725_v26 = vmul.f32 %v3716_v4, %v8263_v33  ;;  %7028 = vmatmul.mubr.msk.f32.gmra.mrb[190].mxu1 %vm509_vm2, %v3744_v1  ;;  %v7447_v4 = vpack.c.bf16 %v917_v19, %v916_v46 }
 0x700   :  { %v9309_v59 = vpop.f32.mrb[184].mxu0  ;;  %7030 = vmatprep.mubr.msk.f32.mxu1 %vm7533_vm0, %v10300_v5 }
 0x701   :  { %v3745_v62 = vmax.f32 %v3731_v10, %v3738_v49  ;;  %v3732_v3 = vadd.f32 %v3725_v26, %v8270_v38  ;;  %v7042_v57 = vpop.f32.mrb[185].mxu0  ;;  %v5902_v10 = vld [vmem:[%s10260_s1 + $0x348] sm:$0xff]  ;;  %v918_v49 = vld [vmem:[%s10265_s6 + $0x10] sm:$0xff]  ;;  %v919_v26 = vld [vmem:[%s10265_s6 + $0x18] sm:$0xff] }
 0x702   :  { %v7450_v57 = vpack.c.bf16 %v919_v26, %v918_v49  ;;  %v5906_v49 = vld [vmem:[%s10260_s1 + $0x368] sm:$0xff]  ;;  %v843_v26 = vadd.f32 %v9100_v9, %v8105_v61  ;;  %v5908_v61 = vld [vmem:[%s10260_s1 + $0x378] sm:$0x3] }
 0x703   :  { %v3739_v13 = vmul.f32 0.2, %v3732_v3  ;;  %7031 = vmatmul.mubr.msk.f32.gmra.mrb[192].mxu1 %vm509_vm2, %v3745_v62 }
 0x704   :  { %v9315_v44 = vpop.f32.mrb[186].mxu0  ;;  %7033 = vmatprep.mubr.msk.f32.mxu1 %vm7533_vm0, %v10300_v5 }
 0x705   :  { %v3746_v32 = vmax.f32 %v3732_v3, %v3739_v13  ;;  %v7045_v36 = vpop.f32.mrb[187].mxu0  ;;  %v5903_v3 = vld [vmem:[%s10260_s1 + $0x350] sm:$0xff] }
 0x706   :  { %v5904_v36 = vld [vmem:[%s10260_s1 + $0x358] sm:$0xff] }
 0x707   :  { %7034 = vmatmul.mubr.msk.f32.gmra.mrb[194].mxu1 %vm509_vm2, %v3746_v32 }
 0x708   :  { %v9326_v1 = vpop.f32.mrb[188].mxu0  ;;  %7065 = vmatprep.mubr.msk.f32.mxu1 %vm7533_vm0, %v10300_v5 }
 0x709   :  { %v7048_v27 = vpop.f32.mrb[189].mxu0 }
 0x70b   :  { %7066 = vmatmul.mubr.msk.f32.vlgmr.msra.gmra.mrb[196].mxu1 %vm99_vm1, %v5902_v10  ;;  %v5905_v10 = vld [vmem:[%s10260_s1 + $0x360] sm:$0xff] }
 0x70c   :  { %v9340_v62 = vpop.f32.mrb[190].mxu0  ;;  %7068 = vmatprep.mubr.msk.f32.mxu1 %vm7533_vm0, %v10300_v5  ;;  %7448 = vmatpush3.bf16.msra.mxu1 %v7447_v4 }
 0x70d   :  { %v7051_v13 = vpop.f32.mrb[191].mxu0  ;;  %7449 = vmatprep.subr.bf16.mxu1 %v10301_v45 }
 0x70e   :  { %v5907_v13 = vld [vmem:[%s10260_s1 + $0x370] sm:$0xff] }
 0x70f   :  { %7069 = vmatmul.mubr.msk.f32.gmra.mrb[198].mxu1 %vm99_vm1, %v5903_v3 }
 0x710   :  { %v9349_v32 = vpop.f32.mrb[192].mxu0  ;;  %7071 = vmatprep.mubr.msk.f32.mxu1 %vm7533_vm0, %v10300_v5  ;;  %7451 = vmatpush3.bf16.msra.mxu1 %v7450_v57  ;;  %v882_v57 = vmul.f32 %v8263_v33, %v843_v26  ;;  %v853_v26 = vadd.f32 %v9100_v9, %v8112_v14  ;;  %v858_v14 = vadd.f32 %v9100_v9, %v8115_v20 }
 0x711   :  { %v7054_v46 = vpop.f32.mrb[193].mxu0  ;;  %7458 = vmatprep.subr.bf16.mxu1 %v10301_v45 }
 0x712   :  { %v848_v46 = vadd.f32 %v9100_v9, %v8108_v7  ;;  %v5683_v7 = vld [vmem:[%s10265_s6 + $0x80] sm:$0xff] }
 0x713   :  { %7072 = vmatmul.mubr.msk.f32.gmra.mrb[200].mxu1 %vm99_vm1, %v5904_v36  ;;  %v895_v36 = vadd.f32 %v8270_v38, %v882_v57  ;;  %v884_v57 = vmul.f32 %v8263_v33, %v853_v26  ;;  %v5686_v26 = vld [vmem:[%s10265_s6 + $0x98] sm:$0xff] }
 0x714   :  { %v9358_v19 = vpop.f32.mrb[194].mxu0  ;;  %7074 = vmatprep.mubr.msk.f32.mxu1 %vm7533_vm0, %v10300_v5 }
 0x715   :  { %10330 = vst [vmem:[#allocation55_spill] sm:$0xff] %v9358_v19  ;;  %v7057_v4 = vpop.f32.mrb[195].mxu0  ;;  %v5685_v19 = vld [vmem:[%s10265_s6 + $0x90] sm:$0xff] }
 0x716   :  { %v902_v4 = vmul.f32 0.2, %v895_v36 }
 0x717   :  { %7075 = vmatmul.mubr.msk.f32.gmra.mrb[202].mxu1 %vm99_vm1, %v5905_v10  ;;  %v883_v10 = vmul.f32 %v8263_v33, %v848_v46 }
 0x718   :  { %v9366_v27 = vpop.f32.mrb[196].mxu0  ;;  %7077 = vmatprep.mubr.msk.f32.mxu1 %vm7533_vm0, %v10300_v5  ;;  %v909_v46 = vmax.f32 %v895_v36, %v902_v4  ;;  %v7462_v36 = vpack.c.bf16 %v5686_v26, %v5685_v19  ;;  %v863_v4 = vadd.f32 %v9100_v9, %v8120_v28  ;;  %v868_v19 = vadd.f32 %v9100_v9, %v8124_v35 }
 0x719   :  { %10331 = vst [vmem:[#allocation56_spill] sm:$0xff] %v9366_v27  ;;  %v7060_v3 = vpop.f32.mrb[197].mxu0  ;;  %v1744_v26 = vadd.f32 %v9100_v9, %v8725_v0 }
 0x71a   :  { %v5684_v3 = vld [vmem:[%s10265_s6 + $0x88] sm:$0xff]  ;;  %v887_v28 = vmul.f32 %v8263_v33, %v868_v19  ;;  %v1754_v19 = vadd.f32 %v9100_v9, %v8729_v53 }
 0x71b   :  { %7078 = vmatmul.mubr.msk.f32.gmra.mrb[204].mxu1 %vm99_vm1, %v5906_v49  ;;  %v896_v49 = vadd.f32 %v8270_v38, %v883_v10  ;;  %v897_v10 = vadd.f32 %v8270_v38, %v884_v57  ;;  %v886_v57 = vmul.f32 %v8263_v33, %v863_v4  ;;  %v5770_v53 = vld [vmem:[%s10265_s6 + $0x108] sm:$0xff] }
 0x71c   :  { %7080 = vmatprep.mubr.msk.f32.mxu1 %vm7533_vm0, %v10300_v5 }
 0x71d   :  { %v903_v27 = vmul.f32 0.2, %v896_v49 }
 0x71f   :  { %7081 = vmatmul.mubr.msk.f32.gmra.mrb[206].mxu1 %vm99_vm1, %v5907_v13  ;;  %v7459_v13 = vpack.c.bf16 %v5684_v3, %v5683_v7  ;;  %v910_v7 = vmax.f32 %v896_v49, %v903_v27  ;;  %v904_v3 = vmul.f32 0.2, %v897_v10  ;;  %v873_v27 = vadd.f32 %v9100_v9, %v8127_v42 }
 0x720   :  { %7083 = vmatprep.mubr.msk.f32.mxu1 %vm7533_vm0, %v10300_v5  ;;  %v900_v49 = vadd.f32 %v8270_v38, %v887_v28  ;;  %v1779_v28 = vmul.f32 %v1754_v19, %v8263_v33 }
 0x722   :  { %v907_v42 = vmul.f32 0.2, %v900_v49 }
 0x723   :  { %7084 = vmatmul.mubr.msk.f32.gmra.mrb[208].mxu1 %vm99_vm1, %v5908_v61  ;;  %v885_v61 = vmul.f32 %v8263_v33, %v858_v14 }
 0x724   :  { %7123 = vmatprep.mubr.msk.f32.mxu1 %vm7533_vm0, %v10300_v5 }
 0x725   :  { %v898_v20 = vadd.f32 %v8270_v38, %v885_v61  ;;  %v888_v61 = vmul.f32 %v8263_v33, %v873_v27  ;;  %v1759_v27 = vadd.f32 %v9100_v9, %v8731_v17 }
 0x727   :  { %7124 = vmatmul.mubr.msk.f32.vlgmr.msra.gmra.mrb[210].mxu1 %vm509_vm2, %v909_v46  ;;  %v911_v46 = vmax.f32 %v897_v10, %v904_v3  ;;  %v905_v14 = vmul.f32 0.2, %v898_v20  ;;  %v901_v4 = vadd.f32 %v8270_v38, %v888_v61  ;;  %v1786_v61 = vadd.f32 %v1779_v28, %v8270_v38 }
 0x728   :  { %7126 = vmatprep.mubr.msk.f32.mxu1 %vm7533_vm0, %v10300_v5  ;;  %7460 = vmatpush3.bf16.msra.mxu1 %v7459_v13  ;;  %v899_v13 = vadd.f32 %v8270_v38, %v886_v57  ;;  %v1780_v17 = vmul.f32 %v1759_v27, %v8263_v33 }
 0x729   :  { %7461 = vmatprep.subr.bf16.mxu1 %v10301_v45  ;;  %v912_v35 = vmax.f32 %v898_v20, %v905_v14  ;;  %v914_v20 = vmax.f32 %v900_v49, %v907_v42  ;;  %v908_v57 = vmul.f32 0.2, %v901_v4  ;;  %v5769_v49 = vld [vmem:[%s10265_s6 + $0x100] sm:$0xff]  ;;  %v5771_v42 = vld [vmem:[%s10265_s6 + $0x110] sm:$0xff] }
 0x72a   :  { %v906_v10 = vmul.f32 0.2, %v899_v13 }
 0x72b   :  { %7127 = vmatmul.mubr.msk.f32.gmra.mrb[212].mxu1 %vm509_vm2, %v910_v7  ;;  %v1777_v7 = vmul.f32 %v1744_v26, %v8263_v33 }
 0x72c   :  { %7129 = vmatprep.mubr.msk.f32.mxu1 %vm7533_vm0, %v10300_v5  ;;  %7463 = vmatpush3.bf16.msra.mxu1 %v7462_v36  ;;  %v1749_v36 = vadd.f32 %v9100_v9, %v8727_v6  ;;  %v913_v3 = vmax.f32 %v899_v13, %v906_v10  ;;  %v915_v13 = vmax.f32 %v901_v4, %v908_v57  ;;  %v5772_v4 = vld [vmem:[%s10265_s6 + $0x118] sm:$0xff] }
 0x72d   :  { %7470 = vmatprep.subr.bf16.mxu1 %v10301_v45  ;;  %v1784_v6 = vadd.f32 %v1777_v7, %v8270_v38  ;;  %v1769_v57 = vadd.f32 %v9100_v9, %v8735_v25  ;;  %v5916_v25 = vld [vmem:[%s10265_s6 + $0x1e0] sm:$0xff] }
 0x72e   :  { %v1778_v0 = vmul.f32 %v1749_v36, %v8263_v33  ;;  %v1764_v36 = vadd.f32 %v9100_v9, %v8733_v51 }
 0x72f   :  { %7130 = vmatmul.mubr.msk.f32.gmra.mrb[214].mxu1 %vm509_vm2, %v911_v46  ;;  %v1791_v14 = vmul.f32 0.2, %v1784_v6 }
 0x730   :  { %7132 = vmatprep.mubr.msk.f32.mxu1 %vm7533_vm0, %v10300_v5  ;;  %v1785_v46 = vadd.f32 %v1778_v0, %v8270_v38  ;;  %v1793_v0 = vmul.f32 0.2, %v1786_v61  ;;  %v1781_v51 = vmul.f32 %v1764_v36, %v8263_v33 }
 0x731   :  { %v1798_v10 = vmax.f32 %v1784_v6, %v1791_v14  ;;  %v1774_v6 = vadd.f32 %v9100_v9, %v8737_v12  ;;  %v1782_v14 = vmul.f32 %v1769_v57, %v8263_v33  ;;  %v5917_v12 = vld [vmem:[%s10265_s6 + $0x1e8] sm:$0xff] }
 0x732   :  { %v1792_v26 = vmul.f32 0.2, %v1785_v46  ;;  %v1800_v19 = vmax.f32 %v1786_v61, %v1793_v0  ;;  %v7441_v27 = vpack.c.bf16 %v5917_v12, %v5916_v25  ;;  %v2644_v0 = vadd.f32 %v9100_v9, %v8799_v21  ;;  %v5856_v21 = vld [vmem:[%s10265_s6 + $0x188] sm:$0xff] }
 0x733   :  { %7133 = vmatmul.mubr.msk.f32.gmra.mrb[216].mxu1 %vm509_vm2, %v912_v35  ;;  %v7471_v35 = vpack.c.bf16 %v5770_v53, %v5769_v49  ;;  %v1783_v28 = vmul.f32 %v1774_v6, %v8263_v33  ;;  %v2649_v6 = vadd.f32 %v9100_v9, %v8807_v30  ;;  %v2654_v30 = vadd.f32 %v9100_v9, %v8817_v50 }
 0x734   :  { %7135 = vmatprep.mubr.msk.f32.mxu1 %vm7533_vm0, %v10300_v5  ;;  %v1799_v7 = vmax.f32 %v1785_v46, %v1792_v26  ;;  %v1789_v26 = vadd.f32 %v1782_v14, %v8270_v38  ;;  %7442 = vmatpush3.bf16.msra.mxu0 %v7441_v27  ;;  %v2669_v57 = vmul.f32 %v2644_v0, %v8263_v33 }
 0x735   :  { %7443 = vmatprep.subr.bf16.mxu0 %v10301_v45  ;;  %v2671_v50 = vmul.f32 %v2654_v30, %v8263_v33 }
 0x736   :  { %v2676_v27 = vadd.f32 %v2669_v57, %v8270_v38 }
 0x737   :  { %7136 = vmatmul.mubr.msk.f32.gmra.mrb[218].mxu1 %vm509_vm2, %v913_v3  ;;  %v7474_v3 = vpack.c.bf16 %v5772_v4, %v5771_v42  ;;  %v2639_v42 = vadd.f32 %v9100_v9, %v8794_v55 }
 0x738   :  { %7138 = vmatprep.mubr.msk.f32.mxu1 %vm7533_vm0, %v10300_v5 }
 0x73b   :  { %7139 = vmatmul.mubr.msk.f32.gmra.mrb[220].mxu1 %vm509_vm2, %v914_v20  ;;  %v1787_v20 = vadd.f32 %v1780_v17, %v8270_v38  ;;  %v1796_v17 = vmul.f32 0.2, %v1789_v26 }
 0x73c   :  { %7141 = vmatprep.mubr.msk.f32.mxu1 %vm7533_vm0, %v10300_v5 }
 0x73d   :  { %v1794_v46 = vmul.f32 0.2, %v1787_v20  ;;  %v1803_v4 = vmax.f32 %v1789_v26, %v1796_v17  ;;  %v5858_v26 = vld [vmem:[%s10265_s6 + $0x198] sm:$0xff] }
 0x73f   :  { %7142 = vmatmul.mubr.msk.f32.gmra.mrb[222].mxu1 %vm509_vm2, %v915_v13  ;;  %v1788_v13 = vadd.f32 %v1781_v51, %v8270_v38  ;;  %v1801_v49 = vmax.f32 %v1787_v20, %v1794_v46  ;;  %v5918_v46 = vld [vmem:[%s10265_s6 + $0x1f0] sm:$0xff] }
 0x740   :  { %7181 = vmatprep.mubr.msk.f32.mxu1 %vm7533_vm0, %v10300_v5 }
 0x741   :  { %v1795_v53 = vmul.f32 0.2, %v1788_v13 }
 0x743   :  { %7182 = vmatmul.mubr.msk.f32.vlgmr.msra.gmra.mrb[224].mxu1 %vm509_vm2, %v1798_v10  ;;  %v1790_v10 = vadd.f32 %v1783_v28, %v8270_v38  ;;  %v1802_v61 = vmax.f32 %v1788_v13, %v1795_v53  ;;  %v5919_v13 = vld [vmem:[%s10265_s6 + $0x1f8] sm:$0xff]  ;;  %v5857_v53 = vld [vmem:[%s10265_s6 + $0x190] sm:$0xff] }
 0x744   :  { %7184 = vmatprep.mubr.msk.f32.mxu1 %vm7533_vm0, %v10300_v5  ;;  %7472 = vmatpush3.bf16.msra.mxu1 %v7471_v35  ;;  %v2634_v35 = vadd.f32 %v9100_v9, %v8788_v58  ;;  %v7444_v25 = vpack.c.bf16 %v5919_v13, %v5918_v46  ;;  %v3534_v46 = vadd.f32 %v9100_v9, %v9148_v40 }
 0x745   :  { %7473 = vmatprep.subr.bf16.mxu1 %v10301_v45  ;;  %v1797_v58 = vmul.f32 0.2, %v1790_v10 }
 0x746   :  { %v2667_v36 = vmul.f32 %v2634_v35, %v8263_v33  ;;  %7445 = vmatpush3.bf16.msra.mxu0 %v7444_v25  ;;  %v7486_v35 = vpack.c.bf16 %v5858_v26, %v5857_v53  ;;  %v3559_v25 = vmul.f32 %v3534_v46, %v8263_v33 }
 0x747   :  { %7185 = vmatmul.mubr.msk.f32.gmra.mrb[226].mxu1 %vm509_vm2, %v1799_v7  ;;  %v1804_v20 = vmax.f32 %v1790_v10, %v1797_v58  ;;  %7452 = vmatprep.subr.bf16.mxu0 %v10301_v45 }
 0x748   :  { %7187 = vmatprep.mubr.msk.f32.mxu1 %vm7533_vm0, %v10300_v5  ;;  %7475 = vmatpush3.bf16.msra.mxu1 %v7474_v3  ;;  %v2674_v7 = vadd.f32 %v2667_v36, %v8270_v38  ;;  %v2668_v3 = vmul.f32 %v2639_v42, %v8263_v33  ;;  %v2659_v36 = vadd.f32 %v9100_v9, %v8825_v63 }
 0x749   :  { %7482 = vmatprep.subr.bf16.mxu1 %v10301_v45  ;;  %v2678_v42 = vadd.f32 %v2671_v50, %v8270_v38  ;;  %v3544_v50 = vadd.f32 %v9100_v9, %v9166_v2 }
 0x74a   :  { %v2681_v55 = vmul.f32 0.2, %v2674_v7  ;;  %v2675_v51 = vadd.f32 %v2668_v3, %v8270_v38  ;;  %v2664_v3 = vadd.f32 %v9100_v9, %v8833_v37 }
 0x74b   :  { %7188 = vmatmul.mubr.msk.f32.gmra.mrb[228].mxu1 %vm509_vm2, %v1800_v19  ;;  %v5855_v19 = vld [vmem:[%s10265_s6 + $0x180] sm:$0xff]  ;;  %v2685_v63 = vmul.f32 0.2, %v2678_v42 }
 0x74c   :  { %7190 = vmatprep.mubr.msk.f32.mxu1 %vm7533_vm0, %v10300_v5  ;;  %v7483_v14 = vpack.c.bf16 %v5856_v21, %v5855_v19  ;;  %v2688_v12 = vmax.f32 %v2674_v7, %v2681_v55  ;;  %v2682_v28 = vmul.f32 0.2, %v2675_v51  ;;  %v2672_v7 = vmul.f32 %v2659_v36, %v8263_v33 }
 0x74d   :  { %v2673_v55 = vmul.f32 %v2664_v3, %v8263_v33  ;;  %v2692_v57 = vmax.f32 %v2678_v42, %v2685_v63  ;;  %v3529_v21 = vadd.f32 %v9100_v9, %v9143_v54 }
 0x74e   :  { %v2689_v10 = vmax.f32 %v2675_v51, %v2682_v28  ;;  %v3524_v51 = vadd.f32 %v9100_v9, %v9137_v60  ;;  %v3539_v28 = vadd.f32 %v9100_v9, %v9156_v11 }
 0x74f   :  { %7191 = vmatmul.mubr.msk.f32.gmra.mrb[230].mxu1 %vm509_vm2, %v1801_v49  ;;  %v2670_v49 = vmul.f32 %v2649_v6, %v8263_v33  ;;  %v2680_v6 = vadd.f32 %v2673_v55, %v8270_v38 }
 0x750   :  { %7193 = vmatprep.mubr.msk.f32.mxu1 %vm7533_vm0, %v10300_v5  ;;  %v3557_v19 = vmul.f32 %v3524_v51, %v8263_v33  ;;  %v3560_v26 = vmul.f32 %v3539_v28, %v8263_v33 }
 0x751   :  { %v2677_v17 = vadd.f32 %v2670_v49, %v8270_v38  ;;  %v2687_v13 = vmul.f32 0.2, %v2680_v6 }
 0x752   :  { %v3564_v30 = vadd.f32 %v3557_v19, %v8270_v38 }
 0x753   :  { %7194 = vmatmul.mubr.msk.f32.gmra.mrb[232].mxu1 %vm509_vm2, %v1802_v61  ;;  %v2683_v61 = vmul.f32 0.2, %v2676_v27  ;;  %v2694_v54 = vmax.f32 %v2680_v6, %v2687_v13 }
 0x754   :  { %7196 = vmatprep.mubr.msk.f32.mxu1 %vm7533_vm0, %v10300_v5 }
 0x755   :  { %v2690_v58 = vmax.f32 %v2676_v27, %v2683_v61  ;;  %v3566_v27 = vadd.f32 %v3559_v25, %v8270_v38  ;;  %v3561_v61 = vmul.f32 %v3544_v50, %v8263_v33 }
 0x757   :  { %7197 = vmatmul.mubr.msk.f32.gmra.mrb[234].mxu1 %vm509_vm2, %v1803_v4  ;;  %v2684_v4 = vmul.f32 0.2, %v2677_v17  ;;  %v3568_v42 = vadd.f32 %v3561_v61, %v8270_v38  ;;  %v5640_v61 = vld [vmem:[%s10265_s6 + $0x40] sm:$0xff] }
 0x758   :  { %7199 = vmatprep.mubr.msk.f32.mxu1 %vm7533_vm0, %v10300_v5 }
 0x759   :  { %v2691_v0 = vmax.f32 %v2677_v17, %v2684_v4  ;;  %v3549_v17 = vadd.f32 %v9100_v9, %v9174_v34  ;;  %v3554_v4 = vadd.f32 %v9100_v9, %v9182_v24 }
 0x75b   :  { %7200 = vmatmul.mubr.msk.f32.gmra.mrb[236].mxu1 %vm509_vm2, %v1804_v20  ;;  %v2679_v20 = vadd.f32 %v2672_v7, %v8270_v38  ;;  %v3575_v7 = vmul.f32 0.2, %v3568_v42  ;;  %v3563_v63 = vmul.f32 %v3554_v4, %v8263_v33 }
 0x75c   :  { %7239 = vmatprep.mubr.msk.f32.mxu1 %vm7533_vm0, %v10300_v5 }
 0x75d   :  { %v2686_v37 = vmul.f32 0.2, %v2679_v20  ;;  %v3570_v24 = vadd.f32 %v3563_v63, %v8270_v38  ;;  %v5642_v63 = vld [vmem:[%s10265_s6 + $0x50] sm:$0xff] }
 0x75f   :  { %7240 = vmatmul.mubr.msk.f32.vlgmr.msra.gmra.mrb[238].mxu1 %vm509_vm2, %v2688_v12  ;;  %v2693_v60 = vmax.f32 %v2679_v20, %v2686_v37  ;;  %v3571_v12 = vmul.f32 0.2, %v3564_v30  ;;  %v3577_v51 = vmul.f32 0.2, %v3570_v24 }
 0x760   :  { %7242 = vmatprep.mubr.msk.f32.mxu1 %vm7533_vm0, %v10300_v5  ;;  %7484 = vmatpush3.bf16.msra.mxu1 %v7483_v14  ;;  %v3558_v14 = vmul.f32 %v3529_v21, %v8263_v33 }
 0x761   :  { %7485 = vmatprep.subr.bf16.mxu1 %v10301_v45  ;;  %v3578_v49 = vmax.f32 %v3564_v30, %v3571_v12 }
 0x762   :  { %v3565_v40 = vadd.f32 %v3558_v14, %v8270_v38 }
 0x763   :  { %7243 = vmatmul.mubr.msk.f32.gmra.mrb[240].mxu1 %vm509_vm2, %v2689_v10  ;;  %v3567_v10 = vadd.f32 %v3560_v26, %v8270_v38 }
 0x764   :  { %7245 = vmatprep.mubr.msk.f32.mxu1 %vm7533_vm0, %v10300_v5  ;;  %7487 = vmatpush3.bf16.msra.mxu1 %v7486_v35  ;;  %v3572_v53 = vmul.f32 0.2, %v3565_v40  ;;  %v3573_v35 = vmul.f32 0.2, %v3566_v27 }
 0x765   :  { %v3574_v2 = vmul.f32 0.2, %v3567_v10 }
 0x766   :  { %v3579_v11 = vmax.f32 %v3565_v40, %v3572_v53  ;;  %v3580_v36 = vmax.f32 %v3566_v27, %v3573_v35 }
 0x767   :  { %7246 = vmatmul.mubr.msk.f32.gmra.mrb[242].mxu1 %vm509_vm2, %v2690_v58  ;;  %v3562_v58 = vmul.f32 %v3549_v17, %v8263_v33  ;;  %v3581_v34 = vmax.f32 %v3567_v10, %v3574_v2  ;;  %v5641_v17 = vld [vmem:[%s10265_s6 + $0x48] sm:$0xff] }
 0x768   :  { %7248 = vmatprep.mubr.msk.f32.mxu1 %vm7533_vm0, %v10300_v5 }
 0x769   :  { %v3569_v3 = vadd.f32 %v3562_v58, %v8270_v38  ;;  %v7453_v58 = vpack.c.bf16 %v5641_v17, %v5640_v61 }
 0x76b   :  { %7249 = vmatmul.mubr.msk.f32.gmra.mrb[244].mxu1 %vm509_vm2, %v2691_v0  ;;  %v3582_v0 = vmax.f32 %v3568_v42, %v3575_v7  ;;  %v3576_v20 = vmul.f32 0.2, %v3569_v3 }
 0x76c   :  { %7251 = vmatprep.mubr.msk.f32.mxu1 %vm7533_vm0, %v10300_v5 }
 0x76d   :  { %v3583_v55 = vmax.f32 %v3569_v3, %v3576_v20 }
 0x76f   :  { %7252 = vmatmul.mubr.msk.f32.gmra.mrb[246].mxu1 %vm509_vm2, %v2692_v57  ;;  %v3584_v57 = vmax.f32 %v3570_v24, %v3577_v51 }
 0x770   :  { %7254 = vmatprep.mubr.msk.f32.mxu1 %vm7533_vm0, %v10300_v5 }
 0x773   :  { %7255 = vmatmul.mubr.msk.f32.gmra.mrb[248].mxu1 %vm509_vm2, %v2693_v60 }
 0x774   :  { %7257 = vmatprep.mubr.msk.f32.mxu1 %vm7533_vm0, %v10300_v5 }
 0x777   :  { %7258 = vmatmul.mubr.msk.f32.gmra.mrb[250].mxu1 %vm509_vm2, %v2694_v54 }
 0x778   :  { %7297 = vmatprep.mubr.msk.f32.mxu1 %vm7533_vm0, %v10300_v5 }
 0x77b   :  { %7298 = vmatmul.mubr.msk.f32.vlgmr.msra.gmra.mrb[252].mxu1 %vm509_vm2, %v3578_v49 }
 0x77c   :  { %7300 = vmatprep.mubr.msk.f32.mxu1 %vm7533_vm0, %v10300_v5 }
 0x77f   :  { %7301 = vmatmul.mubr.msk.f32.gmra.mrb[254].mxu1 %vm509_vm2, %v3579_v11 }
 0x780   :  { %7303 = vmatprep.mubr.msk.f32.mxu1 %vm7533_vm0, %v10300_v5 }
 0x783   :  { %7304 = vmatmul.mubr.msk.f32.gmra.mrb[0].mxu1 %vm509_vm2, %v3580_v36 }
 0x784   :  { %7306 = vmatprep.mubr.msk.f32.mxu1 %vm7533_vm0, %v10300_v5 }
 0x787   :  { %7307 = vmatmul.mubr.msk.f32.gmra.mrb[2].mxu1 %vm509_vm2, %v3581_v34 }
 0x788   :  { %7309 = vmatprep.mubr.msk.f32.mxu1 %vm7533_vm0, %v10300_v5 }
 0x78b   :  { %7310 = vmatmul.mubr.msk.f32.gmra.mrb[4].mxu1 %vm509_vm2, %v3582_v0  ;;  %v5643_v0 = vld [vmem:[%s10265_s6 + $0x58] sm:$0xff] }
 0x78c   :  { %7312 = vmatprep.mubr.msk.f32.mxu1 %vm7533_vm0, %v10300_v5  ;;  %v7456_v51 = vpack.c.bf16 %v5643_v0, %v5642_v63 }
 0x78f   :  { %7313 = vmatmul.mubr.msk.f32.gmra.mrb[6].mxu1 %vm509_vm2, %v3583_v55 }
 0x790   :  { %7315 = vmatprep.mubr.msk.f32.mxu1 %vm7533_vm0, %v10300_v5 }
 0x793   :  { %7316 = vmatmul.mubr.msk.f32.gmra.mrb[8].mxu1 %vm509_vm2, %v3584_v57 }
 0x7c2   :  { %v9637_v37 = vpop.f32.mrb[182].mxu1 }
 0x7c3   :  { %v7017_v6 = vpop.f32.mrb[183].mxu1 }
 0x7c6   :  { %v9639_v19 = vpop.f32.mrb[184].mxu1 }
 0x7c7   :  { %v7020_v21 = vpop.f32.mrb[185].mxu1 }
 0x7ca   :  { %v9641_v46 = vpop.f32.mrb[186].mxu1 }
 0x7cb   :  { %v7023_v60 = vpop.f32.mrb[187].mxu1 }
 0x7ce   :  { %v9643_v13 = vpop.f32.mrb[188].mxu1 }
 0x7cf   :  { %v7026_v30 = vpop.f32.mrb[189].mxu1 }
 0x7d2   :  { %v9645_v14 = vpop.f32.mrb[190].mxu1 }
 0x7d3   :  { %v7029_v25 = vpop.f32.mrb[191].mxu1 }
 0x7d6   :  { %v9647_v54 = vpop.f32.mrb[192].mxu1 }
 0x7d7   :  { %v7032_v12 = vpop.f32.mrb[193].mxu1 }
 0x7da   :  { %v9649_v40 = vpop.f32.mrb[194].mxu1 }
 0x7db   :  { %v7035_v28 = vpop.f32.mrb[195].mxu1 }
 0x7de   :  { %v4130_v27 = vpop.f32.mrb[196].mxu1 }
 0x7df   :  { %v4131_v49 = vadd.f32 %v9100_v9, %v4130_v27  ;;  %v7067_v53 = vpop.f32.mrb[197].mxu1 }
 0x7e1   :  { %v4164_v26 = vmul.f32 %v4131_v49, %v8263_v33 }
 0x7e2   :  { %v4135_v50 = vpop.f32.mrb[198].mxu1 }
 0x7e3   :  { %v4171_v35 = vadd.f32 %v4164_v26, %v8270_v38  ;;  %v4136_v11 = vadd.f32 %v9100_v9, %v4135_v50  ;;  %v7070_v10 = vpop.f32.mrb[199].mxu1  ;;  %v9666_v9 = vld [vmem:[%s10262_s3] ss:$0 sm:$0xff] }
 0x7e5   :  { %v4178_v36 = vmul.f32 0.2, %v4171_v35  ;;  %v4165_v2 = vmul.f32 %v4136_v11, %v8263_v33 }
 0x7e6   :  { %v4140_v42 = vpop.f32.mrb[200].mxu1 }
 0x7e7   :  { %v4185_v4 = vmax.f32 %v4171_v35, %v4178_v36  ;;  %v4172_v34 = vadd.f32 %v4165_v2, %v8270_v38  ;;  %v4141_v7 = vadd.f32 %v9666_v9, %v4140_v42  ;;  %v7073_v3 = vpop.f32.mrb[201].mxu1  ;;  %v1299_v35 = vadd.f32 %v9666_v9, %v8441_v8 }
 0x7e8   :  { %v1304_v8 = vadd.f32 %v9666_v9, %v8443_v39 }
 0x7e9   :  { %v4179_v20 = vmul.f32 0.2, %v4172_v34  ;;  %v4166_v24 = vmul.f32 %v4141_v7, %v8263_v33  ;;  %7095 = vmatmul.mubr.msk.f32.vlgmr.msra.gmra.mrb[198].mxu0 %vm509_vm2, %v4185_v4 }
 0x7ea   :  { %7454 = vmatpush3.bf16.msra.mxu0 %v7453_v58  ;;  %v4145_v55 = vpop.f32.mrb[202].mxu1  ;;  %7097 = vmatprep.mubr.msk.f32.mxu0 %vm7533_vm0, %v10300_v5  ;;  %v1332_v58 = vmul.f32 %v1299_v35, %v8263_v33  ;;  %v1333_v39 = vmul.f32 %v1304_v8, %v8263_v33 }
 0x7eb   :  { %v4186_v57 = vmax.f32 %v4172_v34, %v4179_v20  ;;  %v4173_v6 = vadd.f32 %v4166_v24, %v8270_v38  ;;  %v4146_v21 = vadd.f32 %v9666_v9, %v4145_v55  ;;  %v7076_v60 = vpop.f32.mrb[203].mxu1  ;;  %7455 = vmatprep.subr.bf16.mxu0 %v10301_v45  ;;  %v1309_v55 = vadd.f32 %v9666_v9, %v8445_v43 }
 0x7ec   :  { %v1339_v24 = vadd.f32 %v1332_v58, %v8270_v38  ;;  %v1314_v43 = vadd.f32 %v9666_v9, %v8447_v47  ;;  %v5727_v47 = vld [vmem:[%s10265_s6 + $0xc8] sm:$0xff]  ;;  %v5729_v58 = vld [vmem:[%s10265_s6 + $0xd8] sm:$0xff] }
 0x7ed   :  { %v4180_v30 = vmul.f32 0.2, %v4173_v6  ;;  %v4167_v25 = vmul.f32 %v4146_v21, %v8263_v33  ;;  %7098 = vmatmul.mubr.msk.f32.gmra.mrb[200].mxu0 %vm509_vm2, %v4186_v57 }
 0x7ee   :  { %v4150_v12 = vpop.f32.mrb[204].mxu1  ;;  %7100 = vmatprep.mubr.msk.f32.mxu0 %vm7533_vm0, %v10300_v5  ;;  %7457 = vmatpush3.bf16.msra.mxu0 %v7456_v51  ;;  %v1335_v35 = vmul.f32 %v1314_v43, %v8263_v33 }
 0x7ef   :  { %v4187_v28 = vmax.f32 %v4173_v6, %v4180_v30  ;;  %v4174_v27 = vadd.f32 %v4167_v25, %v8270_v38  ;;  %v4151_v49 = vadd.f32 %v9666_v9, %v4150_v12  ;;  %v7079_v53 = vpop.f32.mrb[205].mxu1  ;;  %7464 = vmatprep.subr.bf16.mxu0 %v10301_v45  ;;  %v1334_v25 = vmul.f32 %v1309_v55, %v8263_v33 }
 0x7f0   :  { %v1342_v8 = vadd.f32 %v1335_v35, %v8270_v38 }
 0x7f1   :  { %v4181_v26 = vmul.f32 0.2, %v4174_v27  ;;  %v4168_v50 = vmul.f32 %v4151_v49, %v8263_v33  ;;  %7101 = vmatmul.mubr.msk.f32.gmra.mrb[202].mxu0 %vm509_vm2, %v4187_v28  ;;  %v1346_v28 = vmul.f32 0.2, %v1339_v24 }
 0x7f2   :  { %v4155_v11 = vpop.f32.mrb[206].mxu1  ;;  %7103 = vmatprep.mubr.msk.f32.mxu0 %vm7533_vm0, %v10300_v5 }
 0x7f3   :  { %v4188_v10 = vmax.f32 %v4174_v27, %v4181_v26  ;;  %v4175_v61 = vadd.f32 %v4168_v50, %v8270_v38  ;;  %v4156_v17 = vadd.f32 %v9666_v9, %v4155_v11  ;;  %v7082_v36 = vpop.f32.mrb[207].mxu1  ;;  %v1340_v27 = vadd.f32 %v1333_v39, %v8270_v38  ;;  %v5726_v26 = vld [vmem:[%s10265_s6 + $0xc0] sm:$0xff] }
 0x7f4   :  { %v1341_v50 = vadd.f32 %v1334_v25, %v8270_v38 }
 0x7f5   :  { %v4182_v2 = vmul.f32 0.2, %v4175_v61  ;;  %v4169_v42 = vmul.f32 %v4156_v17, %v8263_v33  ;;  %7104 = vmatmul.mubr.msk.f32.gmra.mrb[204].mxu0 %vm509_vm2, %v4188_v10  ;;  %v1353_v10 = vmax.f32 %v1339_v24, %v1346_v28  ;;  %v1319_v17 = vadd.f32 %v9666_v9, %v8449_v48 }
 0x7f6   :  { %v4160_v4 = vpop.f32.mrb[208].mxu1  ;;  %7106 = vmatprep.mubr.msk.f32.mxu0 %vm7533_vm0, %v10300_v5  ;;  %v1349_v24 = vmul.f32 0.2, %v1342_v8 }
 0x7f7   :  { %v4189_v34 = vmax.f32 %v4175_v61, %v4182_v2  ;;  %v4176_v7 = vadd.f32 %v4169_v42, %v8270_v38  ;;  %v4161_v3 = vadd.f32 %v9666_v9, %v4160_v4  ;;  %v7085_v63 = vpop.f32.mrb[209].mxu1  ;;  %v1347_v61 = vmul.f32 0.2, %v1340_v27  ;;  %v5728_v42 = vld [vmem:[%s10265_s6 + $0xd0] sm:$0xff] }
 0x7f8   :  { %v1348_v4 = vmul.f32 0.2, %v1341_v50 }
 0x7f9   :  { %v4183_v0 = vmul.f32 0.2, %v4176_v7  ;;  %v4170_v20 = vmul.f32 %v4161_v3, %v8263_v33  ;;  %7107 = vmatmul.mubr.msk.f32.gmra.mrb[206].mxu0 %vm509_vm2, %v4189_v34  ;;  %v1354_v48 = vmax.f32 %v1340_v27, %v1347_v61  ;;  %v1324_v3 = vadd.f32 %v9666_v9, %v8451_v52  ;;  %v10333_v61 = vld [vmem:[#allocation20_spill] sm:$0xff] }
 0x7fa   :  { %v4405_v51 = vpop.f32.mrb[210].mxu1  ;;  %7109 = vmatprep.mubr.msk.f32.mxu0 %vm7533_vm0, %v10300_v5 }
 0x7fb   :  { %v4190_v57 = vmax.f32 %v4176_v7, %v4183_v0  ;;  %v4177_v6 = vadd.f32 %v4170_v20, %v8270_v38  ;;  %v9716_v21 = vadd.f32 %v4405_v51, %v8427_v41  ;;  %v7125_v60 = vpop.f32.mrb[211].mxu1  ;;  %v1336_v7 = vmul.f32 %v1319_v17, %v8263_v33 }
 0x7fc   :  { %v1355_v20 = vmax.f32 %v1341_v50, %v1348_v4  ;;  %v1337_v39 = vmul.f32 %v1324_v3, %v8263_v33  ;;  %v10332_v50 = vld [vmem:[#allocation6_spill] sm:$0xff]  ;;  %v10336_v3 = vld [vmem:[#allocation21_spill] sm:$0xff] }
 0x7fd   :  { %v4184_v30 = vmul.f32 0.2, %v4177_v6  ;;  %7110 = vmatmul.mubr.msk.f32.gmra.mrb[208].mxu0 %vm509_vm2, %v4190_v57  ;;  %v1343_v51 = vadd.f32 %v1336_v7, %v8270_v38  ;;  %v2194_v35 = vadd.f32 %v9666_v9, %v10332_v50 }
 0x7fe   :  { %v4410_v12 = vpop.f32.mrb[212].mxu1  ;;  %7112 = vmatprep.mubr.msk.f32.mxu0 %vm7533_vm0, %v10300_v5  ;;  %v1344_v25 = vadd.f32 %v1337_v39, %v8270_v38 }
 0x7ff   :  { %v4191_v49 = vmax.f32 %v4177_v6, %v4184_v30  ;;  %v9726_v41 = vadd.f32 %v4410_v12, %v8429_v16  ;;  %v7128_v53 = vpop.f32.mrb[213].mxu1  ;;  %v7465_v16 = vpack.c.bf16 %v5727_v47, %v5726_v26  ;;  %v1356_v6 = vmax.f32 %v1342_v8, %v1349_v24  ;;  %v5812_v24 = vld [vmem:[%s10265_s6 + $0x140] sm:$0xff] }
 0x800   :  { %v1350_v30 = vmul.f32 0.2, %v1343_v51  ;;  %v2189_v12 = vadd.f32 %v9666_v9, %v8248_v15 }
 0x801   :  { %7113 = vmatmul.mubr.msk.f32.gmra.mrb[210].mxu0 %vm509_vm2, %v4191_v49  ;;  %v1351_v49 = vmul.f32 0.2, %v1344_v25 }
 0x802   :  { %v4415_v11 = vpop.f32.mrb[214].mxu1  ;;  %7152 = vmatprep.mubr.msk.f32.mxu0 %vm7533_vm0, %v10300_v5  ;;  %v1357_v27 = vmax.f32 %v1343_v51, %v1350_v30 }
 0x803   :  { %v9742_v36 = vadd.f32 %v4415_v11, %v8431_v18  ;;  %v7131_v2 = vpop.f32.mrb[215].mxu1  ;;  %v7468_v18 = vpack.c.bf16 %v5729_v58, %v5728_v42  ;;  %v10334_v42 = vld [vmem:[#allocation8_spill] sm:$0xff] }
 0x804   :  { %v2223_v2 = vmul.f32 %v2194_v35, %v8263_v33  ;;  %v2199_v58 = vadd.f32 %v9666_v9, %v10334_v42  ;;  %v10341_v42 = vld [vmem:[#allocation12_spill] sm:$0xff] }
 0x805   :  { %7153 = vmatmul.mubr.msk.f32.vlgmr.msra.gmra.mrb[212].mxu0 %vm509_vm2, %v1353_v10 }
 0x806   :  { %7466 = vmatpush3.bf16.msra.mxu0 %v7465_v16  ;;  %v4420_v34 = vpop.f32.mrb[216].mxu1  ;;  %7155 = vmatprep.mubr.msk.f32.mxu0 %vm7533_vm0, %v10300_v5  ;;  %v1358_v16 = vmax.f32 %v1344_v25, %v1351_v49  ;;  %v2224_v51 = vmul.f32 %v2199_v58, %v8263_v33  ;;  %v5815_v49 = vld [vmem:[%s10265_s6 + $0x158] sm:$0xff]  ;;  %v2219_v58 = vadd.f32 %v9666_v9, %v10341_v42 }
 0x807   :  { %v9758_v63 = vadd.f32 %v4420_v34, %v8433_v22  ;;  %v7134_v0 = vpop.f32.mrb[217].mxu1  ;;  %7467 = vmatprep.subr.bf16.mxu0 %v10301_v45  ;;  %v1329_v22 = vadd.f32 %v9666_v9, %v8453_v56  ;;  %v2230_v34 = vadd.f32 %v2223_v2, %v8270_v38  ;;  %v10348_v42 = vld [vmem:[#allocation41_spill] sm:$0xff] }
 0x808   :  { %v2231_v25 = vadd.f32 %v2224_v51, %v8270_v38 }
 0x809   :  { %7156 = vmatmul.mubr.msk.f32.gmra.mrb[214].mxu0 %vm509_vm2, %v1354_v48  ;;  %v1338_v43 = vmul.f32 %v1329_v22, %v8263_v33  ;;  %v10337_v22 = vld [vmem:[#allocation10_spill] sm:$0xff]  ;;  %v2237_v30 = vmul.f32 0.2, %v2230_v34 }
 0x80a   :  { %v4425_v55 = vpop.f32.mrb[218].mxu1  ;;  %7158 = vmatprep.mubr.msk.f32.mxu0 %vm7533_vm0, %v10300_v5  ;;  %7469 = vmatpush3.bf16.msra.mxu0 %v7468_v18  ;;  %v10335_v18 = vld [vmem:[#allocation9_spill] sm:$0xff] }
 0x80b   :  { %v9769_v52 = vadd.f32 %v4425_v55, %v8435_v23  ;;  %v7137_v57 = vpop.f32.mrb[219].mxu1  ;;  %7476 = vmatprep.subr.bf16.mxu0 %v10301_v45  ;;  %v1345_v53 = vadd.f32 %v1338_v43, %v8270_v38  ;;  %v2204_v48 = vadd.f32 %v9666_v9, %v10335_v18  ;;  %v5813_v55 = vld [vmem:[%s10265_s6 + $0x148] sm:$0xff] }
 0x80c   :  { %v2209_v57 = vadd.f32 %v9666_v9, %v10337_v22 }
 0x80d   :  { %7159 = vmatmul.mubr.msk.f32.gmra.mrb[216].mxu0 %vm509_vm2, %v1355_v20  ;;  %v1352_v10 = vmul.f32 0.2, %v1345_v53  ;;  %v2225_v43 = vmul.f32 %v2204_v48, %v8263_v33  ;;  %v10342_v48 = vld [vmem:[#allocation24_spill] sm:$0xff] }
 0x80e   :  { %v4430_v60 = vpop.f32.mrb[220].mxu1  ;;  %7161 = vmatprep.mubr.msk.f32.mxu0 %vm7533_vm0, %v10300_v5 }
 0x80f   :  { %v9778_v56 = vadd.f32 %v4430_v60, %v8437_v29  ;;  %v7140_v23 = vpop.f32.mrb[221].mxu1  ;;  %v2222_v29 = vmul.f32 %v2189_v12, %v8263_v33  ;;  %v1359_v7 = vmax.f32 %v1345_v53, %v1352_v10  ;;  %v7477_v60 = vpack.c.bf16 %v5813_v55, %v5812_v24  ;;  %v10340_v10 = vld [vmem:[#allocation23_spill] sm:$0xff]  ;;  %v10343_v24 = vld [vmem:[#allocation34_spill] sm:$0xff] }
 0x810   :  { %v10338_v23 = vld [vmem:[#allocation22_spill] sm:$0xff]  ;;  %v2226_v53 = vmul.f32 %v2209_v57, %v8263_v33  ;;  %v3079_v55 = vadd.f32 %v9666_v9, %v10343_v24 }
 0x811   :  { %7162 = vmatmul.mubr.msk.f32.gmra.mrb[218].mxu0 %vm509_vm2, %v1356_v6  ;;  %v2229_v15 = vadd.f32 %v2222_v29, %v8270_v38 }
 0x812   :  { %v4435_v28 = vpop.f32.mrb[222].mxu1  ;;  %7164 = vmatprep.mubr.msk.f32.mxu0 %vm7533_vm0, %v10300_v5  ;;  %v2233_v18 = vadd.f32 %v2226_v53, %v8270_v38 }
 0x813   :  { %v9787_v26 = vadd.f32 %v4435_v28, %v8439_v31  ;;  %v7143_v47 = vpop.f32.mrb[223].mxu1  ;;  %v2236_v4 = vmul.f32 0.2, %v2229_v15 }
 0x814   :  { %v10339_v47 = vld [vmem:[#allocation11_spill] sm:$0xff]  ;;  %v2240_v22 = vmul.f32 0.2, %v2233_v18 }
 0x815   :  { %7165 = vmatmul.mubr.msk.f32.gmra.mrb[220].mxu0 %vm509_vm2, %v1357_v27  ;;  %v2243_v39 = vmax.f32 %v2229_v15, %v2236_v4  ;;  %v5814_v27 = vld [vmem:[%s10265_s6 + $0x150] sm:$0xff]  ;;  %v2214_v29 = vadd.f32 %v9666_v9, %v10339_v47  ;;  %v2244_v15 = vmax.f32 %v2230_v34, %v2237_v30  ;;  %v10346_v47 = vld [vmem:[#allocation26_spill] sm:$0xff] }
 0x816   :  { %v4647_v11 = vpop.f32.mrb[224].mxu1  ;;  %7167 = vmatprep.mubr.msk.f32.mxu0 %vm7533_vm0, %v10300_v5  ;;  %v7480_v35 = vpack.c.bf16 %v5815_v49, %v5814_v27  ;;  %v10345_v49 = vld [vmem:[#allocation35_spill] sm:$0xff] }
 0x817   :  { %v9797_v17 = vadd.f32 %v4647_v11, %v10333_v61  ;;  %v7183_v31 = vpop.f32.mrb[225].mxu1  ;;  %v2238_v11 = vmul.f32 0.2, %v2231_v25  ;;  %v2227_v2 = vmul.f32 %v2214_v29, %v8263_v33  ;;  %v3084_v53 = vadd.f32 %v9666_v9, %v10345_v49 }
 0x819   :  { %7168 = vmatmul.mubr.msk.f32.gmra.mrb[222].mxu0 %vm509_vm2, %v1358_v16  ;;  %v2232_v16 = vadd.f32 %v2225_v43, %v8270_v38  ;;  %v2234_v57 = vadd.f32 %v2227_v2, %v8270_v38  ;;  %v3112_v43 = vmul.f32 %v3079_v55, %v8263_v33  ;;  %v10350_v55 = vld [vmem:[#allocation42_spill] sm:$0xff] }
 0x81a   :  { %v4652_v8 = vpop.f32.mrb[226].mxu1  ;;  %7170 = vmatprep.mubr.msk.f32.mxu0 %vm7533_vm0, %v10300_v5 }
 0x81b   :  { %v9809_v0 = vadd.f32 %v4652_v8, %v10336_v3  ;;  %v7186_v20 = vpop.f32.mrb[227].mxu1  ;;  %v2245_v8 = vmax.f32 %v2231_v25, %v2238_v11  ;;  %v2239_v34 = vmul.f32 0.2, %v2232_v16  ;;  %v2241_v27 = vmul.f32 0.2, %v2234_v57 }
 0x81c   :  { %v2228_v20 = vmul.f32 %v2219_v58, %v8263_v33 }
 0x81d   :  { %7171 = vmatmul.mubr.msk.f32.gmra.mrb[224].mxu0 %vm509_vm2, %v1359_v7 }
 0x81e   :  { %v4657_v6 = vpop.f32.mrb[228].mxu1  ;;  %7210 = vmatprep.mubr.msk.f32.mxu0 %vm7533_vm0, %v10300_v5  ;;  %v2235_v25 = vadd.f32 %v2228_v20, %v8270_v38  ;;  %v10349_v20 = vld [vmem:[#allocation37_spill] sm:$0xff] }
 0x81f   :  { %v9826_v12 = vadd.f32 %v4657_v6, %v10338_v23  ;;  %v7189_v28 = vpop.f32.mrb[229].mxu1  ;;  %v10344_v6 = vld [vmem:[#allocation25_spill] sm:$0xff]  ;;  %v3094_v24 = vadd.f32 %v9666_v9, %v10349_v20 }
 0x820   :  { %v2247_v28 = vmax.f32 %v2233_v18, %v2240_v22  ;;  %v5898_v22 = vld [vmem:[%s10265_s6 + $0x1c0] sm:$0xff] }
 0x821   :  { %7211 = vmatmul.mubr.msk.f32.vlgmr.msra.gmra.mrb[226].mxu0 %vm509_vm2, %v2243_v39  ;;  %v2246_v39 = vmax.f32 %v2232_v16, %v2239_v34  ;;  %v2248_v16 = vmax.f32 %v2234_v57, %v2241_v27  ;;  %v5899_v57 = vld [vmem:[%s10265_s6 + $0x1c8] sm:$0xff]  ;;  %v3115_v49 = vmul.f32 %v3094_v24, %v8263_v33 }
 0x822   :  { %7478 = vmatpush3.bf16.msra.mxu0 %v7477_v60  ;;  %v4662_v50 = vpop.f32.mrb[230].mxu1  ;;  %7213 = vmatprep.mubr.msk.f32.mxu0 %vm7533_vm0, %v10300_v5 }
 0x823   :  { %v9842_v61 = vadd.f32 %v4662_v50, %v10340_v10  ;;  %v7192_v31 = vpop.f32.mrb[231].mxu1  ;;  %7479 = vmatprep.subr.bf16.mxu0 %v10301_v45  ;;  %v3113_v10 = vmul.f32 %v3084_v53, %v8263_v33  ;;  %v10352_v53 = vld [vmem:[#allocation43_spill] sm:$0xff] }
 0x824   :  { %v10347_v31 = vld [vmem:[#allocation36_spill] sm:$0xff] }
 0x825   :  { %7214 = vmatmul.mubr.msk.f32.gmra.mrb[228].mxu0 %vm509_vm2, %v2244_v15  ;;  %v3119_v15 = vadd.f32 %v3112_v43, %v8270_v38  ;;  %v3089_v2 = vadd.f32 %v9666_v9, %v10347_v31 }
 0x826   :  { %v4667_v4 = vpop.f32.mrb[232].mxu1  ;;  %7216 = vmatprep.mubr.msk.f32.mxu0 %vm7533_vm0, %v10300_v5  ;;  %7481 = vmatpush3.bf16.msra.mxu0 %v7480_v35  ;;  %v2242_v35 = vmul.f32 0.2, %v2235_v25 }
 0x827   :  { %v9853_v7 = vadd.f32 %v4667_v4, %v10342_v48  ;;  %v7195_v3 = vpop.f32.mrb[233].mxu1  ;;  %7488 = vmatprep.subr.bf16.mxu0 %v10301_v45  ;;  %v3126_v34 = vmul.f32 0.2, %v3119_v15  ;;  %v3120_v48 = vadd.f32 %v3113_v10, %v8270_v38 }
 0x828   :  { %v3114_v3 = vmul.f32 %v3089_v2, %v8263_v33 }
 0x829   :  { %7217 = vmatmul.mubr.msk.f32.gmra.mrb[230].mxu0 %vm509_vm2, %v2245_v8  ;;  %v2249_v8 = vmax.f32 %v2235_v25, %v2242_v35  ;;  %v5900_v35 = vld [vmem:[%s10265_s6 + $0x1d0] sm:$0xff] }
 0x82a   :  { %v4672_v51 = vpop.f32.mrb[234].mxu1  ;;  %7219 = vmatprep.mubr.msk.f32.mxu0 %vm7533_vm0, %v10300_v5  ;;  %v3121_v27 = vadd.f32 %v3114_v3, %v8270_v38 }
 0x82b   :  { %v9864_v60 = vadd.f32 %v4672_v51, %v10344_v6  ;;  %v7198_v30 = vpop.f32.mrb[235].mxu1  ;;  %v3133_v6 = vmax.f32 %v3119_v15, %v3126_v34  ;;  %v5901_v15 = vld [vmem:[%s10265_s6 + $0x1d8] sm:$0xff] }
 0x82c   :  { %v10351_v30 = vld [vmem:[#allocation38_spill] sm:$0xff]  ;;  %v7492_v2 = vpack.c.bf16 %v5901_v15, %v5900_v35  ;;  %v10354_v34 = vld [vmem:[#allocation44_spill] sm:$0xff] }
 0x82d   :  { %7220 = vmatmul.mubr.msk.f32.gmra.mrb[232].mxu0 %vm509_vm2, %v2246_v39  ;;  %v3099_v25 = vadd.f32 %v9666_v9, %v10351_v30 }
 0x82e   :  { %v4677_v23 = vpop.f32.mrb[236].mxu1  ;;  %7222 = vmatprep.mubr.msk.f32.mxu0 %vm7533_vm0, %v10300_v5 }
 0x82f   :  { %v9874_v29 = vadd.f32 %v4677_v23, %v10346_v47  ;;  %v7201_v50 = vpop.f32.mrb[237].mxu1  ;;  %v7489_v23 = vpack.c.bf16 %v5899_v57, %v5898_v22  ;;  %v10355_v22 = vld [vmem:[#allocation40_spill] sm:$0xff] }
 0x830   :  { %v3109_v57 = vadd.f32 %v9666_v9, %v10355_v22 }
 0x831   :  { %7223 = vmatmul.mubr.msk.f32.gmra.mrb[234].mxu0 %vm509_vm2, %v2247_v28  ;;  %v3127_v28 = vmul.f32 0.2, %v3120_v48 }
 0x832   :  { %v4889_v11 = vpop.f32.mrb[238].mxu1  ;;  %7225 = vmatprep.mubr.msk.f32.mxu0 %vm7533_vm0, %v10300_v5 }
 0x833   :  { %v9884_v58 = vadd.f32 %v4889_v11, %v10348_v42  ;;  %v7241_v4 = vpop.f32.mrb[239].mxu1  ;;  %v3116_v11 = vmul.f32 %v3099_v25, %v8263_v33  ;;  %v3134_v42 = vmax.f32 %v3120_v48, %v3127_v28 }
 0x834   :  { %v3128_v4 = vmul.f32 0.2, %v3121_v27 }
 0x835   :  { %7226 = vmatmul.mubr.msk.f32.gmra.mrb[236].mxu0 %vm509_vm2, %v2248_v16  ;;  %v10353_v16 = vld [vmem:[#allocation39_spill] sm:$0xff]  ;;  %v3123_v20 = vadd.f32 %v3116_v11, %v8270_v38 }
 0x836   :  { %v4894_v18 = vpop.f32.mrb[240].mxu1  ;;  %7228 = vmatprep.mubr.msk.f32.mxu0 %vm7533_vm0, %v10300_v5  ;;  %v3104_v10 = vadd.f32 %v9666_v9, %v10353_v16  ;;  %v3135_v48 = vmax.f32 %v3121_v27, %v3128_v4  ;;  %v3118_v27 = vmul.f32 %v3109_v57, %v8263_v33 }
 0x837   :  { %v9894_v51 = vadd.f32 %v4894_v18, %v10350_v55  ;;  %v7244_v39 = vpop.f32.mrb[241].mxu1  ;;  %v3130_v25 = vmul.f32 0.2, %v3123_v20 }
 0x838   :  { %v3117_v24 = vmul.f32 %v3104_v10, %v8263_v33  ;;  %v3125_v10 = vadd.f32 %v3118_v27, %v8270_v38 }
 0x839   :  { %7229 = vmatmul.mubr.msk.f32.gmra.mrb[238].mxu0 %vm509_vm2, %v2249_v8  ;;  %v3122_v8 = vadd.f32 %v3115_v49, %v8270_v38  ;;  %v3969_v49 = vadd.f32 %v9666_v9, %v9309_v59  ;;  %v3137_v15 = vmax.f32 %v3123_v20, %v3130_v25  ;;  %v10358_v59 = vld [vmem:[#allocation47_spill] sm:$0xff] }
 0x83a   :  { %v4899_v43 = vpop.f32.mrb[242].mxu1  ;;  %7268 = vmatprep.mubr.msk.f32.mxu0 %vm7533_vm0, %v10300_v5  ;;  %v3132_v20 = vmul.f32 0.2, %v3125_v10 }
 0x83b   :  { %v9910_v47 = vadd.f32 %v4899_v43, %v10352_v53  ;;  %v7247_v50 = vpop.f32.mrb[243].mxu1  ;;  %v3129_v39 = vmul.f32 0.2, %v3122_v8  ;;  %v3124_v43 = vadd.f32 %v3117_v24, %v8270_v38  ;;  %v10357_v53 = vld [vmem:[#allocation46_spill] sm:$0xff] }
 0x83c   :  { %v3139_v57 = vmax.f32 %v3125_v10, %v3132_v20  ;;  %v10360_v20 = vld [vmem:[#allocation56_spill] sm:$0xff] }
 0x83d   :  { %7269 = vmatmul.mubr.msk.f32.vlgmr.msra.gmra.mrb[240].mxu0 %vm509_vm2, %v3133_v6  ;;  %v10356_v6 = vld [vmem:[#allocation45_spill] sm:$0xff]  ;;  %v3136_v28 = vmax.f32 %v3122_v8, %v3129_v39  ;;  %v3131_v11 = vmul.f32 0.2, %v3124_v43 }
 0x83e   :  { %7490 = vmatpush3.bf16.msra.mxu0 %v7489_v23  ;;  %v4904_v31 = vpop.f32.mrb[244].mxu1  ;;  %7271 = vmatprep.mubr.msk.f32.mxu0 %vm7533_vm0, %v10300_v5 }
 0x83f   :  { %v9926_v18 = vadd.f32 %v4904_v31, %v10354_v34  ;;  %v7250_v3 = vpop.f32.mrb[245].mxu1  ;;  %7491 = vmatprep.subr.bf16.mxu0 %v10301_v45  ;;  %v4002_v31 = vmul.f32 %v3969_v49, %v8263_v33  ;;  %v3138_v8 = vmax.f32 %v3124_v43, %v3131_v11  ;;  %v3979_v34 = vadd.f32 %v9666_v9, %v9326_v1 }
 0x840   :  { %v3984_v1 = vadd.f32 %v9666_v9, %v9340_v62  ;;  %v3989_v49 = vadd.f32 %v9666_v9, %v9349_v32 }
 0x841   :  { %7272 = vmatmul.mubr.msk.f32.gmra.mrb[242].mxu0 %vm509_vm2, %v3134_v42  ;;  %v4009_v24 = vadd.f32 %v4002_v31, %v8270_v38  ;;  %v4004_v39 = vmul.f32 %v3979_v34, %v8263_v33  ;;  %v10359_v31 = vld [vmem:[#allocation55_spill] sm:$0xff] }
 0x842   :  { %v4909_v55 = vpop.f32.mrb[246].mxu1  ;;  %7274 = vmatprep.mubr.msk.f32.mxu0 %vm7533_vm0, %v10300_v5  ;;  %7493 = vmatpush3.bf16.msra.mxu0 %v7492_v2  ;;  %v3974_v2 = vadd.f32 %v9666_v9, %v9315_v44  ;;  %v4006_v10 = vmul.f32 %v3989_v49, %v8263_v33 }
 0x843   :  { %v9937_v30 = vadd.f32 %v4909_v55, %v10356_v6  ;;  %v7253_v45 = vpop.f32.mrb[247].mxu1  ;;  %v4016_v6 = vmul.f32 0.2, %v4009_v24  ;;  %v4011_v43 = vadd.f32 %v4004_v39, %v8270_v38 }
 0x844   :  { %v4003_v55 = vmul.f32 %v3974_v2, %v8263_v33  ;;  %v3994_v2 = vadd.f32 %v9666_v9, %v10359_v31  ;;  %v4013_v34 = vadd.f32 %v4006_v10, %v8270_v38 }
 0x845   :  { %7275 = vmatmul.mubr.msk.f32.gmra.mrb[244].mxu0 %vm509_vm2, %v3135_v48  ;;  %v4023_v62 = vmax.f32 %v4009_v24, %v4016_v6  ;;  %v3999_v24 = vadd.f32 %v9666_v9, %v10360_v20 }
 0x846   :  { %v4914_v23 = vpop.f32.mrb[248].mxu1  ;;  %7277 = vmatprep.mubr.msk.f32.mxu0 %vm7533_vm0, %v10300_v5  ;;  %v4010_v45 = vadd.f32 %v4003_v55, %v8270_v38 }
 0x847   :  { %v9947_v50 = vadd.f32 %v4914_v23, %v10357_v53  ;;  %v7256_v35 = vpop.f32.mrb[249].mxu1  ;;  %v4005_v23 = vmul.f32 %v3984_v1, %v8263_v33  ;;  %v4020_v1 = vmul.f32 0.2, %v4013_v34 }
 0x848   :  { %v4017_v27 = vmul.f32 0.2, %v4010_v45  ;;  %v4018_v35 = vmul.f32 0.2, %v4011_v43 }
 0x849   :  { %7278 = vmatmul.mubr.msk.f32.gmra.mrb[246].mxu0 %vm509_vm2, %v3136_v28 }
 0x84a   :  { %v4919_v16 = vpop.f32.mrb[250].mxu1  ;;  %7280 = vmatprep.mubr.msk.f32.mxu0 %vm7533_vm0, %v10300_v5 }
 0x84b   :  { %v9957_v42 = vadd.f32 %v4919_v16, %v10358_v59  ;;  %v7259_v4 = vpop.f32.mrb[251].mxu1  ;;  %v4024_v16 = vmax.f32 %v4010_v45, %v4017_v27  ;;  %v4025_v59 = vmax.f32 %v4011_v43, %v4018_v35  ;;  %v4027_v45 = vmax.f32 %v4013_v34, %v4020_v1 }
 0x84d   :  { %7281 = vmatmul.mubr.msk.f32.gmra.mrb[248].mxu0 %vm509_vm2, %v3137_v15  ;;  %v4012_v15 = vadd.f32 %v4005_v23, %v8270_v38 }
 0x84e   :  { %v5131_v3 = vpop.f32.mrb[252].mxu1  ;;  %7283 = vmatprep.mubr.msk.f32.mxu0 %vm7533_vm0, %v10300_v5 }
 0x84f   :  { %v9967_v44 = vadd.f32 %v5131_v3, %v9637_v37  ;;  %v7299_v48 = vpop.f32.mrb[253].mxu1  ;;  %v4019_v4 = vmul.f32 0.2, %v4012_v15  ;;  %v4007_v3 = vmul.f32 %v3994_v2, %v8263_v33 }
 0x851   :  { %7284 = vmatmul.mubr.msk.f32.gmra.mrb[250].mxu0 %vm509_vm2, %v3138_v8  ;;  %v4026_v48 = vmax.f32 %v4012_v15, %v4019_v4  ;;  %v10361_v4 = vld [vmem:[#allocation13_spill] sm:$0xff] }
 0x852   :  { %v5136_v22 = vpop.f32.mrb[254].mxu1  ;;  %7286 = vmatprep.mubr.msk.f32.mxu0 %vm7533_vm0, %v10300_v5 }
 0x853   :  { %v9977_v25 = vadd.f32 %v5136_v22, %v9639_v19  ;;  %v7302_v37 = vpop.f32.mrb[255].mxu1  ;;  %v4014_v22 = vadd.f32 %v4007_v3, %v8270_v38 }
 0x855   :  { %7287 = vmatmul.mubr.msk.f32.gmra.mrb[252].mxu0 %vm509_vm2, %v3139_v57  ;;  %v4008_v57 = vmul.f32 %v3999_v24, %v8263_v33  ;;  %v4021_v37 = vmul.f32 0.2, %v4014_v22  ;;  %v10362_v24 = vld [vmem:[#allocation14_spill] sm:$0xff] }
 0x856   :  { %v5141_v28 = vpop.f32.mrb[0].mxu1  ;;  %7326 = vmatprep.mubr.msk.f32.mxu0 %vm7533_vm0, %v10300_v5 }
 0x857   :  { %v9987_v53 = vadd.f32 %v5141_v28, %v9641_v46  ;;  %v7305_v19 = vpop.f32.mrb[1].mxu1  ;;  %v4015_v43 = vadd.f32 %v4008_v57, %v8270_v38  ;;  %v4028_v33 = vmax.f32 %v4014_v22, %v4021_v37  ;;  %v10363_v22 = vld [vmem:[#allocation15_spill] sm:$0xff]  ;;  %v10364_v37 = vld [vmem:[#allocation16_spill] sm:$0xff] }
 0x859   :  { %7327 = vmatmul.mubr.msk.f32.vlgmr.msra.gmra.mrb[254].mxu0 %vm509_vm2, %v4023_v62 }
 0x85a   :  { %v5146_v11 = vpop.f32.mrb[2].mxu1  ;;  %7329 = vmatprep.mubr.msk.f32.mxu0 %vm7533_vm0, %v10300_v5 }
 0x85b   :  { %v9997_v32 = vadd.f32 %v5146_v11, %v9643_v13  ;;  %v7308_v46 = vpop.f32.mrb[3].mxu1 }
 0x85d   :  { %7330 = vmatmul.mubr.msk.f32.gmra.mrb[0].mxu0 %vm509_vm2, %v4024_v16 }
 0x85e   :  { %v5151_v8 = vpop.f32.mrb[4].mxu1  ;;  %7332 = vmatprep.mubr.msk.f32.mxu0 %vm7533_vm0, %v10300_v5 }
 0x85f   :  { %v10007_v55 = vadd.f32 %v5151_v8, %v9645_v14  ;;  %v7311_v13 = vpop.f32.mrb[5].mxu1 }
 0x861   :  { %7333 = vmatmul.mubr.msk.f32.gmra.mrb[2].mxu0 %vm509_vm2, %v4025_v59 }
 0x862   :  { %v5156_v39 = vpop.f32.mrb[6].mxu1  ;;  %7335 = vmatprep.mubr.msk.f32.mxu0 %vm7533_vm0, %v10300_v5 }
 0x863   :  { %v10015_v6 = vadd.f32 %v5156_v39, %v9647_v54  ;;  %v7314_v9 = vpop.f32.mrb[7].mxu1  ;;  %v4022_v54 = vmul.f32 0.2, %v4015_v43 }
 0x865   :  { %7336 = vmatmul.mubr.msk.f32.gmra.mrb[4].mxu0 %vm509_vm2, %v4026_v48  ;;  %v4029_v62 = vmax.f32 %v4015_v43, %v4022_v54 }
 0x866   :  { %v5161_v14 = vpop.f32.mrb[8].mxu1  ;;  %7338 = vmatprep.mubr.msk.f32.mxu0 %vm7533_vm0, %v10300_v5 }
 0x867   :  { %v10022_v23 = vadd.f32 %v5161_v14, %v9649_v40  ;;  %v7317_v28 = vpop.f32.mrb[9].mxu1 }
 0x869   :  { %7339 = vmatmul.mubr.msk.f32.gmra.mrb[6].mxu0 %vm509_vm2, %v4027_v45 }
 0x86a   :  { %7341 = vmatprep.mubr.msk.f32.mxu0 %vm7533_vm0, %v10300_v5 }
 0x86d   :  { %7342 = vmatmul.mubr.msk.f32.gmra.mrb[8].mxu0 %vm509_vm2, %v4028_v33 }
 0x86e   :  { %7344 = vmatprep.mubr.msk.f32.mxu0 %vm7533_vm0, %v10300_v5 }
 0x871   :  { %7345 = vmatmul.mubr.msk.f32.gmra.mrb[10].mxu0 %vm509_vm2, %v4029_v62 }
 0x8bc   :  { %v10031_v38 = vpop.f32.mrb[198].mxu0 }
 0x8bd   :  { %v7096_v40 = vpop.f32.mrb[199].mxu0 }
 0x8c0   :  { %v10033_v27 = vpop.f32.mrb[200].mxu0 }
 0x8c1   :  { %v7099_v49 = vpop.f32.mrb[201].mxu0 }
 0x8c4   :  { %v10035_v19 = vpop.f32.mrb[202].mxu0 }
 0x8c5   :  { %v7102_v35 = vpop.f32.mrb[203].mxu0 }
 0x8c8   :  { %v10037_v15 = vpop.f32.mrb[204].mxu0 }
 0x8c9   :  { %v7105_v11 = vpop.f32.mrb[205].mxu0 }
 0x8cc   :  { %v10039_v16 = vpop.f32.mrb[206].mxu0 }
 0x8cd   :  { %v7108_v10 = vpop.f32.mrb[207].mxu0 }
 0x8d0   :  { %v10041_v31 = vpop.f32.mrb[208].mxu0 }
 0x8d1   :  { %v7111_v5 = vpop.f32.mrb[209].mxu0 }
 0x8d4   :  { %v10043_v2 = vpop.f32.mrb[210].mxu0 }
 0x8d5   :  { %v7114_v46 = vpop.f32.mrb[211].mxu0 }
 0x8d8   :  { %v4526_v59 = vpop.f32.mrb[212].mxu0 }
 0x8d9   :  { %v4527_v8 = vadd.f32 %v4526_v59, %v10361_v4  ;;  %v7154_v34 = vpop.f32.mrb[213].mxu0 }
 0x8db   :  { %v5286_v3 = vadd.f32 %v4527_v8, %v9716_v21  ;;  %v10365_v21 = vld [vmem:[#allocation17_spill] sm:$0xff] }
 0x8dc   :  { %v4531_v20 = vpop.f32.mrb[214].mxu0 }
 0x8dd   :  { %v4532_v13 = vadd.f32 %v4531_v20, %v10362_v24  ;;  %v7157_v48 = vpop.f32.mrb[215].mxu0 }
 0x8df   :  { %v5287_v39 = vadd.f32 %v4532_v13, %v9726_v41  ;;  %v10366_v41 = vld [vmem:[#allocation18_spill] sm:$0xff] }
 0x8e0   :  { %v4536_v1 = vpop.f32.mrb[216].mxu0 }
 0x8e1   :  { %v4537_v57 = vadd.f32 %v4536_v1, %v10363_v22  ;;  %v7160_v9 = vpop.f32.mrb[217].mxu0  ;;  %v10369_v1 = vld [vmem:[#allocation28_spill] sm:$0xff] }
 0x8e3   :  { %v5288_v14 = vadd.f32 %v4537_v57, %v9742_v36  ;;  %v10367_v36 = vld [vmem:[#allocation19_spill] sm:$0xff] }
 0x8e4   :  { %v4541_v45 = vpop.f32.mrb[218].mxu0 }
 0x8e5   :  { %v4542_v43 = vadd.f32 %v4541_v45, %v10364_v37  ;;  %v7163_v28 = vpop.f32.mrb[219].mxu0  ;;  %v10370_v37 = vld [vmem:[#allocation29_spill] sm:$0xff] }
 0x8e7   :  { %v5289_v33 = vadd.f32 %v4542_v43, %v9758_v63  ;;  %v10368_v63 = vld [vmem:[#allocation27_spill] sm:$0xff] }
 0x8e8   :  { %v4546_v54 = vpop.f32.mrb[220].mxu0 }
 0x8e9   :  { %v4547_v62 = vadd.f32 %v4546_v54, %v10365_v21  ;;  %v7166_v40 = vpop.f32.mrb[221].mxu0 }
 0x8eb   :  { %v5290_v49 = vadd.f32 %v4547_v62, %v9769_v52 }
 0x8ec   :  { %v4551_v35 = vpop.f32.mrb[222].mxu0 }
 0x8ed   :  { %v4552_v11 = vadd.f32 %v4551_v35, %v10366_v41  ;;  %v7169_v10 = vpop.f32.mrb[223].mxu0 }
 0x8ef   :  { %v5291_v5 = vadd.f32 %v4552_v11, %v9778_v56 }
 0x8f0   :  { %v4556_v46 = vpop.f32.mrb[224].mxu0 }
 0x8f1   :  { %v4557_v59 = vadd.f32 %v4556_v46, %v10367_v36  ;;  %v7172_v4 = vpop.f32.mrb[225].mxu0 }
 0x8f3   :  { %v5292_v8 = vadd.f32 %v4557_v59, %v9787_v26 }
 0x8f4   :  { %v4768_v34 = vpop.f32.mrb[226].mxu0 }
 0x8f5   :  { %v4769_v20 = vadd.f32 %v4768_v34, %v10368_v63  ;;  %v7212_v24 = vpop.f32.mrb[227].mxu0 }
 0x8f7   :  { %v5293_v13 = vadd.f32 %v4769_v20, %v9797_v17  ;;  %v10371_v17 = vld [vmem:[#allocation30_spill] sm:$0xff] }
 0x8f8   :  { %v4773_v48 = vpop.f32.mrb[228].mxu0 }
 0x8f9   :  { %v10061_v52 = vadd.f32 %v5293_v13, %v5286_v3  ;;  %v4774_v22 = vadd.f32 %v4773_v48, %v10369_v1  ;;  %v7215_v57 = vpop.f32.mrb[229].mxu0  ;;  %v7535_v13 = vmov 0  }
 0x8fa   :  { %7499 = vset.pattern.permute.xlu1 %v7535_v13  ;;  %7500 = vset.pattern.permute.xlu0 %v7535_v13 }
 0x8fb   :  { %v5294_v56 = vadd.f32 %v4774_v22, %v9809_v0  ;;  %v10372_v0 = vld [vmem:[#allocation31_spill] sm:$0xff] }
 0x8fc   :  { %v4778_v9 = vpop.f32.mrb[230].mxu0 }
 0x8fd   :  { %v10065_v45 = vadd.f32 %v5294_v56, %v5287_v39  ;;  %v4779_v43 = vadd.f32 %v4778_v9, %v10370_v37  ;;  %v7218_v26 = vpop.f32.mrb[231].mxu0  ;;  %v10376_v56 = vld [vmem:[#allocation49_spill] sm:$0xff] }
 0x8fe   :  { %v10377_v26 = vld [vmem:[#allocation50_spill] sm:$0xff] }
 0x8ff   :  { %v5295_v28 = vadd.f32 %v4779_v43, %v9826_v12  ;;  %v10373_v12 = vld [vmem:[#allocation32_spill] sm:$0xff] }
 0x900   :  { %v4783_v54 = vpop.f32.mrb[232].mxu0 }
 0x901   :  { %v10069_v21 = vadd.f32 %v5295_v28, %v5288_v14  ;;  %v4784_v62 = vadd.f32 %v4783_v54, %v10371_v17  ;;  %v7221_v3 = vpop.f32.mrb[233].mxu0 }
 0x903   :  { %v5296_v40 = vadd.f32 %v4784_v62, %v9842_v61  ;;  %v10374_v61 = vld [vmem:[#allocation33_spill] sm:$0xff] }
 0x904   :  { %v4788_v35 = vpop.f32.mrb[234].mxu0 }
 0x905   :  { %v10073_v41 = vadd.f32 %v5296_v40, %v5289_v33  ;;  %v4789_v11 = vadd.f32 %v4788_v35, %v10372_v0  ;;  %v7224_v39 = vpop.f32.mrb[235].mxu0 }
 0x907   :  { %v5297_v10 = vadd.f32 %v4789_v11, %v9853_v7 }
 0x908   :  { %v4793_v46 = vpop.f32.mrb[236].mxu0 }
 0x909   :  { %v10077_v36 = vadd.f32 %v5297_v10, %v5290_v49  ;;  %v4794_v59 = vadd.f32 %v4793_v46, %v10373_v12  ;;  %v7227_v14 = vpop.f32.mrb[237].mxu0  ;;  %v10375_v49 = vld [vmem:[#allocation48_spill] sm:$0xff] }
 0x90a   :  { %v10381_v14 = vld [vmem:[#allocation54_spill] sm:$0xff] }
 0x90b   :  { %v5298_v4 = vadd.f32 %v4794_v59, %v9864_v60 }
 0x90c   :  { %v4798_v34 = vpop.f32.mrb[238].mxu0 }
 0x90d   :  { %v10081_v63 = vadd.f32 %v5298_v4, %v5291_v5  ;;  %v4799_v20 = vadd.f32 %v4798_v34, %v10374_v61  ;;  %v7230_v33 = vpop.f32.mrb[239].mxu0 }
 0x90f   :  { %v5299_v24 = vadd.f32 %v4799_v20, %v9874_v29 }
 0x910   :  { %v5010_v7 = vpop.f32.mrb[240].mxu0 }
 0x911   :  { %v10085_v48 = vadd.f32 %v5299_v24, %v5292_v8  ;;  %v5011_v1 = vadd.f32 %v5010_v7, %v10375_v49  ;;  %v7270_v22 = vpop.f32.mrb[241].mxu0  ;;  %v10378_v8 = vld [vmem:[#allocation51_spill] sm:$0xff] }
 0x913   :  { %v5300_v57 = vadd.f32 %v5011_v1, %v9884_v58  ;;  %v10379_v58 = vld [vmem:[#allocation52_spill] sm:$0xff] }
 0x914   :  { %v5015_v60 = vpop.f32.mrb[242].mxu0 }
 0x915   :  { %v5016_v5 = vadd.f32 %v5015_v60, %v10376_v56  ;;  %v7273_v9 = vpop.f32.mrb[243].mxu0 }
 0x917   :  { %v5301_v37 = vadd.f32 %v5016_v5, %v9894_v51  ;;  %v10380_v51 = vld [vmem:[#allocation53_spill] sm:$0xff] }
 0x918   :  { %v5020_v43 = vpop.f32.mrb[244].mxu0 }
 0x919   :  { %v5021_v29 = vadd.f32 %v5020_v43, %v10377_v26  ;;  %v7276_v28 = vpop.f32.mrb[245].mxu0 }
 0x91b   :  { %v5302_v54 = vadd.f32 %v5021_v29, %v9910_v47 }
 0x91c   :  { %v5025_v17 = vpop.f32.mrb[246].mxu0 }
 0x91d   :  { %v5026_v62 = vadd.f32 %v5025_v17, %v10378_v8  ;;  %v7279_v3 = vpop.f32.mrb[247].mxu0 }
 0x91f   :  { %v5303_v40 = vadd.f32 %v5026_v62, %v9926_v18 }
 0x920   :  { %v5030_v35 = vpop.f32.mrb[248].mxu0 }
 0x921   :  { %v5031_v0 = vadd.f32 %v5030_v35, %v10379_v58  ;;  %v7282_v11 = vpop.f32.mrb[249].mxu0 }
 0x923   :  { %v5304_v39 = vadd.f32 %v5031_v0, %v9937_v30 }
 0x924   :  { %v5035_v10 = vpop.f32.mrb[250].mxu0 }
 0x925   :  { %v5036_v46 = vadd.f32 %v5035_v10, %v10380_v51  ;;  %v7285_v12 = vpop.f32.mrb[251].mxu0 }
 0x927   :  { %v10099_v59 = vadd.f32 %v5036_v46, %v9947_v50  ;;  %v10111_v50 = vld [vmem:[%s10266_s7] ss:$0 sm:$0xff] }
 0x928   :  { %v5040_v47 = vpop.f32.mrb[252].mxu0 }
 0x929   :  { %v5041_v4 = vadd.f32 %v5040_v47, %v10381_v14  ;;  %v7288_v34 = vpop.f32.mrb[253].mxu0 }
 0x92b   :  { %v10103_v61 = vadd.f32 %v5041_v4, %v9957_v42 }
 0x92c   :  { %v5252_v18 = vpop.f32.mrb[254].mxu0 }
 0x92d   :  { %v5253_v20 = vadd.f32 %v5252_v18, %v10031_v38  ;;  %v7328_v33 = vpop.f32.mrb[255].mxu0 }
 0x92f   :  { %v5307_v30 = vadd.f32 %v5253_v20, %v9967_v44 }
 0x930   :  { %v5257_v24 = vpop.f32.mrb[0].mxu0 }
 0x931   :  { %v5321_v13 = vadd.f32 %v5307_v30, %v5300_v57  ;;  %v5258_v7 = vadd.f32 %v5257_v24, %v10033_v27  ;;  %v7331_v49 = vpop.f32.mrb[1].mxu0 }
 0x933   :  { %v5328_v1 = vadd.f32 %v5321_v13, %v10061_v52  ;;  %v5308_v42 = vadd.f32 %v5258_v7, %v9977_v25 }
 0x934   :  { %v5262_v22 = vpop.f32.mrb[2].mxu0 }
 0x935   :  { %v10116_v38 = vadd.f32 %v10111_v50, %v5328_v1  ;;  %v5322_v60 = vadd.f32 %v5308_v42, %v5301_v37  ;;  %v5263_v44 = vadd.f32 %v5262_v22, %v10035_v19  ;;  %v7334_v57 = vpop.f32.mrb[3].mxu0 }
 0x937   :  { %v5329_v27 = vadd.f32 %v5322_v60, %v10065_v45  ;;  %v5309_v56 = vadd.f32 %v5263_v44, %v9987_v53  ;;  %v5371_v5 = vmul.f32 %v10116_v38, %v10116_v38  ;;  %v5350_v19 = vsel %vm5349_vm4, %v10116_v38, 0.0 }
 0x938   :  { %v5267_v9 = vpop.f32.mrb[4].mxu0 }
 0x939   :  { %v10124_v52 = vadd.f32 %v10111_v50, %v5329_v27  ;;  %v5323_v25 = vadd.f32 %v5309_v56, %v5302_v54  ;;  %v5268_v43 = vadd.f32 %v5267_v9, %v10037_v15  ;;  %v7337_v26 = vpop.f32.mrb[5].mxu0  ;;  %v5378_v28 = vsel %vm5349_vm4, %v5371_v5, 0.0 }
 0x93b   :  { %v5351_v37 = vsel %vm5349_vm4, %v10124_v52, 0.0  ;;  %v5372_v53 = vmul.f32 %v10124_v52, %v10124_v52  ;;  %v5330_v45 = vadd.f32 %v5323_v25, %v10069_v21  ;;  %v5310_v29 = vadd.f32 %v5268_v43, %v9997_v32 }
 0x93c   :  { %v5352_v17 = vadd.f32 %v5351_v37, %v5350_v19  ;;  %v5272_v54 = vpop.f32.mrb[6].mxu0 }
 0x93d   :  { %v5379_v15 = vsel %vm5349_vm4, %v5372_v53, 0.0  ;;  %v10138_v8 = vadd.f32 %v10111_v50, %v5330_v45  ;;  %v5324_v62 = vadd.f32 %v5310_v29, %v5303_v40  ;;  %v5273_v3 = vadd.f32 %v5272_v54, %v10039_v16  ;;  %v7340_v35 = vpop.f32.mrb[7].mxu0 }
 0x93e   :  { %v5380_v58 = vadd.f32 %v5379_v15, %v5378_v28 }
 0x93f   :  { %v5353_v0 = vsel %vm5349_vm4, %v10138_v8, 0.0  ;;  %v5373_v32 = vmul.f32 %v10138_v8, %v10138_v8  ;;  %v5331_v21 = vadd.f32 %v5324_v62, %v10073_v41  ;;  %v5311_v11 = vadd.f32 %v5273_v3, %v10007_v55 }
 0x940   :  { %v5354_v10 = vadd.f32 %v5353_v0, %v5352_v17  ;;  %v5277_v51 = vpop.f32.mrb[8].mxu0 }
 0x941   :  { %v5381_v46 = vsel %vm5349_vm4, %v5373_v32, 0.0  ;;  %v10149_v40 = vadd.f32 %v10111_v50, %v5331_v21  ;;  %v5325_v16 = vadd.f32 %v5311_v11, %v5304_v39  ;;  %v5278_v12 = vadd.f32 %v5277_v51, %v10041_v31  ;;  %v7343_v47 = vpop.f32.mrb[9].mxu0 }
 0x942   :  { %v5382_v14 = vadd.f32 %v5381_v46, %v5380_v58  ;;  %v5408_v47 = vld [vmem:[%s10267_s8] sm:$0x1] }
 0x943   :  { %v5355_v4 = vsel %vm5349_vm4, %v10149_v40, 0.0  ;;  %v5374_v41 = vmul.f32 %v10149_v40, %v10149_v40  ;;  %v5332_v55 = vadd.f32 %v5325_v16, %v10077_v36  ;;  %v5312_v34 = vadd.f32 %v5278_v12, %v10015_v6 }
 0x944   :  { %v5356_v18 = vadd.f32 %v5355_v4, %v5354_v10  ;;  %v5282_v20 = vpop.f32.mrb[10].mxu0  ;;  %v10382_v4 = vld [vmem:[#allocation7_spill] sm:$0xff] }
 0x945   :  { %v5383_v33 = vsel %vm5349_vm4, %v5374_v41, 0.0  ;;  %v10160_v39 = vadd.f32 %v10111_v50, %v5332_v55  ;;  %v5326_v31 = vadd.f32 %v5312_v34, %v10099_v59  ;;  %v5283_v30 = vadd.f32 %v5282_v20, %v10043_v2  ;;  %v7346_v24 = vpop.f32.mrb[11].mxu0 }
 0x946   :  { %v5384_v13 = vadd.f32 %v5383_v33, %v5382_v14 }
 0x947   :  { %v5357_v7 = vsel %vm5349_vm4, %v10160_v39, 0.0  ;;  %v5375_v36 = vmul.f32 %v10160_v39, %v10160_v39  ;;  %v5333_v6 = vadd.f32 %v5326_v31, %v10081_v63  ;;  %v5313_v49 = vadd.f32 %v5283_v30, %v10022_v23 }
 0x948   :  { %v5358_v1 = vadd.f32 %v5357_v7, %v5356_v18  ;;  %v5453_v7 = vld [vmem:[%s10269_s10] sm:$0xff] }
 0x949   :  { %v5385_v42 = vsel %vm5349_vm4, %v5375_v36, 0.0  ;;  %v5347_v22 = vadd.f32 %v10111_v50, %v5333_v6  ;;  %v5327_v59 = vadd.f32 %v5313_v49, %v10103_v61 }
 0x94a   :  { %v5386_v2 = vadd.f32 %v5385_v42, %v5384_v13  ;;  %v5455_v13 = vld [vmem:[%s10269_s10 + $0x10] sm:$0xff] }
 0x94b   :  { %v5359_v60 = vsel %vm5349_vm4, %v5347_v22, 0.0  ;;  %v5376_v44 = vmul.f32 %v5347_v22, %v5347_v22  ;;  %v5334_v57 = vadd.f32 %v5327_v59, %v10085_v48 }
 0x94c   :  { %v5360_v27 = vadd.f32 %v5359_v60, %v5358_v1 }
 0x94d   :  { %v5387_v56 = vsel %vm5349_vm4, %v5376_v44, 0.0  ;;  %v5348_v63 = vadd.f32 %v10111_v50, %v5334_v57 }
 0x94e   :  { %v5388_v23 = vadd.f32 %v5387_v56, %v5386_v2  ;;  %v5456_v56 = vld [vmem:[%s10269_s10 + $0x18] sm:$0xff] }
 0x94f   :  { %v5362_v5 = vsel %vm5361_vm5, %v5348_v63, 0.0  ;;  %v5377_v9 = vmul.f32 %v5348_v63, %v5348_v63 }
 0x950   :  { %v5363_v25 = vadd.f32 %v5362_v5, %v5360_v27 }
 0x951   :  { %v5389_v43 = vsel %vm5361_vm5, %v5377_v9, 0.0 }
 0x952   :  { %v5364_v61 = vrot.slane %v5363_v25, 4  ;;  %v5390_v26 = vadd.f32 %v5389_v43, %v5388_v23  ;;  %v5454_v23 = vld [vmem:[%s10269_s10 + $0x8] sm:$0xff] }
 0x954   :  { %v5365_v19 = vadd.f32 %v5364_v61, %v5363_v25  ;;  %v5391_v37 = vrot.slane %v5390_v26, 4 }
 0x956   :  { %v5366_v53 = vrot.slane %v5365_v19, 2  ;;  %v5392_v45 = vadd.f32 %v5391_v37, %v5390_v26 }
 0x958   :  { %v5367_v48 = vadd.f32 %v5366_v53, %v5365_v19  ;;  %v5393_v29 = vrot.slane %v5392_v45, 2 }
 0x95a   :  { %v5368_v28 = vrot.slane %v5367_v48, 1  ;;  %v5394_v17 = vadd.f32 %v5393_v29, %v5392_v45  ;;  %v5458_v45 = vld [vmem:[%s10269_s10 + $0x28] sm:$0xff] }
 0x95c   :  { %v5369_v54 = vadd.f32 %v5368_v28, %v5367_v48  ;;  %v5395_v15 = vrot.slane %v5394_v17, 1  ;;  %v5457_v48 = vld [vmem:[%s10269_s10 + $0x20] sm:$0xff] }
 0x95e   :  { %v5370_v50 = vmul.f32 0.02, %v5369_v54  ;;  %v5396_v62 = vadd.f32 %v5395_v15, %v5394_v17 }
 0x960   :  { %v5397_v3 = vmul.f32 0.02, %v5396_v62  ;;  %v5398_v35 = vmul.f32 %v5370_v50, %v5370_v50  ;;  %v5403_v58 = vsub.f32 %v10138_v8, %v5370_v50  ;;  %v5401_v0 = vsub.f32 %v10116_v38, %v5370_v50 }
 0x961   :  { %v5404_v32 = vsub.f32 %v10149_v40, %v5370_v50  ;;  %v5402_v21 = vsub.f32 %v10124_v52, %v5370_v50  ;;  %v5406_v11 = vsub.f32 %v5347_v22, %v5370_v50  ;;  %v5405_v10 = vsub.f32 %v10160_v39, %v5370_v50  ;;  %v5984_v52 = vld [vmem:[%s10268_s9] ss:$0 sm:$0xff] }
 0x962   :  { %v5399_v51 = vsub.f32 %v5397_v3, %v5398_v35  ;;  %v5407_v46 = vsub.f32 %v5348_v63, %v5370_v50  ;;  %v5459_v50 = vld [vmem:[%s10269_s10 + $0x30] sm:$0x3] }
 0x964   :  { %v5400_v16 = vmax.f32 %v5399_v51, 0.0  ;;  %v5489_v51 = vld [vmem:[%s10270_s11 + $0x8] sm:$0xff] }
 0x966   :  { %v5409_v12 = vadd.f32 1e-05, %v5400_v16  ;;  %v5491_v16 = vld [vmem:[%s10270_s11 + $0x18] sm:$0xff] }
 0x968   :  { %7503 = vrsqrt.f32 %v5409_v12 }
 0x972   :  { %v7504_v14 = vpop.eup %7503 }
 0x973   :  { %v5411_v8 = vmul.f32 %v7504_v14, %v5408_v47 }
 0x975   :  { %v5416_v38 = vrot.slane %v5411_v8, %v10382_v4 }
 0x977   :  { %v5420_v40 = vmul.f32 %v5416_v38, %v5403_v58  ;;  %v5418_v41 = vmul.f32 %v5416_v38, %v5401_v0  ;;  %v5421_v55 = vmul.f32 %v5416_v38, %v5404_v32  ;;  %v5419_v34 = vmul.f32 %v5416_v38, %v5402_v21  ;;  %v5523_v0 = vld [vmem:[#allocation2] sm:$0x1] }
 0x978   :  { %v5423_v18 = vmul.f32 %v5416_v38, %v5406_v11  ;;  %v5422_v20 = vmul.f32 %v5416_v38, %v5405_v10  ;;  %v5424_v33 = vmul.f32 %v5416_v38, %v5407_v46  ;;  %v5488_v21 = vld [vmem:[%s10270_s11] sm:$0xff]  ;;  %v5490_v10 = vld [vmem:[%s10270_s11 + $0x10] sm:$0xff] }
 0x979   :  { %v5434_v39 = vadd.f32 %v5984_v52, %v5420_v40  ;;  %v5432_v31 = vadd.f32 %v5984_v52, %v5418_v41  ;;  %v5435_v30 = vadd.f32 %v5984_v52, %v5421_v55  ;;  %v5433_v24 = vadd.f32 %v5984_v52, %v5419_v34  ;;  %v5492_v38 = vld [vmem:[%s10270_s11 + $0x20] sm:$0xff]  ;;  %v5493_v34 = vld [vmem:[%s10270_s11 + $0x28] sm:$0xff] }
 0x97a   :  { %v5437_v36 = vadd.f32 %v5984_v52, %v5423_v18  ;;  %v5436_v6 = vadd.f32 %v5984_v52, %v5422_v20  ;;  %v5438_v60 = vadd.f32 %v5984_v52, %v5424_v33 }
 0x97b   :  { %v5441_v49 = vmul.f32 0.2, %v5434_v39  ;;  %v5439_v1 = vmul.f32 0.2, %v5432_v31  ;;  %v5442_v42 = vmul.f32 0.2, %v5435_v30 }
 0x97c   :  { %v5440_v22 = vmul.f32 0.2, %v5433_v24  ;;  %v5444_v59 = vmul.f32 0.2, %v5437_v36  ;;  %v5443_v2 = vmul.f32 0.2, %v5436_v6 }
 0x97d   :  { %v5448_v44 = vmax.f32 %v5434_v39, %v5441_v49  ;;  %v5446_v57 = vmax.f32 %v5432_v31, %v5439_v1  ;;  %v5449_v27 = vmax.f32 %v5435_v30, %v5442_v42  ;;  %v5445_v61 = vmul.f32 0.2, %v5438_v60  ;;  %v5494_v30 = vld [vmem:[%s10270_s11 + $0x30] sm:$0x3]  ;;  %s7536_s11 = smov [#allocation3]  }
 0x97e   :  { %v5447_v63 = vmax.f32 %v5433_v24, %v5440_v22  ;;  %v5451_v25 = vmax.f32 %v5437_v36, %v5444_v59  ;;  %v5450_v43 = vmax.f32 %v5436_v6, %v5443_v2  ;;  %s5542_s17 = sshll.u32 %s7536_s11, 4  ;;  %s5543_s17 = int_to_ptr.vmem [resolvable:$true] %s5542_s17 }
 0x97f   :  { %v5462_v5 = vmul.f32 %v5455_v13, %v5448_v44  ;;  %v5460_v9 = vmul.f32 %v5453_v7, %v5446_v57  ;;  %v5463_v37 = vmul.f32 %v5456_v56, %v5449_v27  ;;  %v5452_v29 = vmax.f32 %v5438_v60, %v5445_v61  ;;  %s7508_s8 = scalar_lea.vmem %s5543_s17, 16  ;;  %s7512_s18 = scalar_lea.vmem %s5543_s17, 32 }
 0x980   :  { %v5461_v53 = vmul.f32 %v5454_v23, %v5447_v63  ;;  %v5465_v54 = vmul.f32 %v5458_v45, %v5451_v25  ;;  %v5464_v15 = vmul.f32 %v5457_v48, %v5450_v43  ;;  %p7509_p0 = scmp.ne.s32.totalorder %s5543_s17, %s7508_s8  ;;  %p7513_p1 = scmp.lt.s32.totalorder %s5543_s17, %s5543_s17 }
 0x981   :  { %v5473_v26 = vsel %vm5349_vm4, %v5462_v5, 0.0  ;;  %v5467_v19 = vsel %vm5349_vm4, %v5460_v9, 0.0  ;;  %v5476_v28 = vsel %vm5349_vm4, %v5463_v37, 0.0  ;;  %v5466_v35 = vmul.f32 %v5459_v50, %v5452_v29  ;;  %p7514_p2 = scmp.lt.s32.totalorder %s7512_s18, %s7508_s8 }
 0x982   :  { %5474 = vadd.xlane.f32.xlu1 %v5473_v26  ;;  %5468 = vadd.xlane.f32.xlu0 %v5467_v19  ;;  %v5470_v17 = vsel %vm5349_vm4, %v5461_v53, 0.0  ;;  %v5482_v62 = vsel %vm5349_vm4, %v5465_v54, 0.0  ;;  %v5479_v3 = vsel %vm5349_vm4, %v5464_v15, 0.0 }
 0x983   :  { %v5485_v58 = vsel %vm5361_vm5, %v5466_v35, 0.0  ;;  %p7515_p3 = por %p7514_p2, %p7513_p1 }
 0x985   :  { %p7516_p4 = pnand %p7515_p3, %p7509_p0 }
 0x986   :  { %5477 = vadd.xlane.f32.xlu1 %v5476_v28  ;;  %5471 = vadd.xlane.f32.xlu0 %v5470_v17 }
 0x98a   :  { %5483 = vadd.xlane.f32.xlu1 %v5482_v62  ;;  %5480 = vadd.xlane.f32.xlu0 %v5479_v3 }
 0x98e   :  { %5486 = vadd.xlane.f32.xlu0 %v5485_v58 }
 0x99b   :  { %5526 = vperm.xlu1 %7499, %v5523_v0  }
 0xa0f   :  { %v5475_v32 = vpop.xlane.xlu1 %5474  ;;  %v5469_v11 = vpop.xlane.xlu0 %5468 }
 0xa10   :  { %v5495_v46 = vmul.f32 %v5488_v21, %v5469_v11  ;;  %v5497_v14 = vmul.f32 %v5490_v10, %v5475_v32 }
 0xa12   :  { %v5503_v52 = vsel %vm5502_vm6, %v5495_v46, 0.0  ;;  %v5506_v33 = vsel %vm5502_vm6, %v5497_v14, 0.0 }
 0xa13   :  { %v5478_v12 = vpop.xlane.xlu1 %5477  ;;  %v5472_v47 = vpop.xlane.xlu0 %5471 }
 0xa14   :  { %v5496_v8 = vmul.f32 %v5489_v51, %v5472_v47  ;;  %v5498_v40 = vmul.f32 %v5491_v16, %v5478_v12 }
 0xa16   :  { %v5504_v41 = vsel %vm5502_vm6, %v5496_v8, 0.0  ;;  %v5508_v24 = vsel %vm5502_vm6, %v5498_v40, 0.0 }
 0xa17   :  { %v5505_v55 = vadd.f32 %v5504_v41, %v5503_v52  ;;  %v5484_v18 = vpop.xlane.xlu1 %5483  ;;  %v5481_v20 = vpop.xlane.xlu0 %5480 }
 0xa18   :  { %v5499_v39 = vmul.f32 %v5492_v38, %v5481_v20  ;;  %v5500_v13 = vmul.f32 %v5493_v34, %v5484_v18 }
 0xa19   :  { %v5507_v31 = vadd.f32 %v5506_v33, %v5505_v55 }
 0xa1a   :  { %v5510_v6 = vsel %vm5502_vm6, %v5499_v39, 0.0  ;;  %v5512_v42 = vsel %vm5502_vm6, %v5500_v13, 0.0 }
 0xa1b   :  { %v5509_v7 = vadd.f32 %v5508_v24, %v5507_v31  ;;  %v5487_v36 = vpop.xlane.xlu0 %5486  ;;  %v5527_v27 = vpop.permute.xlu1 %5526 }
 0xa1c   :  { %v5501_v49 = vmul.f32 %v5494_v30, %v5487_v36  ;;  %v5532_v23 = vrot.slane %v5527_v27, %v10382_v4 }
 0xa1d   :  { %v5511_v1 = vadd.f32 %v5510_v6, %v5509_v7 }
 0xa1e   :  { %v5515_v59 = vsel %vm5514_vm7, %v5501_v49, 0.0 }
 0xa1f   :  { %v5513_v22 = vadd.f32 %v5512_v42, %v5511_v1 }
 0xa21   :  { %v5516_v2 = vadd.f32 %v5515_v59, %v5513_v22 }
 0xa23   :  { %v5517_v60 = vrot.slane %v5516_v2, 4 }
 0xa25   :  { %v5518_v44 = vadd.f32 %v5517_v60, %v5516_v2 }
 0xa27   :  { %v5519_v57 = vrot.slane %v5518_v44, 2 }
 0xa29   :  { %v5520_v56 = vadd.f32 %v5519_v57, %v5518_v44 }
 0xa2b   :  { %v5521_v63 = vrot.slane %v5520_v56, 1 }
 0xa2d   :  { %v5522_v5 = vadd.f32 %v5521_v63, %v5520_v56 }
 0xa2f   :  { %v5533_v9 = vadd.f32 %v5532_v23, %v5522_v5 }
 0xa31   :  { %5535 = vst.msk [vmem:[#allocation3] sm:$0x1] %vm5534_vm8, %v5533_v9 }
 0xa32   :  { %7519 = shalt.err (!%p7516_p4)
}
 0xa33   :  { %s7520_s9 = scalar_lea.hbm %s10272_s13, 16 }
 0xa34   :  { %p7521_p5 = scmp.ne.s32.totalorder %s10272_s13, %s7520_s9  ;;  %p7524_p6 = scmp.lt.u32.totalorder %s7520_s9, %s10272_s13 }
 0xa36   :  { %p7526_p7 = pnand %p7524_p6, %p7521_p5 }
 0xa38   :  { %7529 = shalt.err (!%p7526_p7)
}
 0xa39   :  { %5545 = dma.vmem_to_hbm [thread:$0]  %s5543_s17, 16, %s10272_s13, [#allocation4]  }
 0xa3a   :  { %7530 = dma.done.wait [#allocation4], 16  }
 0xa3b   :  { %7531 = vsyncadd [#allocation4], 4294967280 }
 0xa3c   :  { %5549 = vsyncpa [#allocation4], 1 }

</bundles_post_ra>
